<compile_context>
chip_gen: v7x
topology: tpu7x:2x2x1
jax: 0.10.0
libtpu: 0.0.40
codegen_flags: <defaults>
</compile_context>

<pallas_src>
import functools

import jax
import jax.numpy as jnp
from jax.experimental import pallas as pl
from jax.experimental.pallas import tpu as pltpu  # noqa: F401 (TPU backend)


def _full_spec(shape):
    """Whole-array BlockSpec (no grid -> zero-arg index_map)."""
    nd = len(shape)

    def idx():
        return (0,) * nd

    return pl.BlockSpec(shape, idx)


# --------------- generic single-block matmul (+bias, +optional ReLU) ---------------
def _matmul_kernel(x_ref, w_ref, b_ref, o_ref, *, apply_relu):
    acc = jnp.dot(x_ref[...], w_ref[...], preferred_element_type=jnp.float32)
    acc = acc + b_ref[...]            # (M,N) + (1,N) broadcast, f32
    if apply_relu:
        acc = jnp.maximum(acc, 0.0)
    o_ref[...] = acc.astype(o_ref.dtype)


def pallas_matmul_bias(x, w, b, *, relu, out_dtype):
    M, K = x.shape
    K2, N = w.shape
    assert K == K2
    return pl.pallas_call(
        functools.partial(_matmul_kernel, apply_relu=relu),
        out_shape=jax.ShapeDtypeStruct((M, N), out_dtype),
        in_specs=[_full_spec((M, K)), _full_spec((K, N)), _full_spec((1, N))],
        out_specs=_full_spec((M, N)),
    )(x, w, b)


# --------------- conv: NHWC im2col + one MXU matmul (bf16, f32 acc) ---------------
def conv2d_relu_nhwc(x, w2, b, kh, kw, stride):
    """x: (N,H,W,C) bf16; w2: (kh*kw*C [padded], out_ch) bf16; b: (1,out_ch) f32."""
    N, H, W, C = x.shape
    OH = (H - kh) // stride + 1
    OW = (W - kw) // stride + 1
    cols = []
    for i in range(kh):
        for j in range(kw):
            cols.append(x[:, i:i + stride * OH:stride, j:j + stride * OW:stride, :])
    # feature order = (kh, kw, C); matches weight permutation in prepare_params
    patches = jnp.stack(cols, axis=3).reshape(N * OH * OW, kh * kw * C)
    Kp = w2.shape[0]
    if Kp > patches.shape[1]:                       # conv3: 576 -> 640 lane padding
        patches = jnp.pad(patches, ((0, 0), (0, Kp - patches.shape[1])))
    out_ch = w2.shape[1]
    y = pallas_matmul_bias(patches, w2, b, relu=True, out_dtype=jnp.bfloat16)
    return y.reshape(N, OH, OW, out_ch)             # stays NHWC, no transpose


# --------------- fused FC trunk: 6 linear layers in one pallas_call ---------------
def _trunk_kernel(vec_ref, img_ref,
                  wv_ref, bv_ref, wi_ref, bi_ref,
                  w1v_ref, w1i_ref, b1_ref,
                  w2_ref, b2_ref,
                  wa1_ref, ba1_ref,
                  wa2_ref, ba2_ref,
                  o_ref):
    f32 = jnp.float32
    bf16 = jnp.bfloat16
    # vector_fc / image_fc (no activation, matches the PyTorch module)
    vf = jnp.dot(vec_ref[...], wv_ref[...], preferred_element_type=f32) + bv_ref[...]
    imf = jnp.dot(img_ref[...], wi_ref[...], preferred_element_type=f32) + bi_ref[...]
    # fc1 on the implicit concat([vf, imf]) via split weight halves
    h = (jnp.dot(vf.astype(bf16), w1v_ref[...], preferred_element_type=f32)
         + jnp.dot(imf.astype(bf16), w1i_ref[...], preferred_element_type=f32)
         + b1_ref[...])
    h = jnp.maximum(h, 0.0)
    # fc2
    h = jnp.maximum(
        jnp.dot(h.astype(bf16), w2_ref[...], preferred_element_type=f32) + b2_ref[...],
        0.0)
    # fc_action1
    a = jnp.maximum(
        jnp.dot(h.astype(bf16), wa1_ref[...], preferred_element_type=f32) + ba1_ref[...],
        0.0)
    # fc_action2 (lane-dense N=128, cols 5..127 are zero-padded weights/bias)
    q = jnp.dot(a.astype(bf16), wa2_ref[...], preferred_element_type=f32) + ba2_ref[...]
    o_ref[...] = q


def fused_trunk(vec_p, img_p, p):
    MP = vec_p.shape[0]
    args = [vec_p, img_p,
            p["Wv"], p["bv"], p["Wi"], p["bi"],
            p["W1v"], p["W1i"], p["b1"],
            p["W2"], p["b2"],
            p["Wa1"], p["ba1"],
            p["Wa2"], p["ba2"]]
    return pl.pallas_call(
        _trunk_kernel,
        out_shape=jax.ShapeDtypeStruct((MP, 128), jnp.float32),
        in_specs=[_full_spec(a.shape) for a in args],
        out_specs=_full_spec((MP, 128)),
    )(*args)


# --------------- parameters (torch layout) + one-time kernel-side prep ---------------
def init_params(key):
    """Deterministic synthetic parameters (torch-style uniform(-1/sqrt(fan_in), ...)).
    Dense weights stored as (in, out); conv weights as (out_ch, in_ch, kh, kw)."""
    def dense(k, fan_in, fan_out):
        k1, k2 = jax.random.split(k)
        s = 1.0 / jnp.sqrt(fan_in)
        return (jax.random.uniform(k1, (fan_in, fan_out), jnp.float32, -s, s),
                jax.random.uniform(k2, (fan_out,), jnp.float32, -s, s))

    def conv(k, out_ch, in_ch, kh, kw_):
        k1, k2 = jax.random.split(k)
        s = 1.0 / jnp.sqrt(in_ch * kh * kw_)
        return (jax.random.uniform(k1, (out_ch, in_ch, kh, kw_), jnp.float32, -s, s),
                jax.random.uniform(k2, (out_ch,), jnp.float32, -s, s))

    ks = jax.random.split(key, 9)
    return {
        "vector_fc":  dense(ks[0], 303, 512),
        "conv1":      conv(ks[1], 32, 4, 8, 8),
        "conv2":      conv(ks[2], 64, 32, 4, 4),
        "conv3":      conv(ks[3], 64, 64, 3, 3),
        "image_fc":   dense(ks[4], 1024, 512),
        "fc1":        dense(ks[5], 1024, 512),
        "fc2":        dense(ks[6], 512, 512),
        "fc_action1": dense(ks[7], 512, 256),
        "fc_action2": dense(ks[8], 256, 5),
    }


def prepare_params(params):
    """One-time weight-side transforms: NHWC permutations, zero padding, bf16 cast."""
    bf16 = jnp.bfloat16

    def conv_w(w, pad_k_to=None):
        out_ch, in_ch, kh, kw = w.shape
        # torch weight.view(out,-1) uses (C,kh,kw); our NHWC im2col uses (kh,kw,C)
        w2 = w.transpose(2, 3, 1, 0).reshape(kh * kw * in_ch, out_ch)
        if pad_k_to is not None and pad_k_to > w2.shape[0]:
            w2 = jnp.pad(w2, ((0, pad_k_to - w2.shape[0]), (0, 0)))
        return w2.astype(bf16)

    def bias(b):
        return b.reshape(1, -1).astype(jnp.float32)

    w1, b1 = params["conv1"]
    w2, b2 = params["conv2"]
    w3, b3 = params["conv3"]
    Wvec, bvec = params["vector_fc"]
    Wimg, bimg = params["image_fc"]
    Wf1, bf1 = params["fc1"]
    Wf2, bf2 = params["fc2"]
    Wa1, ba1 = params["fc_action1"]
    Wa2, ba2 = params["fc_action2"]

    # image_fc rows are indexed in torch NCHW-flatten order (c,h,w); our CNN output
    # flattens NHWC (h,w,c) -> fold the permutation into the weight rows.
    Wimg_p = Wimg.reshape(64, 4, 4, 512).transpose(1, 2, 0, 3).reshape(1024, 512)

    return {
        "conv1_w": conv_w(w1),               "conv1_b": bias(b1),
        "conv2_w": conv_w(w2),               "conv2_b": bias(b2),
        "conv3_w": conv_w(w3, pad_k_to=640), "conv3_b": bias(b3),
        # vector_fc: pad K 303 -> 384 (lane multiple)
        "Wv": jnp.pad(Wvec, ((0, 384 - 303), (0, 0))).astype(bf16), "bv": bias(bvec),
        "Wi": Wimg_p.astype(bf16),                                   "bi": bias(bimg),
        # fc1 split: rows [:512] multiply vector_feat, rows [512:] multiply image_feat
        "W1v": Wf1[:512].astype(bf16),
        "W1i": Wf1[512:].astype(bf16),
        "b1": bias(bf1),
        "W2": Wf2.astype(bf16),  "b2": bias(bf2),
        "Wa1": Wa1.astype(bf16), "ba1": bias(ba1),
        # fc_action2: lane-dense output (N padded 5 -> 128 with zero cols)
        "Wa2": jnp.pad(Wa2, ((0, 0), (0, 128 - 5))).astype(bf16),
        "ba2": jnp.pad(ba2, (0, 128 - 5)).reshape(1, -1).astype(jnp.float32),
    }


# --------------- forward pass ---------------
def q_network_forward(prepped, front_obs, vector_obs):
    B = front_obs.shape[0]
    MP = ((B + 7) // 8) * 8          # pad batch to the f32 sublane granule once

    # image branch: single NCHW->NHWC transpose of the raw input, then NHWC end-to-end
    x = front_obs.transpose(0, 2, 3, 1).astype(jnp.bfloat16)            # (B,60,60,4)
    x = conv2d_relu_nhwc(x, prepped["conv1_w"], prepped["conv1_b"], 8, 8, 4)  # (B,14,14,32)
    x = conv2d_relu_nhwc(x, prepped["conv2_w"], prepped["conv2_b"], 4, 4, 2)  # (B,6,6,64)
    x = conv2d_relu_nhwc(x, prepped["conv3_w"], prepped["conv3_b"], 3, 3, 1)  # (B,4,4,64)
    img = x.reshape(B, 1024)                                            # NHWC flatten
    img_p = jnp.pad(img, ((0, MP - B), (0, 0)))                         # (MP,1024) bf16

    # vector branch input: pad K 303 -> 384 and batch to MP
    vec = vector_obs.astype(jnp.bfloat16)
    vec_p = jnp.pad(vec, ((0, MP - B), (0, 384 - vec.shape[1])))        # (MP,384) bf16

    # fused 6-layer FC trunk (vector_fc, image_fc, fc1, fc2, fc_action1, fc_action2)
    q = fused_trunk(vec_p, img_p, prepped)                              # (MP,128) f32
    return q[:B, :5]


if __name__ == "__main__":
    key = jax.random.PRNGKey(0)
    k_params, k_img, k_vec = jax.random.split(key, 3)
    params = init_params(k_params)
    prepped = prepare_params(params)     # one-time weight prep (perm/pad/bf16)

    # Image must be 60x60 so that the CNN output flattens to 1024 (= image_fc in-dim).
    front_obs = jax.random.normal(k_img, (2, 4, 60, 60), jnp.float32)
    vector_obs = jax.random.normal(k_vec, (2, 303), jnp.float32)

    q = jax.jit(q_network_forward)(prepped, front_obs, vector_obs)
    jax.block_until_ready(q)
    assert q.shape == (2, 5) and q.dtype == jnp.float32
    print("KERNEL_OK")
</pallas_src>

<mosaic_0001>
module attributes {stable_mosaic.version = 11 : i64} {
  func.func @_matmul_kernel(%arg0: memref<392x256xbf16, #tpu.memory_space<vmem>>, %arg1: memref<256x32xbf16, #tpu.memory_space<vmem>>, %arg2: memref<1x32xf32, #tpu.memory_space<vmem>>, %arg3: memref<392x32xbf16, #tpu.memory_space<vmem>>) attributes {dimension_semantics = [], scalar_prefetch = 0 : i64, scratch_operands = 0 : i64, tpu.core_type = #tpu.core_type<tc>} {
    %c0 = arith.constant 0 : index
    %c0_0 = arith.constant 0 : index
    %0 = vector.load %arg0[%c0, %c0_0] : memref<392x256xbf16, #tpu.memory_space<vmem>>, vector<392x256xbf16>
    %c0_1 = arith.constant 0 : index
    %c0_2 = arith.constant 0 : index
    %1 = vector.load %arg1[%c0_1, %c0_2] : memref<256x32xbf16, #tpu.memory_space<vmem>>, vector<256x32xbf16>
    %cst = arith.constant dense<0.000000e+00> : vector<392x32xf32>
    %2 = tpu.matmul %0, %1, %cst {dimension_numbers = #tpu.dot_dimension_numbers<[1], [0], [0], [1], [0, 0, 1, 1], [], []>} : vector<392x256xbf16>, vector<256x32xbf16>, vector<392x32xf32> -> vector<392x32xf32>
    %c0_3 = arith.constant 0 : index
    %c0_4 = arith.constant 0 : index
    %3 = vector.load %arg2[%c0_3, %c0_4] : memref<1x32xf32, #tpu.memory_space<vmem>>, vector<1x32xf32>
    %4 = vector.broadcast %3 : vector<1x32xf32> to vector<392x32xf32>
    %5 = arith.addf %2, %4 : vector<392x32xf32>
    %cst_5 = arith.constant 0.000000e+00 : f32
    %6 = vector.broadcast %cst_5 : f32 to vector<392x32xf32>
    %7 = arith.maximumf %5, %6 : vector<392x32xf32>
    %8 = arith.truncf %7 : vector<392x32xf32> to vector<392x32xbf16>
    %c0_6 = arith.constant 0 : index
    %c0_7 = arith.constant 0 : index
    %9 = vector.load %arg3[%c0_6, %c0_7] : memref<392x32xbf16, #tpu.memory_space<vmem>>, vector<392x32xbf16>
    tpu.vector_store %arg3[%c0_6, %c0_7], %8 {strides = array<i32>} : memref<392x32xbf16, #tpu.memory_space<vmem>>, vector<392x32xbf16>,
    return
  }
}

module attributes {stable_mosaic.version = 11 : i64} {
  func.func @_matmul_kernel(%arg0: memref<72x512xbf16, #tpu.memory_space<vmem>>, %arg1: memref<512x64xbf16, #tpu.memory_space<vmem>>, %arg2: memref<1x64xf32, #tpu.memory_space<vmem>>, %arg3: memref<72x64xbf16, #tpu.memory_space<vmem>>) attributes {dimension_semantics = [], scalar_prefetch = 0 : i64, scratch_operands = 0 : i64, tpu.core_type = #tpu.core_type<tc>} {
    %c0 = arith.constant 0 : index
    %c0_0 = arith.constant 0 : index
    %0 = vector.load %arg0[%c0, %c0_0] : memref<72x512xbf16, #tpu.memory_space<vmem>>, vector<72x512xbf16>
    %c0_1 = arith.constant 0 : index
    %c0_2 = arith.constant 0 : index
    %1 = vector.load %arg1[%c0_1, %c0_2] : memref<512x64xbf16, #tpu.memory_space<vmem>>, vector<512x64xbf16>
    %cst = arith.constant dense<0.000000e+00> : vector<72x64xf32>
    %2 = tpu.matmul %0, %1, %cst {dimension_numbers = #tpu.dot_dimension_numbers<[1], [0], [0], [1], [0, 0, 1, 1], [], []>} : vector<72x512xbf16>, vector<512x64xbf16>, vector<72x64xf32> -> vector<72x64xf32>
    %c0_3 = arith.constant 0 : index
    %c0_4 = arith.constant 0 : index
    %3 = vector.load %arg2[%c0_3, %c0_4] : memref<1x64xf32, #tpu.memory_space<vmem>>, vector<1x64xf32>
    %4 = vector.broadcast %3 : vector<1x64xf32> to vector<72x64xf32>
    %5 = arith.addf %2, %4 : vector<72x64xf32>
    %cst_5 = arith.constant 0.000000e+00 : f32
    %6 = vector.broadcast %cst_5 : f32 to vector<72x64xf32>
    %7 = arith.maximumf %5, %6 : vector<72x64xf32>
    %8 = arith.truncf %7 : vector<72x64xf32> to vector<72x64xbf16>
    %c0_6 = arith.constant 0 : index
    %c0_7 = arith.constant 0 : index
    %9 = vector.load %arg3[%c0_6, %c0_7] : memref<72x64xbf16, #tpu.memory_space<vmem>>, vector<72x64xbf16>
    tpu.vector_store %arg3[%c0_6, %c0_7], %8 {strides = array<i32>} : memref<72x64xbf16, #tpu.memory_space<vmem>>, vector<72x64xbf16>,
    return
  }
}

module attributes {stable_mosaic.version = 11 : i64} {
  func.func @_matmul_kernel(%arg0: memref<32x640xbf16, #tpu.memory_space<vmem>>, %arg1: memref<640x64xbf16, #tpu.memory_space<vmem>>, %arg2: memref<1x64xf32, #tpu.memory_space<vmem>>, %arg3: memref<32x64xbf16, #tpu.memory_space<vmem>>) attributes {dimension_semantics = [], scalar_prefetch = 0 : i64, scratch_operands = 0 : i64, tpu.core_type = #tpu.core_type<tc>} {
    %c0 = arith.constant 0 : index
    %c0_0 = arith.constant 0 : index
    %0 = vector.load %arg0[%c0, %c0_0] : memref<32x640xbf16, #tpu.memory_space<vmem>>, vector<32x640xbf16>
    %c0_1 = arith.constant 0 : index
    %c0_2 = arith.constant 0 : index
    %1 = vector.load %arg1[%c0_1, %c0_2] : memref<640x64xbf16, #tpu.memory_space<vmem>>, vector<640x64xbf16>
    %cst = arith.constant dense<0.000000e+00> : vector<32x64xf32>
    %2 = tpu.matmul %0, %1, %cst {dimension_numbers = #tpu.dot_dimension_numbers<[1], [0], [0], [1], [0, 0, 1, 1], [], []>} : vector<32x640xbf16>, vector<640x64xbf16>, vector<32x64xf32> -> vector<32x64xf32>
    %c0_3 = arith.constant 0 : index
    %c0_4 = arith.constant 0 : index
    %3 = vector.load %arg2[%c0_3, %c0_4] : memref<1x64xf32, #tpu.memory_space<vmem>>, vector<1x64xf32>
    %4 = vector.broadcast %3 : vector<1x64xf32> to vector<32x64xf32>
    %5 = arith.addf %2, %4 : vector<32x64xf32>
    %cst_5 = arith.constant 0.000000e+00 : f32
    %6 = vector.broadcast %cst_5 : f32 to vector<32x64xf32>
    %7 = arith.maximumf %5, %6 : vector<32x64xf32>
    %8 = arith.truncf %7 : vector<32x64xf32> to vector<32x64xbf16>
    %c0_6 = arith.constant 0 : index
    %c0_7 = arith.constant 0 : index
    %9 = vector.load %arg3[%c0_6, %c0_7] : memref<32x64xbf16, #tpu.memory_space<vmem>>, vector<32x64xbf16>
    tpu.vector_store %arg3[%c0_6, %c0_7], %8 {strides = array<i32>} : memref<32x64xbf16, #tpu.memory_space<vmem>>, vector<32x64xbf16>,
    return
  }
}

module attributes {stable_mosaic.version = 11 : i64} {
  func.func @_trunk_kernel(%arg0: memref<8x384xbf16, #tpu.memory_space<vmem>>, %arg1: memref<8x1024xbf16, #tpu.memory_space<vmem>>, %arg2: memref<384x512xbf16, #tpu.memory_space<vmem>>, %arg3: memref<1x512xf32, #tpu.memory_space<vmem>>, %arg4: memref<1024x512xbf16, #tpu.memory_space<vmem>>, %arg5: memref<1x512xf32, #tpu.memory_space<vmem>>, %arg6: memref<512x512xbf16, #tpu.memory_space<vmem>>, %arg7: memref<512x512xbf16, #tpu.memory_space<vmem>>, %arg8: memref<1x512xf32, #tpu.memory_space<vmem>>, %arg9: memref<512x512xbf16, #tpu.memory_space<vmem>>, %arg10: memref<1x512xf32, #tpu.memory_space<vmem>>, %arg11: memref<512x256xbf16, #tpu.memory_space<vmem>>, %arg12: memref<1x256xf32, #tpu.memory_space<vmem>>, %arg13: memref<256x128xbf16, #tpu.memory_space<vmem>>, %arg14: memref<1x128xf32, #tpu.memory_space<vmem>>, %arg15: memref<8x128xf32, #tpu.memory_space<vmem>>) attributes {dimension_semantics = [], scalar_prefetch = 0 : i64, scratch_operands = 0 : i64, tpu.core_type = #tpu.core_type<tc>} {
    %c0 = arith.constant 0 : index
    %c0_0 = arith.constant 0 : index
    %0 = vector.load %arg0[%c0, %c0_0] : memref<8x384xbf16, #tpu.memory_space<vmem>>, vector<8x384xbf16>
    %c0_1 = arith.constant 0 : index
    %c0_2 = arith.constant 0 : index
    %1 = vector.load %arg2[%c0_1, %c0_2] : memref<384x512xbf16, #tpu.memory_space<vmem>>, vector<384x512xbf16>
    %cst = arith.constant dense<0.000000e+00> : vector<8x512xf32>
    %2 = tpu.matmul %0, %1, %cst {dimension_numbers = #tpu.dot_dimension_numbers<[1], [0], [0], [1], [0, 0, 1, 1], [], []>} : vector<8x384xbf16>, vector<384x512xbf16>, vector<8x512xf32> -> vector<8x512xf32>
    %c0_3 = arith.constant 0 : index
    %c0_4 = arith.constant 0 : index
    %3 = vector.load %arg3[%c0_3, %c0_4] : memref<1x512xf32, #tpu.memory_space<vmem>>, vector<1x512xf32>
    %4 = vector.broadcast %3 : vector<1x512xf32> to vector<8x512xf32>
    %5 = arith.addf %2, %4 : vector<8x512xf32>
    %c0_5 = arith.constant 0 : index
    %c0_6 = arith.constant 0 : index
    %6 = vector.load %arg1[%c0_5, %c0_6] : memref<8x1024xbf16, #tpu.memory_space<vmem>>, vector<8x1024xbf16>
    %c0_7 = arith.constant 0 : index
    %c0_8 = arith.constant 0 : index
    %7 = vector.load %arg4[%c0_7, %c0_8] : memref<1024x512xbf16, #tpu.memory_space<vmem>>, vector<1024x512xbf16>
    %cst_9 = arith.constant dense<0.000000e+00> : vector<8x512xf32>
    %8 = tpu.matmul %6, %7, %cst_9 {dimension_numbers = #tpu.dot_dimension_numbers<[1], [0], [0], [1], [0, 0, 1, 1], [], []>} : vector<8x1024xbf16>, vector<1024x512xbf16>, vector<8x512xf32> -> vector<8x512xf32>
    %c0_10 = arith.constant 0 : index
    %c0_11 = arith.constant 0 : index
    %9 = vector.load %arg5[%c0_10, %c0_11] : memref<1x512xf32, #tpu.memory_space<vmem>>, vector<1x512xf32>
    %10 = vector.broadcast %9 : vector<1x512xf32> to vector<8x512xf32>
    %11 = arith.addf %8, %10 : vector<8x512xf32>
    %12 = arith.truncf %5 : vector<8x512xf32> to vector<8x512xbf16>
    %c0_12 = arith.constant 0 : index
    %c0_13 = arith.constant 0 : index
    %13 = vector.load %arg6[%c0_12, %c0_13] : memref<512x512xbf16, #tpu.memory_space<vmem>>, vector<512x512xbf16>
    %cst_14 = arith.constant dense<0.000000e+00> : vector<8x512xf32>
    %14 = tpu.matmul %12, %13, %cst_14 {dimension_numbers = #tpu.dot_dimension_numbers<[1], [0], [0], [1], [0, 0, 1, 1], [], []>} : vector<8x512xbf16>, vector<512x512xbf16>, vector<8x512xf32> -> vector<8x512xf32>
    %15 = arith.truncf %11 : vector<8x512xf32> to vector<8x512xbf16>
    %c0_15 = arith.constant 0 : index
    %c0_16 = arith.constant 0 : index
    %16 = vector.load %arg7[%c0_15, %c0_16] : memref<512x512xbf16, #tpu.memory_space<vmem>>, vector<512x512xbf16>
    %cst_17 = arith.constant dense<0.000000e+00> : vector<8x512xf32>
    %17 = tpu.matmul %15, %16, %cst_17 {dimension_numbers = #tpu.dot_dimension_numbers<[1], [0], [0], [1], [0, 0, 1, 1], [], []>} : vector<8x512xbf16>, vector<512x512xbf16>, vector<8x512xf32> -> vector<8x512xf32>
    %18 = arith.addf %14, %17 : vector<8x512xf32>
    %c0_18 = arith.constant 0 : index
    %c0_19 = arith.constant 0 : index
    %19 = vector.load %arg8[%c0_18, %c0_19] : memref<1x512xf32, #tpu.memory_space<vmem>>, vector<1x512xf32>
    %20 = vector.broadcast %19 : vector<1x512xf32> to vector<8x512xf32>
    %21 = arith.addf %18, %20 : vector<8x512xf32>
    %cst_20 = arith.constant 0.000000e+00 : f32
    %22 = vector.broadcast %cst_20 : f32 to vector<8x512xf32>
    %23 = arith.maximumf %21, %22 : vector<8x512xf32>
    %24 = arith.truncf %23 : vector<8x512xf32> to vector<8x512xbf16>
    %c0_21 = arith.constant 0 : index
    %c0_22 = arith.constant 0 : index
    %25 = vector.load %arg9[%c0_21, %c0_22] : memref<512x512xbf16, #tpu.memory_space<vmem>>, vector<512x512xbf16>
    %cst_23 = arith.constant dense<0.000000e+00> : vector<8x512xf32>
    %26 = tpu.matmul %24, %25, %cst_23 {dimension_numbers = #tpu.dot_dimension_numbers<[1], [0], [0], [1], [0, 0, 1, 1], [], []>} : vector<8x512xbf16>, vector<512x512xbf16>, vector<8x512xf32> -> vector<8x512xf32>
    %c0_24 = arith.constant 0 : index
    %c0_25 = arith.constant 0 : index
    %27 = vector.load %arg10[%c0_24, %c0_25] : memref<1x512xf32, #tpu.memory_space<vmem>>, vector<1x512xf32>
    %28 = vector.broadcast %27 : vector<1x512xf32> to vector<8x512xf32>
    %29 = arith.addf %26, %28 : vector<8x512xf32>
    %cst_26 = arith.constant 0.000000e+00 : f32
    %30 = vector.broadcast %cst_26 : f32 to vector<8x512xf32>
    %31 = arith.maximumf %29, %30 : vector<8x512xf32>
    %32 = arith.truncf %31 : vector<8x512xf32> to vector<8x512xbf16>
    %c0_27 = arith.constant 0 : index
    %c0_28 = arith.constant 0 : index
    %33 = vector.load %arg11[%c0_27, %c0_28] : memref<512x256xbf16, #tpu.memory_space<vmem>>, vector<512x256xbf16>
    %cst_29 = arith.constant dense<0.000000e+00> : vector<8x256xf32>
    %34 = tpu.matmul %32, %33, %cst_29 {dimension_numbers = #tpu.dot_dimension_numbers<[1], [0], [0], [1], [0, 0, 1, 1], [], []>} : vector<8x512xbf16>, vector<512x256xbf16>, vector<8x256xf32> -> vector<8x256xf32>
    %c0_30 = arith.constant 0 : index
    %c0_31 = arith.constant 0 : index
    %35 = vector.load %arg12[%c0_30, %c0_31] : memref<1x256xf32, #tpu.memory_space<vmem>>, vector<1x256xf32>
    %36 = vector.broadcast %35 : vector<1x256xf32> to vector<8x256xf32>
    %37 = arith.addf %34, %36 : vector<8x256xf32>
    %cst_32 = arith.constant 0.000000e+00 : f32
    %38 = vector.broadcast %cst_32 : f32 to vector<8x256xf32>
    %39 = arith.maximumf %37, %38 : vector<8x256xf32>
    %40 = arith.truncf %39 : vector<8x256xf32> to vector<8x256xbf16>
    %c0_33 = arith.constant 0 : index
    %c0_34 = arith.constant 0 : index
    %41 = vector.load %arg13[%c0_33, %c0_34] : memref<256x128xbf16, #tpu.memory_space<vmem>>, vector<256x128xbf16>
    %cst_35 = arith.constant dense<0.000000e+00> : vector<8x128xf32>
    %42 = tpu.matmul %40, %41, %cst_35 {dimension_numbers = #tpu.dot_dimension_numbers<[1], [0], [0], [1], [0, 0, 1, 1], [], []>} : vector<8x256xbf16>, vector<256x128xbf16>, vector<8x128xf32> -> vector<8x128xf32>
    %c0_36 = arith.constant 0 : index
    %c0_37 = arith.constant 0 : index
    %43 = vector.load %arg14[%c0_36, %c0_37] : memref<1x128xf32, #tpu.memory_space<vmem>>, vector<1x128xf32>
    %44 = vector.broadcast %43 : vector<1x128xf32> to vector<8x128xf32>
    %45 = arith.addf %42, %44 : vector<8x128xf32>
    %c0_38 = arith.constant 0 : index
    %c0_39 = arith.constant 0 : index
    %46 = vector.load %arg15[%c0_38, %c0_39] : memref<8x128xf32, #tpu.memory_space<vmem>>, vector<8x128xf32>
    tpu.vector_store %arg15[%c0_38, %c0_39], %45 {strides = array<i32>} : memref<8x128xf32, #tpu.memory_space<vmem>>, vector<8x128xf32>,
    return
  }
}

</mosaic_0001>

<bundles_post_ra>
// kernel: q_network_forward.4
= control target key start
LH: loop header
LB: loop body
LE: loop exit
PB: predicated region body
PF: predicated region fallthrough
CT: control target
= control target key end

     0   :  { %v1266_v0 = vmov 0   ;;  %vm924_vm0 = vcmask 257024   ;;  %s1764_s1 = inlined_call_operand.vmem [shape: bf16[256,32], index: 1, kind: input, shape index: {}]   ;;  %s1765_s0 = inlined_call_operand.vmem [shape: bf16[392,256], index: 0, kind: input, shape index: {}]   ;;  %s1766_s2 = inlined_call_operand.vmem [shape: f32[1,32], index: 2, kind: input, shape index: {}]   ;;  %s1767_s3 = inlined_call_operand.vmem [shape: bf16[392,32], index: 3, kind: output, shape index: {}]  }
   0x1   :  { %446 = vmatprep.subr.bf16.mxu0 %v1266_v0  ;;  %v1176_v1 = vld [vmem:[%s1764_s1] sm:$0xff]   ;;  %1143 = vmatprep.subr.bf16.mxu1 %v1266_v0  ;;  %v1177_v2 = vld [vmem:[%s1764_s1 + $0x8] sm:$0xff]   ;;  %v1178_v3 = vld [vmem:[%s1764_s1 + $0x10] sm:$0xff]  }
   0x2   :  { %447 = vmatpush1.bf16.msra.mxu0 %v1176_v1  ;;  %1159 = vmatpush1.bf16.msra.mxu1 %v1176_v1  ;;  %v1179_v4 = vld [vmem:[%s1764_s1 + $0x18] sm:$0xff]   ;;  %v1180_v5 = vld [vmem:[%s1764_s1 + $0x20] sm:$0xff]   ;;  %v1181_v7 = vld [vmem:[%s1764_s1 + $0x28] sm:$0xff]  }
   0x3   :  { %448 = vmatprep.subr.bf16.mxu0 %v1266_v0  ;;  %1144 = vmatprep.subr.bf16.mxu1 %v1266_v0  ;;  %v1194_v6 = vld [vmem:[%s1765_s0 + $0x4] ss:$8 sps:$4 sm:$0xff]   ;;  %v1197_v8 = vld [vmem:[%s1765_s0 + $0xd4] ss:$8 sps:$4 sm:$0xff]   ;;  %v1192_v19 = vld [vmem:[%s1765_s0] ss:$8 sps:$4 sm:$0xff]  }
   0x4   :  { %478 = vmatprep.mubr.bf16.mxu0 %v1194_v6  ;;  %582 = vmatprep.mubr.bf16.mxu1 %v1197_v8  ;;  %v1182_v9 = vld [vmem:[%s1764_s1 + $0x30] sm:$0xff]   ;;  %v1183_v10 = vld [vmem:[%s1764_s1 + $0x38] sm:$0xff]   ;;  %v1184_v11 = vld [vmem:[%s1764_s1 + $0x40] sm:$0xff]  }
   0x5   :  { %v1185_v12 = vld [vmem:[%s1764_s1 + $0x48] sm:$0xff]   ;;  %v1186_v13 = vld [vmem:[%s1764_s1 + $0x50] sm:$0xff]   ;;  %v1187_v14 = vld [vmem:[%s1764_s1 + $0x58] sm:$0xff]  }
   0x6   :  { %449 = vmatpush1.bf16.msra.mxu0 %v1177_v2  ;;  %1160 = vmatpush1.bf16.msra.mxu1 %v1177_v2  ;;  %v1188_v15 = vld [vmem:[%s1764_s1 + $0x60] sm:$0xff]   ;;  %v1189_v16 = vld [vmem:[%s1764_s1 + $0x68] sm:$0xff]   ;;  %v1190_v17 = vld [vmem:[%s1764_s1 + $0x70] sm:$0xff]  }
   0x7   :  { %450 = vmatprep.subr.bf16.mxu0 %v1266_v0  ;;  %1145 = vmatprep.subr.bf16.mxu1 %v1266_v0  ;;  %v1191_v18 = vld [vmem:[%s1764_s1 + $0x78] sm:$0xff]   ;;  %v1201_v22 = vld [vmem:[%s1765_s0 + $0xe4] ss:$8 sps:$4 sm:$0xff]   ;;  %v1205_v24 = vld [vmem:[%s1765_s0 + $0xe0] ss:$8 sps:$4 sm:$0xff]  }
   0x8   :  { %v1195_v20 = vld [vmem:[%s1765_s0 + $0xd0] ss:$8 sps:$4 sm:$0xff]   ;;  %v1198_v21 = vld [vmem:[%s1765_s0 + $0x14] ss:$8 sps:$4 sm:$0xff]   ;;  %v1203_v25 = vld [vmem:[%s1765_s0 + $0x24] ss:$8 sps:$4 sm:$0xff]  }
   0x9   :  { %v1200_v23 = vld [vmem:[%s1765_s0 + $0x10] ss:$8 sps:$4 sm:$0xff]   ;;  %v1207_v26 = vld [vmem:[%s1765_s0 + $0xf4] ss:$8 sps:$4 sm:$0xff]   ;;  %v1206_v27 = vld [vmem:[%s1765_s0 + $0x20] ss:$8 sps:$4 sm:$0xff]  }
   0xa   :  { %451 = vmatpush1.bf16.msra.mxu0 %v1178_v3  ;;  %1161 = vmatpush1.bf16.msra.mxu1 %v1178_v3  ;;  %v1211_v28 = vld [vmem:[%s1765_s0 + $0xf0] ss:$8 sps:$4 sm:$0xff]   ;;  %v1209_v29 = vld [vmem:[%s1765_s0 + $0x34] ss:$8 sps:$4 sm:$0xff]   ;;  %v1213_v30 = vld [vmem:[%s1765_s0 + $0x104] ss:$8 sps:$4 sm:$0xff]  }
   0xb   :  { %452 = vmatprep.subr.bf16.mxu0 %v1266_v0  ;;  %1146 = vmatprep.subr.bf16.mxu1 %v1266_v0  ;;  %v1212_v31 = vld [vmem:[%s1765_s0 + $0x30] ss:$8 sps:$4 sm:$0xff]   ;;  %v1217_v32 = vld [vmem:[%s1765_s0 + $0x100] ss:$8 sps:$4 sm:$0xff]   ;;  %v1215_v33 = vld [vmem:[%s1765_s0 + $0x44] ss:$8 sps:$4 sm:$0xff]  }
   0xc   :  { %v1219_v34 = vld [vmem:[%s1765_s0 + $0x114] ss:$8 sps:$4 sm:$0xff]   ;;  %v1218_v35 = vld [vmem:[%s1765_s0 + $0x40] ss:$8 sps:$4 sm:$0xff]   ;;  %v1223_v36 = vld [vmem:[%s1765_s0 + $0x110] ss:$8 sps:$4 sm:$0xff]  }
   0xd   :  { %v1221_v37 = vld [vmem:[%s1765_s0 + $0x54] ss:$8 sps:$4 sm:$0xff]   ;;  %v1225_v38 = vld [vmem:[%s1765_s0 + $0x124] ss:$8 sps:$4 sm:$0xff]   ;;  %v1224_v39 = vld [vmem:[%s1765_s0 + $0x50] ss:$8 sps:$4 sm:$0xff]  }
   0xe   :  { %453 = vmatpush1.bf16.msra.mxu0 %v1179_v4  ;;  %1162 = vmatpush1.bf16.msra.mxu1 %v1179_v4  ;;  %v1229_v40 = vld [vmem:[%s1765_s0 + $0x120] ss:$8 sps:$4 sm:$0xff]   ;;  %v1227_v41 = vld [vmem:[%s1765_s0 + $0x64] ss:$8 sps:$4 sm:$0xff]   ;;  %v1231_v42 = vld [vmem:[%s1765_s0 + $0x134] ss:$8 sps:$4 sm:$0xff]  }
   0xf   :  { %454 = vmatprep.subr.bf16.mxu0 %v1266_v0  ;;  %1147 = vmatprep.subr.bf16.mxu1 %v1266_v0  ;;  %v1230_v43 = vld [vmem:[%s1765_s0 + $0x60] ss:$8 sps:$4 sm:$0xff]   ;;  %v1235_v44 = vld [vmem:[%s1765_s0 + $0x130] ss:$8 sps:$4 sm:$0xff]   ;;  %v1233_v45 = vld [vmem:[%s1765_s0 + $0x74] ss:$8 sps:$4 sm:$0xff]  }
  0x10   :  { %v1237_v46 = vld [vmem:[%s1765_s0 + $0x144] ss:$8 sps:$4 sm:$0xff]   ;;  %v1236_v47 = vld [vmem:[%s1765_s0 + $0x70] ss:$8 sps:$4 sm:$0xff]   ;;  %v1241_v48 = vld [vmem:[%s1765_s0 + $0x140] ss:$8 sps:$4 sm:$0xff]  }
  0x11   :  { %v1239_v49 = vld [vmem:[%s1765_s0 + $0x84] ss:$8 sps:$4 sm:$0xff]   ;;  %v1243_v50 = vld [vmem:[%s1765_s0 + $0x154] ss:$8 sps:$4 sm:$0xff]   ;;  %v1242_v51 = vld [vmem:[%s1765_s0 + $0x80] ss:$8 sps:$4 sm:$0xff]  }
  0x12   :  { %455 = vmatpush1.bf16.msra.mxu0 %v1180_v5  ;;  %1163 = vmatpush1.bf16.msra.mxu1 %v1180_v5  ;;  %v1247_v52 = vld [vmem:[%s1765_s0 + $0x150] ss:$8 sps:$4 sm:$0xff]   ;;  %v1245_v53 = vld [vmem:[%s1765_s0 + $0x94] ss:$8 sps:$4 sm:$0xff]   ;;  %v1249_v54 = vld [vmem:[%s1765_s0 + $0x164] ss:$8 sps:$4 sm:$0xff]  }
  0x13   :  { %456 = vmatprep.subr.bf16.mxu0 %v1266_v0  ;;  %1148 = vmatprep.subr.bf16.mxu1 %v1266_v0  ;;  %v1248_v55 = vld [vmem:[%s1765_s0 + $0x90] ss:$8 sps:$4 sm:$0xff]   ;;  %v1253_v56 = vld [vmem:[%s1765_s0 + $0x160] ss:$8 sps:$4 sm:$0xff]   ;;  %v1251_v57 = vld [vmem:[%s1765_s0 + $0xa4] ss:$8 sps:$4 sm:$0xff]  }
  0x14   :  { %v1255_v58 = vld [vmem:[%s1765_s0 + $0x174] ss:$8 sps:$4 sm:$0xff]   ;;  %v63_v59 = vld [vmem:[%s1765_s0 + $0x180] sm:$0xff]  ;;  %v1259_v61 = vld [vmem:[%s1765_s0 + $0x170] ss:$8 sps:$4 sm:$0xff]  }
  0x15   :  { %v1254_v60 = vld [vmem:[%s1765_s0 + $0xa0] ss:$8 sps:$4 sm:$0xff]   ;;  %v1257_v62 = vld [vmem:[%s1765_s0 + $0xb4] ss:$8 sps:$4 sm:$0xff]   ;;  %v1028_v63 = vcombine.high %v63_v59, %v63_v59  ;;  %v1027_v1 = vcombine.low %v63_v59, %v63_v59  ;;  %v1262_v2 = vld [vmem:[%s1765_s0 + $0xc4] ss:$8 sps:$4 sm:$0xff]  }
  0x16   :  { %457 = vmatpush1.bf16.msra.mxu0 %v1181_v7  ;;  %1164 = vmatpush1.bf16.msra.mxu1 %v1181_v7  ;;  %v1265_v3 = vld [vmem:[%s1765_s0 + $0xc0] ss:$8 sps:$4 sm:$0xff]  }
  0x17   :  { %458 = vmatprep.subr.bf16.mxu0 %v1266_v0  ;;  %1149 = vmatprep.subr.bf16.mxu1 %v1266_v0  ;;  %v1517_v4 = vld [vmem:[%s1766_s2] ss:$0 sm:$0xff] }
  0x1a   :  { %459 = vmatpush1.bf16.msra.mxu0 %v1182_v9  ;;  %1165 = vmatpush1.bf16.msra.mxu1 %v1182_v9 }
  0x1b   :  { %460 = vmatprep.subr.bf16.mxu0 %v1266_v0  ;;  %1150 = vmatprep.subr.bf16.mxu1 %v1266_v0 }
  0x1e   :  { %461 = vmatpush1.bf16.msra.mxu0 %v1183_v10  ;;  %1166 = vmatpush1.bf16.msra.mxu1 %v1183_v10 }
  0x1f   :  { %462 = vmatprep.subr.bf16.mxu0 %v1266_v0  ;;  %1151 = vmatprep.subr.bf16.mxu1 %v1266_v0 }
  0x22   :  { %463 = vmatpush1.bf16.msra.mxu0 %v1184_v11  ;;  %1167 = vmatpush1.bf16.msra.mxu1 %v1184_v11 }
  0x23   :  { %464 = vmatprep.subr.bf16.mxu0 %v1266_v0  ;;  %1152 = vmatprep.subr.bf16.mxu1 %v1266_v0 }
  0x26   :  { %465 = vmatpush1.bf16.msra.mxu0 %v1185_v12  ;;  %1168 = vmatpush1.bf16.msra.mxu1 %v1185_v12 }
  0x27   :  { %466 = vmatprep.subr.bf16.mxu0 %v1266_v0  ;;  %1153 = vmatprep.subr.bf16.mxu1 %v1266_v0 }
  0x2a   :  { %467 = vmatpush1.bf16.msra.mxu0 %v1186_v13  ;;  %1169 = vmatpush1.bf16.msra.mxu1 %v1186_v13 }
  0x2b   :  { %468 = vmatprep.subr.bf16.mxu0 %v1266_v0  ;;  %1154 = vmatprep.subr.bf16.mxu1 %v1266_v0 }
  0x2e   :  { %469 = vmatpush1.bf16.msra.mxu0 %v1187_v14  ;;  %1170 = vmatpush1.bf16.msra.mxu1 %v1187_v14 }
  0x2f   :  { %470 = vmatprep.subr.bf16.mxu0 %v1266_v0  ;;  %1155 = vmatprep.subr.bf16.mxu1 %v1266_v0 }
  0x32   :  { %471 = vmatpush1.bf16.msra.mxu0 %v1188_v15  ;;  %1171 = vmatpush1.bf16.msra.mxu1 %v1188_v15 }
  0x33   :  { %472 = vmatprep.subr.bf16.mxu0 %v1266_v0  ;;  %1156 = vmatprep.subr.bf16.mxu1 %v1266_v0 }
  0x36   :  { %473 = vmatpush1.bf16.msra.mxu0 %v1189_v16  ;;  %1172 = vmatpush1.bf16.msra.mxu1 %v1189_v16 }
  0x37   :  { %474 = vmatprep.subr.bf16.mxu0 %v1266_v0  ;;  %1157 = vmatprep.subr.bf16.mxu1 %v1266_v0 }
  0x3a   :  { %475 = vmatpush1.bf16.msra.mxu0 %v1190_v17  ;;  %1173 = vmatpush1.bf16.msra.mxu1 %v1190_v17 }
  0x3b   :  { %476 = vmatprep.subr.bf16.mxu0 %v1266_v0  ;;  %1158 = vmatprep.subr.bf16.mxu1 %v1266_v0  ;;  %v1260_v0 = vld [vmem:[%s1765_s0 + $0xb0] ss:$8 sps:$4 sm:$0xff]  }
  0x3e   :  { %477 = vmatpush1.bf16.msra.mxu0 %v1191_v18  ;;  %1174 = vmatpush1.bf16.msra.mxu1 %v1191_v18 }
  0x41   :  { %479 = vmatmul.mubr.bf16.vlgmr.msra.gmra.mrb[0].mxu0 %v1192_v19  ;;  %583 = vmatmul.mubr.bf16.vlgmr.msra.gmra.mrb[0].mxu1 %v1195_v20 }
  0x42   :  { %486 = vmatprep.mubr.bf16.mxu0 %v1198_v21  ;;  %590 = vmatprep.mubr.bf16.mxu1 %v1201_v22 }
  0x49   :  { %487 = vmatmul.mubr.bf16.gmra.mrb[4].mxu0 %v1200_v23  ;;  %591 = vmatmul.mubr.bf16.gmra.mrb[4].mxu1 %v1205_v24 }
  0x4a   :  { %494 = vmatprep.mubr.bf16.mxu0 %v1203_v25  ;;  %598 = vmatprep.mubr.bf16.mxu1 %v1207_v26 }
  0x51   :  { %495 = vmatmul.mubr.bf16.gmra.mrb[8].mxu0 %v1206_v27  ;;  %599 = vmatmul.mubr.bf16.gmra.mrb[8].mxu1 %v1211_v28 }
  0x52   :  { %502 = vmatprep.mubr.bf16.mxu0 %v1209_v29  ;;  %606 = vmatprep.mubr.bf16.mxu1 %v1213_v30 }
  0x59   :  { %503 = vmatmul.mubr.bf16.gmra.mrb[12].mxu0 %v1212_v31  ;;  %607 = vmatmul.mubr.bf16.gmra.mrb[12].mxu1 %v1217_v32 }
  0x5a   :  { %510 = vmatprep.mubr.bf16.mxu0 %v1215_v33  ;;  %614 = vmatprep.mubr.bf16.mxu1 %v1219_v34 }
  0x61   :  { %511 = vmatmul.mubr.bf16.gmra.mrb[16].mxu0 %v1218_v35  ;;  %615 = vmatmul.mubr.bf16.gmra.mrb[16].mxu1 %v1223_v36 }
  0x62   :  { %518 = vmatprep.mubr.bf16.mxu0 %v1221_v37  ;;  %622 = vmatprep.mubr.bf16.mxu1 %v1225_v38 }
  0x69   :  { %519 = vmatmul.mubr.bf16.gmra.mrb[20].mxu0 %v1224_v39  ;;  %623 = vmatmul.mubr.bf16.gmra.mrb[20].mxu1 %v1229_v40 }
  0x6a   :  { %526 = vmatprep.mubr.bf16.mxu0 %v1227_v41  ;;  %630 = vmatprep.mubr.bf16.mxu1 %v1231_v42 }
  0x71   :  { %527 = vmatmul.mubr.bf16.gmra.mrb[24].mxu0 %v1230_v43  ;;  %631 = vmatmul.mubr.bf16.gmra.mrb[24].mxu1 %v1235_v44 }
  0x72   :  { %534 = vmatprep.mubr.bf16.mxu0 %v1233_v45  ;;  %638 = vmatprep.mubr.bf16.mxu1 %v1237_v46 }
  0x79   :  { %535 = vmatmul.mubr.bf16.gmra.mrb[28].mxu0 %v1236_v47  ;;  %639 = vmatmul.mubr.bf16.gmra.mrb[28].mxu1 %v1241_v48 }
  0x7a   :  { %542 = vmatprep.mubr.bf16.mxu0 %v1239_v49  ;;  %646 = vmatprep.mubr.bf16.mxu1 %v1243_v50 }
  0x81   :  { %543 = vmatmul.mubr.bf16.gmra.mrb[32].mxu0 %v1242_v51  ;;  %647 = vmatmul.mubr.bf16.gmra.mrb[32].mxu1 %v1247_v52 }
  0x82   :  { %550 = vmatprep.mubr.bf16.mxu0 %v1245_v53  ;;  %654 = vmatprep.mubr.bf16.mxu1 %v1249_v54 }
  0x89   :  { %551 = vmatmul.mubr.bf16.gmra.mrb[36].mxu0 %v1248_v55  ;;  %655 = vmatmul.mubr.bf16.gmra.mrb[36].mxu1 %v1253_v56 }
  0x8a   :  { %558 = vmatprep.mubr.bf16.mxu0 %v1251_v57  ;;  %662 = vmatprep.mubr.bf16.mxu1 %v1255_v58 }
  0x91   :  { %559 = vmatmul.mubr.bf16.gmra.mrb[40].mxu0 %v1254_v60  ;;  %663 = vmatmul.mubr.bf16.gmra.mrb[40].mxu1 %v1259_v61 }
  0x92   :  { %566 = vmatprep.mubr.bf16.mxu0 %v1257_v62  ;;  %670 = vmatprep.mubr.bf16.mxu1 %v1028_v63 }
  0x99   :  { %567 = vmatmul.mubr.bf16.gmra.mrb[44].mxu0 %v1260_v0  ;;  %671 = vmatmul.mubr.bf16.gmra.mrb[44].mxu1 %v1027_v1 }
  0x9a   :  { %574 = vmatprep.mubr.bf16.mxu0 %v1262_v2 }
  0xa1   :  { %575 = vmatmul.mubr.bf16.gmra.mrb[48].mxu0 %v1265_v3 }
 0x114   :  { %v480_v5 = vpop.f32.mrb[0].mxu0  ;;  %v584_v6 = vpop.f32.mrb[0].mxu1 }
 0x115   :  { %v481_v7 = vadd.f32 %v1517_v4, %v480_v5  ;;  %v482_v8 = vpop.f32.mrb[1].mxu0  ;;  %v585_v9 = vadd.f32 %v1517_v4, %v584_v6  ;;  %v586_v10 = vpop.f32.mrb[1].mxu1 }
 0x116   :  { %v483_v11 = vpop.f32.mrb[2].mxu0  ;;  %v587_v12 = vpop.f32.mrb[2].mxu1 }
 0x117   :  { %v678_v13 = vmax.f32 %v481_v7, 0.0  ;;  %v484_v14 = vadd.f32 %v1517_v4, %v483_v11  ;;  %v485_v15 = vpop.f32.mrb[3].mxu0  ;;  %v704_v16 = vmax.f32 %v585_v9, 0.0  ;;  %v588_v17 = vadd.f32 %v1517_v4, %v587_v12  ;;  %v589_v18 = vpop.f32.mrb[3].mxu1 }
 0x119   :  { %v1094_v19 = vpack.c.bf16 %v678_v13, %v678_v13  ;;  %v679_v20 = vmax.f32 %v484_v14, 0.0  ;;  %v1120_v21 = vpack.c.bf16 %v704_v16, %v704_v16  ;;  %v705_v22 = vmax.f32 %v588_v17, 0.0 }
 0x11b   :  { %925 = vst.msk [vmem:[%s1767_s3] sm:$0xf] %vm924_vm0, %v1094_v19  ;;  %v1095_v23 = vpack.c.bf16 %v679_v20, %v679_v20  ;;  %951 = vst.msk [vmem:[%s1767_s3 + $0x68] sm:$0xf] %vm924_vm0, %v1120_v21  ;;  %v1121_v24 = vpack.c.bf16 %v705_v22, %v705_v22 }
 0x11c   :  { %v488_v25 = vpop.f32.mrb[4].mxu0  ;;  %v592_v26 = vpop.f32.mrb[4].mxu1 }
 0x11d   :  { %926 = vst.msk [vmem:[%s1767_s3 + $0x4] sm:$0xf] %vm924_vm0, %v1095_v23  ;;  %v489_v27 = vadd.f32 %v1517_v4, %v488_v25  ;;  %v490_v28 = vpop.f32.mrb[5].mxu0  ;;  %952 = vst.msk [vmem:[%s1767_s3 + $0x6c] sm:$0xf] %vm924_vm0, %v1121_v24  ;;  %v593_v29 = vadd.f32 %v1517_v4, %v592_v26  ;;  %v594_v30 = vpop.f32.mrb[5].mxu1 }
 0x11e   :  { %v491_v31 = vpop.f32.mrb[6].mxu0  ;;  %v595_v32 = vpop.f32.mrb[6].mxu1 }
 0x11f   :  { %v680_v33 = vmax.f32 %v489_v27, 0.0  ;;  %v492_v34 = vadd.f32 %v1517_v4, %v491_v31  ;;  %v493_v35 = vpop.f32.mrb[7].mxu0  ;;  %v706_v36 = vmax.f32 %v593_v29, 0.0  ;;  %v596_v37 = vadd.f32 %v1517_v4, %v595_v32  ;;  %v597_v38 = vpop.f32.mrb[7].mxu1 }
 0x121   :  { %v1096_v39 = vpack.c.bf16 %v680_v33, %v680_v33  ;;  %v681_v40 = vmax.f32 %v492_v34, 0.0  ;;  %v1122_v41 = vpack.c.bf16 %v706_v36, %v706_v36  ;;  %v707_v42 = vmax.f32 %v596_v37, 0.0 }
 0x123   :  { %927 = vst.msk [vmem:[%s1767_s3 + $0x8] sm:$0xf] %vm924_vm0, %v1096_v39  ;;  %v1097_v43 = vpack.c.bf16 %v681_v40, %v681_v40  ;;  %953 = vst.msk [vmem:[%s1767_s3 + $0x70] sm:$0xf] %vm924_vm0, %v1122_v41  ;;  %v1123_v44 = vpack.c.bf16 %v707_v42, %v707_v42 }
 0x124   :  { %v496_v45 = vpop.f32.mrb[8].mxu0  ;;  %v600_v46 = vpop.f32.mrb[8].mxu1 }
 0x125   :  { %928 = vst.msk [vmem:[%s1767_s3 + $0xc] sm:$0xf] %vm924_vm0, %v1097_v43  ;;  %v497_v47 = vadd.f32 %v1517_v4, %v496_v45  ;;  %v498_v48 = vpop.f32.mrb[9].mxu0  ;;  %954 = vst.msk [vmem:[%s1767_s3 + $0x74] sm:$0xf] %vm924_vm0, %v1123_v44  ;;  %v601_v49 = vadd.f32 %v1517_v4, %v600_v46  ;;  %v602_v50 = vpop.f32.mrb[9].mxu1 }
 0x126   :  { %v499_v51 = vpop.f32.mrb[10].mxu0  ;;  %v603_v52 = vpop.f32.mrb[10].mxu1 }
 0x127   :  { %v682_v53 = vmax.f32 %v497_v47, 0.0  ;;  %v500_v54 = vadd.f32 %v1517_v4, %v499_v51  ;;  %v501_v55 = vpop.f32.mrb[11].mxu0  ;;  %v708_v56 = vmax.f32 %v601_v49, 0.0  ;;  %v604_v57 = vadd.f32 %v1517_v4, %v603_v52  ;;  %v605_v58 = vpop.f32.mrb[11].mxu1 }
 0x129   :  { %v1098_v59 = vpack.c.bf16 %v682_v53, %v682_v53  ;;  %v683_v60 = vmax.f32 %v500_v54, 0.0  ;;  %v1124_v61 = vpack.c.bf16 %v708_v56, %v708_v56  ;;  %v709_v62 = vmax.f32 %v604_v57, 0.0 }
 0x12b   :  { %929 = vst.msk [vmem:[%s1767_s3 + $0x10] sm:$0xf] %vm924_vm0, %v1098_v59  ;;  %v1099_v63 = vpack.c.bf16 %v683_v60, %v683_v60  ;;  %955 = vst.msk [vmem:[%s1767_s3 + $0x78] sm:$0xf] %vm924_vm0, %v1124_v61  ;;  %v1125_v0 = vpack.c.bf16 %v709_v62, %v709_v62 }
 0x12c   :  { %v504_v1 = vpop.f32.mrb[12].mxu0  ;;  %v608_v2 = vpop.f32.mrb[12].mxu1 }
 0x12d   :  { %930 = vst.msk [vmem:[%s1767_s3 + $0x14] sm:$0xf] %vm924_vm0, %v1099_v63  ;;  %v505_v3 = vadd.f32 %v1517_v4, %v504_v1  ;;  %v506_v5 = vpop.f32.mrb[13].mxu0  ;;  %956 = vst.msk [vmem:[%s1767_s3 + $0x7c] sm:$0xf] %vm924_vm0, %v1125_v0  ;;  %v609_v6 = vadd.f32 %v1517_v4, %v608_v2  ;;  %v610_v7 = vpop.f32.mrb[13].mxu1 }
 0x12e   :  { %v507_v8 = vpop.f32.mrb[14].mxu0  ;;  %v611_v9 = vpop.f32.mrb[14].mxu1 }
 0x12f   :  { %v684_v10 = vmax.f32 %v505_v3, 0.0  ;;  %v508_v11 = vadd.f32 %v1517_v4, %v507_v8  ;;  %v509_v12 = vpop.f32.mrb[15].mxu0  ;;  %v710_v13 = vmax.f32 %v609_v6, 0.0  ;;  %v612_v14 = vadd.f32 %v1517_v4, %v611_v9  ;;  %v613_v15 = vpop.f32.mrb[15].mxu1 }
 0x131   :  { %v1100_v16 = vpack.c.bf16 %v684_v10, %v684_v10  ;;  %v685_v17 = vmax.f32 %v508_v11, 0.0  ;;  %v1126_v18 = vpack.c.bf16 %v710_v13, %v710_v13  ;;  %v711_v19 = vmax.f32 %v612_v14, 0.0 }
 0x133   :  { %931 = vst.msk [vmem:[%s1767_s3 + $0x18] sm:$0xf] %vm924_vm0, %v1100_v16  ;;  %v1101_v20 = vpack.c.bf16 %v685_v17, %v685_v17  ;;  %957 = vst.msk [vmem:[%s1767_s3 + $0x80] sm:$0xf] %vm924_vm0, %v1126_v18  ;;  %v1127_v21 = vpack.c.bf16 %v711_v19, %v711_v19 }
 0x134   :  { %v512_v22 = vpop.f32.mrb[16].mxu0  ;;  %v616_v23 = vpop.f32.mrb[16].mxu1 }
 0x135   :  { %932 = vst.msk [vmem:[%s1767_s3 + $0x1c] sm:$0xf] %vm924_vm0, %v1101_v20  ;;  %v513_v24 = vadd.f32 %v1517_v4, %v512_v22  ;;  %v514_v25 = vpop.f32.mrb[17].mxu0  ;;  %958 = vst.msk [vmem:[%s1767_s3 + $0x84] sm:$0xf] %vm924_vm0, %v1127_v21  ;;  %v617_v26 = vadd.f32 %v1517_v4, %v616_v23  ;;  %v618_v27 = vpop.f32.mrb[17].mxu1 }
 0x136   :  { %v515_v28 = vpop.f32.mrb[18].mxu0  ;;  %v619_v29 = vpop.f32.mrb[18].mxu1 }
 0x137   :  { %v686_v30 = vmax.f32 %v513_v24, 0.0  ;;  %v516_v31 = vadd.f32 %v1517_v4, %v515_v28  ;;  %v517_v32 = vpop.f32.mrb[19].mxu0  ;;  %v712_v33 = vmax.f32 %v617_v26, 0.0  ;;  %v620_v34 = vadd.f32 %v1517_v4, %v619_v29  ;;  %v621_v35 = vpop.f32.mrb[19].mxu1 }
 0x139   :  { %v1102_v36 = vpack.c.bf16 %v686_v30, %v686_v30  ;;  %v687_v37 = vmax.f32 %v516_v31, 0.0  ;;  %v1128_v38 = vpack.c.bf16 %v712_v33, %v712_v33  ;;  %v713_v39 = vmax.f32 %v620_v34, 0.0 }
 0x13b   :  { %933 = vst.msk [vmem:[%s1767_s3 + $0x20] sm:$0xf] %vm924_vm0, %v1102_v36  ;;  %v1103_v40 = vpack.c.bf16 %v687_v37, %v687_v37  ;;  %959 = vst.msk [vmem:[%s1767_s3 + $0x88] sm:$0xf] %vm924_vm0, %v1128_v38  ;;  %v1129_v41 = vpack.c.bf16 %v713_v39, %v713_v39 }
 0x13c   :  { %v520_v42 = vpop.f32.mrb[20].mxu0  ;;  %v624_v43 = vpop.f32.mrb[20].mxu1 }
 0x13d   :  { %934 = vst.msk [vmem:[%s1767_s3 + $0x24] sm:$0xf] %vm924_vm0, %v1103_v40  ;;  %v521_v44 = vadd.f32 %v1517_v4, %v520_v42  ;;  %v522_v45 = vpop.f32.mrb[21].mxu0  ;;  %960 = vst.msk [vmem:[%s1767_s3 + $0x8c] sm:$0xf] %vm924_vm0, %v1129_v41  ;;  %v625_v46 = vadd.f32 %v1517_v4, %v624_v43  ;;  %v626_v47 = vpop.f32.mrb[21].mxu1 }
 0x13e   :  { %v523_v48 = vpop.f32.mrb[22].mxu0  ;;  %v627_v49 = vpop.f32.mrb[22].mxu1 }
 0x13f   :  { %v688_v50 = vmax.f32 %v521_v44, 0.0  ;;  %v524_v51 = vadd.f32 %v1517_v4, %v523_v48  ;;  %v525_v52 = vpop.f32.mrb[23].mxu0  ;;  %v714_v53 = vmax.f32 %v625_v46, 0.0  ;;  %v628_v54 = vadd.f32 %v1517_v4, %v627_v49  ;;  %v629_v55 = vpop.f32.mrb[23].mxu1 }
 0x141   :  { %v1104_v56 = vpack.c.bf16 %v688_v50, %v688_v50  ;;  %v689_v57 = vmax.f32 %v524_v51, 0.0  ;;  %v1130_v58 = vpack.c.bf16 %v714_v53, %v714_v53  ;;  %v715_v59 = vmax.f32 %v628_v54, 0.0 }
 0x143   :  { %935 = vst.msk [vmem:[%s1767_s3 + $0x28] sm:$0xf] %vm924_vm0, %v1104_v56  ;;  %v1105_v60 = vpack.c.bf16 %v689_v57, %v689_v57  ;;  %961 = vst.msk [vmem:[%s1767_s3 + $0x90] sm:$0xf] %vm924_vm0, %v1130_v58  ;;  %v1131_v61 = vpack.c.bf16 %v715_v59, %v715_v59 }
 0x144   :  { %v528_v62 = vpop.f32.mrb[24].mxu0  ;;  %v632_v63 = vpop.f32.mrb[24].mxu1 }
 0x145   :  { %936 = vst.msk [vmem:[%s1767_s3 + $0x2c] sm:$0xf] %vm924_vm0, %v1105_v60  ;;  %v529_v0 = vadd.f32 %v1517_v4, %v528_v62  ;;  %v530_v1 = vpop.f32.mrb[25].mxu0  ;;  %962 = vst.msk [vmem:[%s1767_s3 + $0x94] sm:$0xf] %vm924_vm0, %v1131_v61  ;;  %v633_v2 = vadd.f32 %v1517_v4, %v632_v63  ;;  %v634_v3 = vpop.f32.mrb[25].mxu1 }
 0x146   :  { %v531_v5 = vpop.f32.mrb[26].mxu0  ;;  %v635_v6 = vpop.f32.mrb[26].mxu1 }
 0x147   :  { %v690_v7 = vmax.f32 %v529_v0, 0.0  ;;  %v532_v8 = vadd.f32 %v1517_v4, %v531_v5  ;;  %v533_v9 = vpop.f32.mrb[27].mxu0  ;;  %v716_v10 = vmax.f32 %v633_v2, 0.0  ;;  %v636_v11 = vadd.f32 %v1517_v4, %v635_v6  ;;  %v637_v12 = vpop.f32.mrb[27].mxu1 }
 0x149   :  { %v1106_v13 = vpack.c.bf16 %v690_v7, %v690_v7  ;;  %v691_v14 = vmax.f32 %v532_v8, 0.0  ;;  %v1132_v15 = vpack.c.bf16 %v716_v10, %v716_v10  ;;  %v717_v16 = vmax.f32 %v636_v11, 0.0 }
 0x14b   :  { %937 = vst.msk [vmem:[%s1767_s3 + $0x30] sm:$0xf] %vm924_vm0, %v1106_v13  ;;  %v1107_v17 = vpack.c.bf16 %v691_v14, %v691_v14  ;;  %963 = vst.msk [vmem:[%s1767_s3 + $0x98] sm:$0xf] %vm924_vm0, %v1132_v15  ;;  %v1133_v18 = vpack.c.bf16 %v717_v16, %v717_v16 }
 0x14c   :  { %v536_v19 = vpop.f32.mrb[28].mxu0  ;;  %v640_v20 = vpop.f32.mrb[28].mxu1 }
 0x14d   :  { %938 = vst.msk [vmem:[%s1767_s3 + $0x34] sm:$0xf] %vm924_vm0, %v1107_v17  ;;  %v537_v21 = vadd.f32 %v1517_v4, %v536_v19  ;;  %v538_v22 = vpop.f32.mrb[29].mxu0  ;;  %964 = vst.msk [vmem:[%s1767_s3 + $0x9c] sm:$0xf] %vm924_vm0, %v1133_v18  ;;  %v641_v23 = vadd.f32 %v1517_v4, %v640_v20  ;;  %v642_v24 = vpop.f32.mrb[29].mxu1 }
 0x14e   :  { %v539_v25 = vpop.f32.mrb[30].mxu0  ;;  %v643_v26 = vpop.f32.mrb[30].mxu1 }
 0x14f   :  { %v692_v27 = vmax.f32 %v537_v21, 0.0  ;;  %v540_v28 = vadd.f32 %v1517_v4, %v539_v25  ;;  %v541_v29 = vpop.f32.mrb[31].mxu0  ;;  %v718_v30 = vmax.f32 %v641_v23, 0.0  ;;  %v644_v31 = vadd.f32 %v1517_v4, %v643_v26  ;;  %v645_v32 = vpop.f32.mrb[31].mxu1 }
 0x151   :  { %v1108_v33 = vpack.c.bf16 %v692_v27, %v692_v27  ;;  %v693_v34 = vmax.f32 %v540_v28, 0.0  ;;  %v1134_v35 = vpack.c.bf16 %v718_v30, %v718_v30  ;;  %v719_v36 = vmax.f32 %v644_v31, 0.0 }
 0x153   :  { %939 = vst.msk [vmem:[%s1767_s3 + $0x38] sm:$0xf] %vm924_vm0, %v1108_v33  ;;  %v1109_v37 = vpack.c.bf16 %v693_v34, %v693_v34  ;;  %965 = vst.msk [vmem:[%s1767_s3 + $0xa0] sm:$0xf] %vm924_vm0, %v1134_v35  ;;  %v1135_v38 = vpack.c.bf16 %v719_v36, %v719_v36 }
 0x154   :  { %v544_v39 = vpop.f32.mrb[32].mxu0  ;;  %v648_v40 = vpop.f32.mrb[32].mxu1 }
 0x155   :  { %940 = vst.msk [vmem:[%s1767_s3 + $0x3c] sm:$0xf] %vm924_vm0, %v1109_v37  ;;  %v545_v41 = vadd.f32 %v1517_v4, %v544_v39  ;;  %v546_v42 = vpop.f32.mrb[33].mxu0  ;;  %966 = vst.msk [vmem:[%s1767_s3 + $0xa4] sm:$0xf] %vm924_vm0, %v1135_v38  ;;  %v649_v43 = vadd.f32 %v1517_v4, %v648_v40  ;;  %v650_v44 = vpop.f32.mrb[33].mxu1 }
 0x156   :  { %v547_v45 = vpop.f32.mrb[34].mxu0  ;;  %v651_v46 = vpop.f32.mrb[34].mxu1 }
 0x157   :  { %v694_v47 = vmax.f32 %v545_v41, 0.0  ;;  %v548_v48 = vadd.f32 %v1517_v4, %v547_v45  ;;  %v549_v49 = vpop.f32.mrb[35].mxu0  ;;  %v720_v50 = vmax.f32 %v649_v43, 0.0  ;;  %v652_v51 = vadd.f32 %v1517_v4, %v651_v46  ;;  %v653_v52 = vpop.f32.mrb[35].mxu1 }
 0x159   :  { %v1110_v53 = vpack.c.bf16 %v694_v47, %v694_v47  ;;  %v695_v54 = vmax.f32 %v548_v48, 0.0  ;;  %v1136_v55 = vpack.c.bf16 %v720_v50, %v720_v50  ;;  %v721_v56 = vmax.f32 %v652_v51, 0.0 }
 0x15b   :  { %941 = vst.msk [vmem:[%s1767_s3 + $0x40] sm:$0xf] %vm924_vm0, %v1110_v53  ;;  %v1111_v57 = vpack.c.bf16 %v695_v54, %v695_v54  ;;  %967 = vst.msk [vmem:[%s1767_s3 + $0xa8] sm:$0xf] %vm924_vm0, %v1136_v55  ;;  %v1137_v58 = vpack.c.bf16 %v721_v56, %v721_v56 }
 0x15c   :  { %v552_v59 = vpop.f32.mrb[36].mxu0  ;;  %v656_v60 = vpop.f32.mrb[36].mxu1 }
 0x15d   :  { %942 = vst.msk [vmem:[%s1767_s3 + $0x44] sm:$0xf] %vm924_vm0, %v1111_v57  ;;  %v553_v61 = vadd.f32 %v1517_v4, %v552_v59  ;;  %v554_v62 = vpop.f32.mrb[37].mxu0  ;;  %968 = vst.msk [vmem:[%s1767_s3 + $0xac] sm:$0xf] %vm924_vm0, %v1137_v58  ;;  %v657_v63 = vadd.f32 %v1517_v4, %v656_v60  ;;  %v658_v0 = vpop.f32.mrb[37].mxu1 }
 0x15e   :  { %v555_v1 = vpop.f32.mrb[38].mxu0  ;;  %v659_v2 = vpop.f32.mrb[38].mxu1 }
 0x15f   :  { %v696_v3 = vmax.f32 %v553_v61, 0.0  ;;  %v556_v5 = vadd.f32 %v1517_v4, %v555_v1  ;;  %v557_v6 = vpop.f32.mrb[39].mxu0  ;;  %v722_v7 = vmax.f32 %v657_v63, 0.0  ;;  %v660_v8 = vadd.f32 %v1517_v4, %v659_v2  ;;  %v661_v9 = vpop.f32.mrb[39].mxu1 }
 0x161   :  { %v1112_v10 = vpack.c.bf16 %v696_v3, %v696_v3  ;;  %v697_v11 = vmax.f32 %v556_v5, 0.0  ;;  %v1138_v12 = vpack.c.bf16 %v722_v7, %v722_v7  ;;  %v723_v13 = vmax.f32 %v660_v8, 0.0 }
 0x163   :  { %943 = vst.msk [vmem:[%s1767_s3 + $0x48] sm:$0xf] %vm924_vm0, %v1112_v10  ;;  %v1113_v14 = vpack.c.bf16 %v697_v11, %v697_v11  ;;  %969 = vst.msk [vmem:[%s1767_s3 + $0xb0] sm:$0xf] %vm924_vm0, %v1138_v12  ;;  %v1139_v15 = vpack.c.bf16 %v723_v13, %v723_v13 }
 0x164   :  { %v560_v16 = vpop.f32.mrb[40].mxu0  ;;  %v664_v17 = vpop.f32.mrb[40].mxu1 }
 0x165   :  { %944 = vst.msk [vmem:[%s1767_s3 + $0x4c] sm:$0xf] %vm924_vm0, %v1113_v14  ;;  %v561_v18 = vadd.f32 %v1517_v4, %v560_v16  ;;  %v562_v19 = vpop.f32.mrb[41].mxu0  ;;  %970 = vst.msk [vmem:[%s1767_s3 + $0xb4] sm:$0xf] %vm924_vm0, %v1139_v15  ;;  %v665_v20 = vadd.f32 %v1517_v4, %v664_v17  ;;  %v666_v21 = vpop.f32.mrb[41].mxu1 }
 0x166   :  { %v563_v22 = vpop.f32.mrb[42].mxu0  ;;  %v667_v23 = vpop.f32.mrb[42].mxu1 }
 0x167   :  { %v698_v24 = vmax.f32 %v561_v18, 0.0  ;;  %v564_v25 = vadd.f32 %v1517_v4, %v563_v22  ;;  %v565_v26 = vpop.f32.mrb[43].mxu0  ;;  %v724_v27 = vmax.f32 %v665_v20, 0.0  ;;  %v668_v28 = vadd.f32 %v1517_v4, %v667_v23  ;;  %v669_v29 = vpop.f32.mrb[43].mxu1 }
 0x169   :  { %v1114_v30 = vpack.c.bf16 %v698_v24, %v698_v24  ;;  %v699_v31 = vmax.f32 %v564_v25, 0.0  ;;  %v1140_v32 = vpack.c.bf16 %v724_v27, %v724_v27  ;;  %v725_v33 = vmax.f32 %v668_v28, 0.0 }
 0x16b   :  { %945 = vst.msk [vmem:[%s1767_s3 + $0x50] sm:$0xf] %vm924_vm0, %v1114_v30  ;;  %v1115_v34 = vpack.c.bf16 %v699_v31, %v699_v31  ;;  %971 = vst.msk [vmem:[%s1767_s3 + $0xb8] sm:$0xf] %vm924_vm0, %v1140_v32  ;;  %v1141_v35 = vpack.c.bf16 %v725_v33, %v725_v33 }
 0x16c   :  { %v568_v36 = vpop.f32.mrb[44].mxu0  ;;  %v672_v37 = vpop.f32.mrb[44].mxu1 }
 0x16d   :  { %946 = vst.msk [vmem:[%s1767_s3 + $0x54] sm:$0xf] %vm924_vm0, %v1115_v34  ;;  %v569_v38 = vadd.f32 %v1517_v4, %v568_v36  ;;  %v570_v39 = vpop.f32.mrb[45].mxu0  ;;  %972 = vst.msk [vmem:[%s1767_s3 + $0xbc] sm:$0xf] %vm924_vm0, %v1141_v35  ;;  %v673_v40 = vadd.f32 %v1517_v4, %v672_v37  ;;  %v674_v41 = vpop.f32.mrb[45].mxu1 }
 0x16e   :  { %v571_v42 = vpop.f32.mrb[46].mxu0  ;;  %v675_v43 = vpop.f32.mrb[46].mxu1 }
 0x16f   :  { %v700_v44 = vmax.f32 %v569_v38, 0.0  ;;  %v572_v45 = vadd.f32 %v1517_v4, %v571_v42  ;;  %v573_v46 = vpop.f32.mrb[47].mxu0  ;;  %v726_v47 = vmax.f32 %v673_v40, 0.0  ;;  %v676_v48 = vpop.f32.mrb[47].mxu1 }
 0x171   :  { %v1116_v49 = vpack.c.bf16 %v700_v44, %v700_v44  ;;  %v701_v50 = vmax.f32 %v572_v45, 0.0  ;;  %v1142_v51 = vpack.c.bf16 %v726_v47, %v726_v47 }
 0x173   :  { %947 = vst.msk [vmem:[%s1767_s3 + $0x58] sm:$0xf] %vm924_vm0, %v1116_v49  ;;  %v1117_v52 = vpack.c.bf16 %v701_v50, %v701_v50  ;;  %973 = vst.msk [vmem:[%s1767_s3 + $0xc0] sm:$0xf] %vm924_vm0, %v1142_v51 }
 0x174   :  { %v576_v53 = vpop.f32.mrb[48].mxu0 }
 0x175   :  { %948 = vst.msk [vmem:[%s1767_s3 + $0x5c] sm:$0xf] %vm924_vm0, %v1117_v52  ;;  %v577_v54 = vadd.f32 %v1517_v4, %v576_v53  ;;  %v578_v55 = vpop.f32.mrb[49].mxu0 }
 0x176   :  { %v579_v56 = vpop.f32.mrb[50].mxu0 }
 0x177   :  { %v702_v57 = vmax.f32 %v577_v54, 0.0  ;;  %v580_v58 = vadd.f32 %v1517_v4, %v579_v56  ;;  %v581_v59 = vpop.f32.mrb[51].mxu0 }
 0x179   :  { %v1118_v60 = vpack.c.bf16 %v702_v57, %v702_v57  ;;  %v703_v61 = vmax.f32 %v580_v58, 0.0 }
 0x17b   :  { %949 = vst.msk [vmem:[%s1767_s3 + $0x60] sm:$0xf] %vm924_vm0, %v1118_v60  ;;  %v1119_v62 = vpack.c.bf16 %v703_v61, %v703_v61 }
 0x17d   :  { %950 = vst.msk [vmem:[%s1767_s3 + $0x64] sm:$0xf] %vm924_vm0, %v1119_v62 }

// kernel: q_network_forward.5
= control target key start
LH: loop header
LB: loop body
LE: loop exit
PB: predicated region body
PF: predicated region fallthrough
CT: control target
= control target key end

     0   :  { %vm580_vm0 = vcmask 519168   ;;  %s1037_s1 = inlined_call_operand.vmem [shape: bf16[512,64], index: 1, kind: input, shape index: {}]   ;;  %s1038_s0 = inlined_call_operand.vmem [shape: bf16[72,512], index: 0, kind: input, shape index: {}]   ;;  %s1039_s2 = inlined_call_operand.vmem [shape: f32[1,64], index: 2, kind: input, shape index: {}]   ;;  %s1040_s3 = inlined_call_operand.vmem [shape: bf16[72,64], index: 3, kind: output, shape index: {}]  }
   0x1   :  { %v757_v0 = vld [vmem:[%s1037_s1 + $0x40] sm:$0xff]   ;;  %v761_v4 = vld [vmem:[%s1037_s1 + $0x48] sm:$0xff]   ;;  %v765_v8 = vld [vmem:[%s1037_s1 + $0x50] sm:$0xff]  }
   0x2   :  { %v758_v1 = vld [vmem:[%s1037_s1 + $0xc0] sm:$0xff]   ;;  %665 = vmatprep.subr.bf16.mxu0 %v757_v0  ;;  %v762_v5 = vld [vmem:[%s1037_s1 + $0xc8] sm:$0xff]   ;;  %v766_v9 = vld [vmem:[%s1037_s1 + $0xd0] sm:$0xff]  }
   0x3   :  { %v759_v2 = vld [vmem:[%s1037_s1] sm:$0xff]   ;;  %711 = vmatprep.subr.bf16.mxu1 %v758_v1  ;;  %v763_v6 = vld [vmem:[%s1037_s1 + $0x8] sm:$0xff]   ;;  %v767_v10 = vld [vmem:[%s1037_s1 + $0x10] sm:$0xff]  }
   0x4   :  { %v760_v3 = vld [vmem:[%s1037_s1 + $0x80] sm:$0xff]   ;;  %666 = vmatpush3.bf16.msra.mxu0 %v759_v2  ;;  %v764_v7 = vld [vmem:[%s1037_s1 + $0x88] sm:$0xff]   ;;  %v768_v11 = vld [vmem:[%s1037_s1 + $0x90] sm:$0xff]  }
   0x5   :  { %712 = vmatpush3.bf16.msra.mxu1 %v760_v3  ;;  %667 = vmatprep.subr.bf16.mxu0 %v761_v4  ;;  %v769_v12 = vld [vmem:[%s1037_s1 + $0x58] sm:$0xff]   ;;  %v773_v16 = vld [vmem:[%s1037_s1 + $0x60] sm:$0xff]   ;;  %v777_v20 = vld [vmem:[%s1037_s1 + $0x68] sm:$0xff]  }
   0x6   :  { %713 = vmatprep.subr.bf16.mxu1 %v762_v5  ;;  %v770_v13 = vld [vmem:[%s1037_s1 + $0xd8] sm:$0xff]   ;;  %v774_v17 = vld [vmem:[%s1037_s1 + $0xe0] sm:$0xff]   ;;  %v778_v21 = vld [vmem:[%s1037_s1 + $0xe8] sm:$0xff]  }
   0x7   :  { %v771_v14 = vld [vmem:[%s1037_s1 + $0x18] sm:$0xff]   ;;  %v775_v18 = vld [vmem:[%s1037_s1 + $0x20] sm:$0xff]   ;;  %v779_v22 = vld [vmem:[%s1037_s1 + $0x28] sm:$0xff]  }
   0x8   :  { %668 = vmatpush3.bf16.msra.mxu0 %v763_v6  ;;  %v772_v15 = vld [vmem:[%s1037_s1 + $0x98] sm:$0xff]   ;;  %v776_v19 = vld [vmem:[%s1037_s1 + $0xa0] sm:$0xff]   ;;  %v780_v23 = vld [vmem:[%s1037_s1 + $0xa8] sm:$0xff]  }
   0x9   :  { %714 = vmatpush3.bf16.msra.mxu1 %v764_v7  ;;  %669 = vmatprep.subr.bf16.mxu0 %v765_v8  ;;  %v781_v24 = vld [vmem:[%s1037_s1 + $0x70] sm:$0xff]   ;;  %v785_v28 = vld [vmem:[%s1037_s1 + $0x78] sm:$0xff]   ;;  %v31_v46 = vld [vmem:[%s1038_s0 + $0x80] sm:$0xff] }
   0xa   :  { %715 = vmatprep.subr.bf16.mxu1 %v766_v9  ;;  %v782_v25 = vld [vmem:[%s1037_s1 + $0xf0] sm:$0xff]   ;;  %v786_v29 = vld [vmem:[%s1037_s1 + $0xf8] sm:$0xff]   ;;  %v32_v47 = vld [vmem:[%s1038_s0 + $0x88] sm:$0xff]  ;;  %v612_v50 = vcombine.high %v31_v46, %v31_v46  ;;  %v611_v52 = vcombine.low %v31_v46, %v31_v46 }
   0xb   :  { %v783_v26 = vld [vmem:[%s1037_s1 + $0x30] sm:$0xff]   ;;  %v787_v30 = vld [vmem:[%s1037_s1 + $0x38] sm:$0xff]   ;;  %v614_v51 = vcombine.high %v32_v47, %v32_v47  ;;  %v613_v53 = vcombine.low %v32_v47, %v32_v47  ;;  %v990_v56 = vld [vmem:[%s1039_s2] ss:$0 sm:$0xff] }
   0xc   :  { %670 = vmatpush3.bf16.msra.mxu0 %v767_v10  ;;  %v784_v27 = vld [vmem:[%s1037_s1 + $0xb0] sm:$0xff]   ;;  %v788_v31 = vld [vmem:[%s1037_s1 + $0xb8] sm:$0xff]  }
   0xd   :  { %716 = vmatpush3.bf16.msra.mxu1 %v768_v11  ;;  %671 = vmatprep.subr.bf16.mxu0 %v769_v12  ;;  %v789_v32 = vld [vmem:[%s1038_s0] ss:$16 sps:$4 sm:$0xff]   ;;  %v791_v33 = vld [vmem:[%s1038_s0 + $0x4] ss:$16 sps:$4 sm:$0xff]   ;;  %v792_v34 = vld [vmem:[%s1038_s0 + $0x8] ss:$16 sps:$4 sm:$0xff]  }
   0xe   :  { %717 = vmatprep.subr.bf16.mxu1 %v770_v13  ;;  %v794_v35 = vld [vmem:[%s1038_s0 + $0xc] ss:$16 sps:$4 sm:$0xff]   ;;  %422 = vmatprep.mubr.bf16.mxu0 %v791_v33  ;;  %v795_v36 = vld [vmem:[%s1038_s0 + $0x24] ss:$16 sps:$4 sm:$0xff]   ;;  %v799_v38 = vld [vmem:[%s1038_s0 + $0x20] ss:$16 sps:$4 sm:$0xff]  }
   0xf   :  { %494 = vmatprep.mubr.bf16.mxu1 %v794_v35  ;;  %v797_v37 = vld [vmem:[%s1038_s0 + $0x2c] ss:$16 sps:$4 sm:$0xff]   ;;  %v800_v39 = vld [vmem:[%s1038_s0 + $0x28] ss:$16 sps:$4 sm:$0xff]   ;;  %v801_v40 = vld [vmem:[%s1038_s0 + $0x44] ss:$16 sps:$4 sm:$0xff]  }
  0x10   :  { %672 = vmatpush3.bf16.msra.mxu0 %v771_v14  ;;  %v803_v41 = vld [vmem:[%s1038_s0 + $0x4c] ss:$16 sps:$4 sm:$0xff]   ;;  %v805_v42 = vld [vmem:[%s1038_s0 + $0x40] ss:$16 sps:$4 sm:$0xff]   ;;  %v806_v43 = vld [vmem:[%s1038_s0 + $0x48] ss:$16 sps:$4 sm:$0xff]  }
  0x11   :  { %718 = vmatpush3.bf16.msra.mxu1 %v772_v15  ;;  %673 = vmatprep.subr.bf16.mxu0 %v773_v16  ;;  %v807_v44 = vld [vmem:[%s1038_s0 + $0x64] ss:$16 sps:$4 sm:$0xff]   ;;  %v809_v45 = vld [vmem:[%s1038_s0 + $0x6c] ss:$16 sps:$4 sm:$0xff]   ;;  %v811_v48 = vld [vmem:[%s1038_s0 + $0x60] ss:$16 sps:$4 sm:$0xff]  }
  0x12   :  { %719 = vmatprep.subr.bf16.mxu1 %v774_v17  ;;  %v812_v49 = vld [vmem:[%s1038_s0 + $0x68] ss:$16 sps:$4 sm:$0xff]  }
  0x14   :  { %674 = vmatpush3.bf16.msra.mxu0 %v775_v18 }
  0x15   :  { %720 = vmatpush3.bf16.msra.mxu1 %v776_v19  ;;  %675 = vmatprep.subr.bf16.mxu0 %v777_v20 }
  0x16   :  { %721 = vmatprep.subr.bf16.mxu1 %v778_v21 }
  0x18   :  { %676 = vmatpush3.bf16.msra.mxu0 %v779_v22 }
  0x19   :  { %722 = vmatpush3.bf16.msra.mxu1 %v780_v23  ;;  %677 = vmatprep.subr.bf16.mxu0 %v781_v24 }
  0x1a   :  { %723 = vmatprep.subr.bf16.mxu1 %v782_v25 }
  0x1c   :  { %678 = vmatpush3.bf16.msra.mxu0 %v783_v26 }
  0x1d   :  { %724 = vmatpush3.bf16.msra.mxu1 %v784_v27  ;;  %679 = vmatprep.subr.bf16.mxu0 %v785_v28 }
  0x1e   :  { %725 = vmatprep.subr.bf16.mxu1 %v786_v29 }
  0x20   :  { %680 = vmatpush3.bf16.msra.mxu0 %v787_v30 }
  0x21   :  { %726 = vmatpush3.bf16.msra.mxu1 %v788_v31 }
  0x23   :  { %423 = vmatmul.mubr.bf16.vlgmr.msra.gmra.mrb[0].mxu0 %v789_v32 }
  0x24   :  { %495 = vmatmul.mubr.bf16.vlgmr.msra.gmra.mrb[0].mxu1 %v792_v34  ;;  %430 = vmatprep.mubr.bf16.mxu0 %v795_v36 }
  0x25   :  { %502 = vmatprep.mubr.bf16.mxu1 %v797_v37 }
  0x2b   :  { %431 = vmatmul.mubr.bf16.gmra.mrb[4].mxu0 %v799_v38 }
  0x2c   :  { %503 = vmatmul.mubr.bf16.gmra.mrb[4].mxu1 %v800_v39  ;;  %438 = vmatprep.mubr.bf16.mxu0 %v801_v40 }
  0x2d   :  { %510 = vmatprep.mubr.bf16.mxu1 %v803_v41 }
  0x33   :  { %439 = vmatmul.mubr.bf16.gmra.mrb[8].mxu0 %v805_v42 }
  0x34   :  { %511 = vmatmul.mubr.bf16.gmra.mrb[8].mxu1 %v806_v43  ;;  %446 = vmatprep.mubr.bf16.mxu0 %v807_v44 }
  0x35   :  { %518 = vmatprep.mubr.bf16.mxu1 %v809_v45 }
  0x3b   :  { %447 = vmatmul.mubr.bf16.gmra.mrb[12].mxu0 %v811_v48 }
  0x3c   :  { %519 = vmatmul.mubr.bf16.gmra.mrb[12].mxu1 %v812_v49  ;;  %454 = vmatprep.mubr.bf16.mxu0 %v612_v50 }
  0x3d   :  { %526 = vmatprep.mubr.bf16.mxu1 %v614_v51 }
  0x43   :  { %455 = vmatmul.mubr.bf16.gmra.mrb[16].mxu0 %v611_v52 }
  0x44   :  { %527 = vmatmul.mubr.bf16.gmra.mrb[16].mxu1 %v613_v53 }
  0xf6   :  { %v681_v54 = vpop.f32.mrb[0].mxu0 }
  0xf7   :  { %v727_v55 = vpop.f32.mrb[0].mxu1  ;;  %v682_v57 = vpop.f32.mrb[1].mxu0 }
  0xf8   :  { %v683_v58 = vadd.f32 %v682_v57, %v681_v54  ;;  %v728_v59 = vpop.f32.mrb[1].mxu1  ;;  %v684_v60 = vpop.f32.mrb[2].mxu0 }
  0xf9   :  { %v729_v61 = vadd.f32 %v728_v59, %v727_v55  ;;  %v730_v62 = vpop.f32.mrb[2].mxu1  ;;  %v685_v63 = vpop.f32.mrb[3].mxu0 }
  0xfa   :  { %v425_v0 = vadd.f32 %v683_v58, %v990_v56  ;;  %v686_v1 = vadd.f32 %v685_v63, %v684_v60  ;;  %v731_v2 = vpop.f32.mrb[3].mxu1 }
  0xfb   :  { %v732_v3 = vadd.f32 %v731_v2, %v730_v62 }
  0xfc   :  { %v497_v4 = vadd.f32 %v729_v61, %v425_v0  ;;  %v428_v5 = vadd.f32 %v686_v1, %v990_v56 }
  0xfe   :  { %v534_v6 = vmax.f32 %v497_v4, 0.0  ;;  %v500_v7 = vadd.f32 %v732_v3, %v428_v5  ;;  %v687_v8 = vpop.f32.mrb[4].mxu0 }
  0xff   :  { %v733_v9 = vpop.f32.mrb[4].mxu1  ;;  %v688_v10 = vpop.f32.mrb[5].mxu0 }
 0x100   :  { %v656_v11 = vpack.c.bf16 %v534_v6, %v534_v6  ;;  %v535_v12 = vmax.f32 %v500_v7, 0.0  ;;  %v689_v13 = vadd.f32 %v688_v10, %v687_v8  ;;  %v734_v14 = vpop.f32.mrb[5].mxu1  ;;  %v690_v15 = vpop.f32.mrb[6].mxu0 }
 0x101   :  { %v735_v16 = vadd.f32 %v734_v14, %v733_v9  ;;  %v736_v17 = vpop.f32.mrb[6].mxu1  ;;  %v691_v18 = vpop.f32.mrb[7].mxu0 }
 0x102   :  { %581 = vst.msk [vmem:[%s1040_s3] sm:$0xf] %vm580_vm0, %v656_v11  ;;  %v657_v19 = vpack.c.bf16 %v535_v12, %v535_v12  ;;  %v433_v20 = vadd.f32 %v689_v13, %v990_v56  ;;  %v692_v21 = vadd.f32 %v691_v18, %v690_v15  ;;  %v737_v22 = vpop.f32.mrb[7].mxu1 }
 0x103   :  { %v738_v23 = vadd.f32 %v737_v22, %v736_v17 }
 0x104   :  { %582 = vst.msk [vmem:[%s1040_s3 + $0x4] sm:$0xf] %vm580_vm0, %v657_v19  ;;  %v505_v24 = vadd.f32 %v735_v16, %v433_v20  ;;  %v436_v25 = vadd.f32 %v692_v21, %v990_v56 }
 0x106   :  { %v536_v26 = vmax.f32 %v505_v24, 0.0  ;;  %v508_v27 = vadd.f32 %v738_v23, %v436_v25  ;;  %v693_v28 = vpop.f32.mrb[8].mxu0 }
 0x107   :  { %v739_v29 = vpop.f32.mrb[8].mxu1  ;;  %v694_v30 = vpop.f32.mrb[9].mxu0 }
 0x108   :  { %v658_v31 = vpack.c.bf16 %v536_v26, %v536_v26  ;;  %v537_v32 = vmax.f32 %v508_v27, 0.0  ;;  %v695_v33 = vadd.f32 %v694_v30, %v693_v28  ;;  %v740_v34 = vpop.f32.mrb[9].mxu1  ;;  %v696_v35 = vpop.f32.mrb[10].mxu0 }
 0x109   :  { %v741_v36 = vadd.f32 %v740_v34, %v739_v29  ;;  %v742_v37 = vpop.f32.mrb[10].mxu1  ;;  %v697_v38 = vpop.f32.mrb[11].mxu0 }
 0x10a   :  { %583 = vst.msk [vmem:[%s1040_s3 + $0x8] sm:$0xf] %vm580_vm0, %v658_v31  ;;  %v659_v39 = vpack.c.bf16 %v537_v32, %v537_v32  ;;  %v441_v40 = vadd.f32 %v695_v33, %v990_v56  ;;  %v698_v41 = vadd.f32 %v697_v38, %v696_v35  ;;  %v743_v42 = vpop.f32.mrb[11].mxu1 }
 0x10b   :  { %v744_v43 = vadd.f32 %v743_v42, %v742_v37 }
 0x10c   :  { %584 = vst.msk [vmem:[%s1040_s3 + $0xc] sm:$0xf] %vm580_vm0, %v659_v39  ;;  %v513_v44 = vadd.f32 %v741_v36, %v441_v40  ;;  %v444_v45 = vadd.f32 %v698_v41, %v990_v56 }
 0x10e   :  { %v538_v46 = vmax.f32 %v513_v44, 0.0  ;;  %v516_v47 = vadd.f32 %v744_v43, %v444_v45  ;;  %v699_v48 = vpop.f32.mrb[12].mxu0 }
 0x10f   :  { %v745_v49 = vpop.f32.mrb[12].mxu1  ;;  %v700_v50 = vpop.f32.mrb[13].mxu0 }
 0x110   :  { %v660_v51 = vpack.c.bf16 %v538_v46, %v538_v46  ;;  %v539_v52 = vmax.f32 %v516_v47, 0.0  ;;  %v701_v53 = vadd.f32 %v700_v50, %v699_v48  ;;  %v746_v54 = vpop.f32.mrb[13].mxu1  ;;  %v702_v55 = vpop.f32.mrb[14].mxu0 }
 0x111   :  { %v747_v57 = vadd.f32 %v746_v54, %v745_v49  ;;  %v748_v58 = vpop.f32.mrb[14].mxu1  ;;  %v703_v59 = vpop.f32.mrb[15].mxu0 }
 0x112   :  { %585 = vst.msk [vmem:[%s1040_s3 + $0x10] sm:$0xf] %vm580_vm0, %v660_v51  ;;  %v661_v60 = vpack.c.bf16 %v539_v52, %v539_v52  ;;  %v449_v61 = vadd.f32 %v701_v53, %v990_v56  ;;  %v704_v62 = vadd.f32 %v703_v59, %v702_v55  ;;  %v749_v63 = vpop.f32.mrb[15].mxu1 }
 0x113   :  { %v750_v0 = vadd.f32 %v749_v63, %v748_v58 }
 0x114   :  { %586 = vst.msk [vmem:[%s1040_s3 + $0x14] sm:$0xf] %vm580_vm0, %v661_v60  ;;  %v521_v1 = vadd.f32 %v747_v57, %v449_v61  ;;  %v452_v2 = vadd.f32 %v704_v62, %v990_v56 }
 0x116   :  { %v540_v3 = vmax.f32 %v521_v1, 0.0  ;;  %v524_v4 = vadd.f32 %v750_v0, %v452_v2  ;;  %v705_v5 = vpop.f32.mrb[16].mxu0 }
 0x117   :  { %v751_v6 = vpop.f32.mrb[16].mxu1  ;;  %v706_v7 = vpop.f32.mrb[17].mxu0 }
 0x118   :  { %v662_v8 = vpack.c.bf16 %v540_v3, %v540_v3  ;;  %v541_v9 = vmax.f32 %v524_v4, 0.0  ;;  %v707_v10 = vadd.f32 %v706_v7, %v705_v5  ;;  %v752_v11 = vpop.f32.mrb[17].mxu1  ;;  %v708_v12 = vpop.f32.mrb[18].mxu0 }
 0x119   :  { %v753_v13 = vadd.f32 %v752_v11, %v751_v6  ;;  %v754_v14 = vpop.f32.mrb[18].mxu1  ;;  %v709_v15 = vpop.f32.mrb[19].mxu0 }
 0x11a   :  { %587 = vst.msk [vmem:[%s1040_s3 + $0x18] sm:$0xf] %vm580_vm0, %v662_v8  ;;  %v663_v16 = vpack.c.bf16 %v541_v9, %v541_v9  ;;  %v457_v17 = vadd.f32 %v707_v10, %v990_v56  ;;  %v755_v18 = vpop.f32.mrb[19].mxu1 }
 0x11c   :  { %588 = vst.msk [vmem:[%s1040_s3 + $0x1c] sm:$0xf] %vm580_vm0, %v663_v16  ;;  %v529_v19 = vadd.f32 %v753_v13, %v457_v17 }
 0x11e   :  { %v542_v20 = vmax.f32 %v529_v19, 0.0 }
 0x120   :  { %v664_v21 = vpack.c.bf16 %v542_v20, %v542_v20 }
 0x122   :  { %589 = vst.msk [vmem:[%s1040_s3 + $0x20] sm:$0xf] %vm580_vm0, %v664_v21 }

// kernel: q_network_forward.6
= control target key start
LH: loop header
LB: loop body
LE: loop exit
PB: predicated region body
PF: predicated region fallthrough
CT: control target
= control target key end

     0   :  { %vm573_vm0 = vcmask 519168   ;;  %s966_s1 = inlined_call_operand.vmem [shape: bf16[640,64], index: 1, kind: input, shape index: {}]   ;;  %s967_s0 = inlined_call_operand.vmem [shape: bf16[32,640], index: 0, kind: input, shape index: {}]   ;;  %s968_s2 = inlined_call_operand.vmem [shape: f32[1,64], index: 2, kind: input, shape index: {}]   ;;  %s969_s3 = inlined_call_operand.vmem [shape: bf16[32,64], index: 3, kind: output, shape index: {}]  }
   0x1   :  { %v727_v0 = vld [vmem:[%s966_s1 + $0x40] sm:$0xff]   ;;  %v731_v4 = vld [vmem:[%s966_s1 + $0x48] sm:$0xff]   ;;  %v735_v8 = vld [vmem:[%s966_s1 + $0x50] sm:$0xff]  }
   0x2   :  { %v728_v1 = vld [vmem:[%s966_s1] sm:$0xff]   ;;  %641 = vmatprep.subr.bf16.mxu0 %v727_v0  ;;  %v732_v5 = vld [vmem:[%s966_s1 + $0x8] sm:$0xff]   ;;  %v736_v9 = vld [vmem:[%s966_s1 + $0x10] sm:$0xff]  }
   0x3   :  { %v729_v2 = vld [vmem:[%s966_s1 + $0xc0] sm:$0xff]   ;;  %642 = vmatpush3.bf16.msra.mxu0 %v728_v1  ;;  %v733_v6 = vld [vmem:[%s966_s1 + $0xc8] sm:$0xff]   ;;  %v737_v10 = vld [vmem:[%s966_s1 + $0xd0] sm:$0xff]  }
   0x4   :  { %v730_v3 = vld [vmem:[%s966_s1 + $0x80] sm:$0xff]   ;;  %669 = vmatprep.subr.bf16.mxu1 %v729_v2  ;;  %643 = vmatprep.subr.bf16.mxu0 %v731_v4  ;;  %v734_v7 = vld [vmem:[%s966_s1 + $0x88] sm:$0xff]   ;;  %v738_v11 = vld [vmem:[%s966_s1 + $0x90] sm:$0xff]  }
   0x5   :  { %670 = vmatpush3.bf16.msra.mxu1 %v730_v3  ;;  %v739_v12 = vld [vmem:[%s966_s1 + $0x58] sm:$0xff]   ;;  %v743_v16 = vld [vmem:[%s966_s1 + $0x60] sm:$0xff]   ;;  %v747_v20 = vld [vmem:[%s966_s1 + $0x68] sm:$0xff]  }
   0x6   :  { %671 = vmatprep.subr.bf16.mxu1 %v733_v6  ;;  %v740_v13 = vld [vmem:[%s966_s1 + $0x18] sm:$0xff]   ;;  %v744_v17 = vld [vmem:[%s966_s1 + $0x20] sm:$0xff]   ;;  %v748_v21 = vld [vmem:[%s966_s1 + $0x28] sm:$0xff]  }
   0x7   :  { %644 = vmatpush3.bf16.msra.mxu0 %v732_v5  ;;  %v741_v14 = vld [vmem:[%s966_s1 + $0xd8] sm:$0xff]   ;;  %v745_v18 = vld [vmem:[%s966_s1 + $0xe0] sm:$0xff]   ;;  %v749_v22 = vld [vmem:[%s966_s1 + $0xe8] sm:$0xff]  }
   0x8   :  { %645 = vmatprep.subr.bf16.mxu0 %v735_v8  ;;  %v742_v15 = vld [vmem:[%s966_s1 + $0x98] sm:$0xff]   ;;  %v746_v19 = vld [vmem:[%s966_s1 + $0xa0] sm:$0xff]   ;;  %v750_v23 = vld [vmem:[%s966_s1 + $0xa8] sm:$0xff]  }
   0x9   :  { %672 = vmatpush3.bf16.msra.mxu1 %v734_v7  ;;  %v751_v24 = vld [vmem:[%s966_s1 + $0x70] sm:$0xff]   ;;  %v755_v28 = vld [vmem:[%s966_s1 + $0x78] sm:$0xff]   ;;  %v762_v34 = vld [vmem:[%s966_s1 + $0x100] sm:$0xff]  }
   0xa   :  { %673 = vmatprep.subr.bf16.mxu1 %v737_v10  ;;  %v752_v25 = vld [vmem:[%s966_s1 + $0x30] sm:$0xff]   ;;  %v756_v29 = vld [vmem:[%s966_s1 + $0x38] sm:$0xff]   ;;  %v765_v36 = vld [vmem:[%s967_s0 + $0xc] ss:$20 sps:$4 sm:$0xff]  }
   0xb   :  { %646 = vmatpush3.bf16.msra.mxu0 %v736_v9  ;;  %v753_v26 = vld [vmem:[%s966_s1 + $0xf0] sm:$0xff]   ;;  %v757_v30 = vld [vmem:[%s966_s1 + $0xf8] sm:$0xff]   ;;  %v766_v37 = vld [vmem:[%s966_s1 + $0x108] sm:$0xff]   ;;  %487 = vmatprep.mubr.bf16.mxu1 %v765_v36 }
   0xc   :  { %647 = vmatprep.subr.bf16.mxu0 %v739_v12  ;;  %v754_v27 = vld [vmem:[%s966_s1 + $0xb0] sm:$0xff]   ;;  %v760_v32 = vld [vmem:[%s967_s0 + $0x4] ss:$20 sps:$4 sm:$0xff]   ;;  %v763_v35 = vld [vmem:[%s967_s0 + $0x8] ss:$20 sps:$4 sm:$0xff]  }
   0xd   :  { %674 = vmatpush3.bf16.msra.mxu1 %v738_v11  ;;  %v758_v31 = vld [vmem:[%s967_s0] ss:$20 sps:$4 sm:$0xff]   ;;  %v761_v33 = vld [vmem:[%s966_s1 + $0xb8] sm:$0xff]   ;;  %438 = vmatprep.mubr.bf16.mxu0 %v760_v32  ;;  %v776_v43 = vld [vmem:[%s967_s0 + $0x30] ss:$20 sps:$4 sm:$0xff]  }
   0xe   :  { %675 = vmatprep.subr.bf16.mxu1 %v741_v14  ;;  %v767_v38 = vld [vmem:[%s966_s1 + $0x110] sm:$0xff]   ;;  %v770_v39 = vld [vmem:[%s967_s0 + $0x2c] ss:$20 sps:$4 sm:$0xff]   ;;  %v768_v40 = vld [vmem:[%s966_s1 + $0x118] sm:$0xff]  }
   0xf   :  { %648 = vmatpush3.bf16.msra.mxu0 %v740_v13  ;;  %v773_v41 = vld [vmem:[%s967_s0 + $0x28] ss:$20 sps:$4 sm:$0xff]   ;;  %v769_v44 = vld [vmem:[%s966_s1 + $0x120] sm:$0xff]   ;;  %v777_v47 = vld [vmem:[%s966_s1 + $0x130] sm:$0xff]  }
  0x10   :  { %649 = vmatprep.subr.bf16.mxu0 %v743_v16  ;;  %v774_v42 = vld [vmem:[%s967_s0 + $0x34] ss:$20 sps:$4 sm:$0xff]   ;;  %v779_v45 = vld [vmem:[%s967_s0 + $0x10] ss:$20 sps:$4 sm:$0xff]   ;;  %v778_v48 = vld [vmem:[%s966_s1 + $0x138] sm:$0xff]  }
  0x11   :  { %676 = vmatpush3.bf16.msra.mxu1 %v742_v15  ;;  %v772_v46 = vld [vmem:[%s966_s1 + $0x128] sm:$0xff]   ;;  %v582_v51 = vld [vmem:[%s968_s2] ss:$0 sm:$0xff] }
  0x12   :  { %677 = vmatprep.subr.bf16.mxu1 %v745_v18  ;;  %v780_v49 = vld [vmem:[%s967_s0 + $0x38] ss:$20 sps:$4 sm:$0xff]  }
  0x13   :  { %650 = vmatpush3.bf16.msra.mxu0 %v744_v17 }
  0x14   :  { %651 = vmatprep.subr.bf16.mxu0 %v747_v20 }
  0x15   :  { %678 = vmatpush3.bf16.msra.mxu1 %v746_v19 }
  0x16   :  { %679 = vmatprep.subr.bf16.mxu1 %v749_v22 }
  0x17   :  { %652 = vmatpush3.bf16.msra.mxu0 %v748_v21 }
  0x18   :  { %653 = vmatprep.subr.bf16.mxu0 %v751_v24 }
  0x19   :  { %680 = vmatpush3.bf16.msra.mxu1 %v750_v23 }
  0x1a   :  { %681 = vmatprep.subr.bf16.mxu1 %v753_v26 }
  0x1b   :  { %654 = vmatpush3.bf16.msra.mxu0 %v752_v25 }
  0x1c   :  { %655 = vmatprep.subr.bf16.mxu0 %v755_v28 }
  0x1d   :  { %682 = vmatpush3.bf16.msra.mxu1 %v754_v27 }
  0x1e   :  { %683 = vmatprep.subr.bf16.mxu1 %v757_v30 }
  0x1f   :  { %656 = vmatpush3.bf16.msra.mxu0 %v756_v29 }
  0x20   :  { %707 = vmatprep.subr.bf16.mxu0 %v762_v34 }
  0x21   :  { %684 = vmatpush3.bf16.msra.mxu1 %v761_v33 }
  0x22   :  { %439 = vmatmul.mubr.bf16.vlgmr.msra.gmra.mrb[0].mxu0 %v758_v31 }
  0x23   :  { %708 = vmatpush3.bf16.msra.mxu0 %v762_v34  ;;  %446 = vmatprep.mubr.bf16.mxu0 %v770_v39 }
  0x24   :  { %488 = vmatmul.mubr.bf16.vlgmr.msra.gmra.mrb[0].mxu1 %v763_v35  ;;  %709 = vmatprep.subr.bf16.mxu0 %v766_v37 }
  0x25   :  { %495 = vmatprep.mubr.bf16.mxu1 %v774_v42 }
  0x27   :  { %710 = vmatpush3.bf16.msra.mxu0 %v766_v37 }
  0x28   :  { %711 = vmatprep.subr.bf16.mxu0 %v767_v38 }
  0x2a   :  { %447 = vmatmul.mubr.bf16.gmra.mrb[4].mxu0 %v773_v41 }
  0x2b   :  { %712 = vmatpush3.bf16.msra.mxu0 %v767_v38  ;;  %723 = vmatprep.mubr.bf16.mxu0 %v779_v45 }
  0x2c   :  { %713 = vmatprep.subr.bf16.mxu0 %v768_v40  ;;  %496 = vmatmul.mubr.bf16.gmra.mrb[4].mxu1 %v776_v43 }
  0x2f   :  { %714 = vmatpush3.bf16.msra.mxu0 %v768_v40 }
  0x30   :  { %715 = vmatprep.subr.bf16.mxu0 %v769_v44 }
  0x33   :  { %716 = vmatpush3.bf16.msra.mxu0 %v769_v44 }
  0x34   :  { %717 = vmatprep.subr.bf16.mxu0 %v772_v46 }
  0x37   :  { %718 = vmatpush3.bf16.msra.mxu0 %v772_v46 }
  0x38   :  { %719 = vmatprep.subr.bf16.mxu0 %v777_v47 }
  0x3b   :  { %720 = vmatpush3.bf16.msra.mxu0 %v777_v47 }
  0x3c   :  { %721 = vmatprep.subr.bf16.mxu0 %v778_v48 }
  0x3f   :  { %722 = vmatpush3.bf16.msra.mxu0 %v778_v48 }
  0x42   :  { %724 = vmatmul.mubr.bf16.vlgmr.msra.gmra.mrb[8].mxu0 %v780_v49 }
  0xf5   :  { %v657_v50 = vpop.f32.mrb[0].mxu0 }
  0xf6   :  { %v658_v52 = vpop.f32.mrb[1].mxu0 }
  0xf7   :  { %v659_v53 = vadd.f32 %v658_v52, %v657_v50  ;;  %v660_v54 = vpop.f32.mrb[2].mxu0  ;;  %v685_v55 = vpop.f32.mrb[0].mxu1 }
  0xf8   :  { %v661_v56 = vpop.f32.mrb[3].mxu0  ;;  %v686_v59 = vpop.f32.mrb[1].mxu1 }
  0xf9   :  { %v441_v57 = vadd.f32 %v659_v53, %v582_v51  ;;  %v662_v58 = vadd.f32 %v661_v56, %v660_v54  ;;  %v687_v60 = vadd.f32 %v686_v59, %v685_v55  ;;  %v688_v61 = vpop.f32.mrb[2].mxu1 }
  0xfa   :  { %v689_v63 = vpop.f32.mrb[3].mxu1 }
  0xfb   :  { %v444_v62 = vadd.f32 %v662_v58, %v582_v51  ;;  %v690_v0 = vadd.f32 %v689_v63, %v688_v61  ;;  %v490_v1 = vadd.f32 %v687_v60, %v441_v57 }
  0xfd   :  { %v663_v2 = vpop.f32.mrb[4].mxu0  ;;  %v493_v4 = vadd.f32 %v690_v0, %v444_v62 }
  0xfe   :  { %v664_v3 = vpop.f32.mrb[5].mxu0 }
  0xff   :  { %v665_v5 = vadd.f32 %v664_v3, %v663_v2  ;;  %v666_v6 = vpop.f32.mrb[6].mxu0  ;;  %v691_v7 = vpop.f32.mrb[4].mxu1 }
 0x100   :  { %v667_v8 = vpop.f32.mrb[7].mxu0  ;;  %v692_v11 = vpop.f32.mrb[5].mxu1 }
 0x101   :  { %v449_v9 = vadd.f32 %v665_v5, %v582_v51  ;;  %v668_v10 = vadd.f32 %v667_v8, %v666_v6  ;;  %v693_v12 = vadd.f32 %v692_v11, %v691_v7  ;;  %v694_v13 = vpop.f32.mrb[6].mxu1 }
 0x102   :  { %v695_v15 = vpop.f32.mrb[7].mxu1 }
 0x103   :  { %v452_v14 = vadd.f32 %v668_v10, %v582_v51  ;;  %v696_v16 = vadd.f32 %v695_v15, %v694_v13  ;;  %v498_v17 = vadd.f32 %v693_v12, %v449_v9 }
 0x105   :  { %v501_v18 = vadd.f32 %v696_v16, %v452_v14 }
 0x115   :  { %v725_v19 = vpop.f32.mrb[8].mxu0 }
 0x116   :  { %v547_v20 = vadd.f32 %v725_v19, %v498_v17  ;;  %v538_v21 = vpop.f32.mrb[9].mxu0 }
 0x117   :  { %v539_v22 = vadd.f32 %v538_v21, %v490_v1  ;;  %v726_v23 = vpop.f32.mrb[10].mxu0 }
 0x118   :  { %v555_v24 = vmax.f32 %v547_v20, 0.0  ;;  %v550_v25 = vadd.f32 %v726_v23, %v501_v18  ;;  %v541_v26 = vpop.f32.mrb[11].mxu0 }
 0x119   :  { %v553_v27 = vmax.f32 %v539_v22, 0.0  ;;  %v542_v28 = vadd.f32 %v541_v26, %v493_v4 }
 0x11a   :  { %v639_v29 = vpack.c.bf16 %v555_v24, %v555_v24  ;;  %v556_v30 = vmax.f32 %v550_v25, 0.0 }
 0x11b   :  { %v637_v31 = vpack.c.bf16 %v553_v27, %v553_v27  ;;  %v554_v32 = vmax.f32 %v542_v28, 0.0 }
 0x11c   :  { %576 = vst.msk [vmem:[%s969_s3 + $0x8] sm:$0xf] %vm573_vm0, %v639_v29  ;;  %v640_v33 = vpack.c.bf16 %v556_v30, %v556_v30 }
 0x11d   :  { %574 = vst.msk [vmem:[%s969_s3] sm:$0xf] %vm573_vm0, %v637_v31  ;;  %v638_v34 = vpack.c.bf16 %v554_v32, %v554_v32 }
 0x11e   :  { %577 = vst.msk [vmem:[%s969_s3 + $0xc] sm:$0xf] %vm573_vm0, %v640_v33 }
 0x11f   :  { %575 = vst.msk [vmem:[%s969_s3 + $0x4] sm:$0xf] %vm573_vm0, %v638_v34 }

// kernel: q_network_forward.7
= control target key start
LH: loop header
LB: loop body
LE: loop exit
PB: predicated region body
PF: predicated region fallthrough
CT: control target
= control target key end

     0   :  { %v8408_v1 = vmov 0   ;;  %s11165_s2 = inlined_call_operand.vmem [shape: bf16[384,512], index: 2, kind: input, shape index: {}]   ;;  %s11166_s4 = inlined_call_operand.vmem [shape: bf16[1024,512], index: 4, kind: input, shape index: {}]   ;;  %s11167_s0 = inlined_call_operand.vmem [shape: bf16[8,384], index: 0, kind: input, shape index: {}]   ;;  %s11168_s1 = inlined_call_operand.vmem [shape: bf16[8,1024], index: 1, kind: input, shape index: {}]   ;;  %s11169_s3 = inlined_call_operand.vmem [shape: f32[1,512], index: 3, kind: input, shape index: {}]   ;;  %s11170_s7 = inlined_call_operand.vmem [shape: bf16[512,512], index: 7, kind: input, shape index: {}]   ;;  %s11171_s6 = inlined_call_operand.vmem [shape: bf16[512,512], index: 6, kind: input, shape index: {}]   ;;  %s11172_s5 = inlined_call_operand.vmem [shape: f32[1,512], index: 5, kind: input, shape index: {}]   ;;  %s11173_s9 = inlined_call_operand.vmem [shape: bf16[512,512], index: 9, kind: input, shape index: {}]   ;;  %s11174_s11 = inlined_call_operand.vmem [shape: bf16[512,256], index: 11, kind: input, shape index: {}]   ;;  %s11175_s8 = inlined_call_operand.vmem [shape: f32[1,512], index: 8, kind: input, shape index: {}]   ;;  %s11176_s13 = inlined_call_operand.vmem [shape: bf16[256,128], index: 13, kind: input, shape index: {}]   ;;  %s11177_s10 = inlined_call_operand.vmem [shape: f32[1,512], index: 10, kind: input, shape index: {}]   ;;  %s11178_s12 = inlined_call_operand.vmem [shape: f32[1,256], index: 12, kind: input, shape index: {}]   ;;  %s11179_s14 = inlined_call_operand.vmem [shape: f32[1,128], index: 14, kind: input, shape index: {}]   ;;  %s11180_s15 = inlined_call_operand.vmem [shape: f32[8,128], index: 15, kind: output, shape index: {}]  }
   0x1   :  { %v7181_v0 = vld [vmem:[%s11165_s2 + $0x4] ss:$16 sps:$4 sm:$0xff]   ;;  %735 = vmatprep.mubr.bf16.mxu0 %v8408_v1  ;;  %v7185_v3 = vld [vmem:[%s11165_s2] ss:$16 sps:$4 sm:$0xff]   ;;  %v8598_v36 = vld [vmem:[%s11167_s0 + $0x8] ss:$0 sps:$4 sm:$0xff]  }
   0x2   :  { %v7183_v2 = vld [vmem:[%s11165_s2 + $0x204] ss:$16 sps:$4 sm:$0xff]   ;;  %662 = vmatprep.subr.bf16.mxu1 %v7181_v0  ;;  %v7186_v4 = vld [vmem:[%s11165_s2 + $0x200] ss:$16 sps:$4 sm:$0xff]  }
   0x3   :  { %703 = vmatprep.subr.bf16.mxu0 %v7183_v2  ;;  %v7187_v5 = vld [vmem:[%s11165_s2 + $0x24] ss:$16 sps:$4 sm:$0xff]   ;;  %663 = vmatpush1.bf16.msra.mxu1 %v7185_v3  ;;  %v7191_v7 = vld [vmem:[%s11165_s2 + $0x20] ss:$16 sps:$4 sm:$0xff]  }
   0x4   :  { %704 = vmatpush1.bf16.msra.mxu0 %v7186_v4  ;;  %v7189_v6 = vld [vmem:[%s11165_s2 + $0x224] ss:$16 sps:$4 sm:$0xff]   ;;  %664 = vmatprep.subr.bf16.mxu1 %v7187_v5  ;;  %v7192_v8 = vld [vmem:[%s11165_s2 + $0x220] ss:$16 sps:$4 sm:$0xff]   ;;  %v7282_v5 = vld [vmem:[%s11165_s2 + $0xc] ss:$16 sps:$4 sm:$0xff]  }
   0x5   :  { %705 = vmatprep.subr.bf16.mxu0 %v7189_v6  ;;  %v7193_v9 = vld [vmem:[%s11165_s2 + $0x44] ss:$16 sps:$4 sm:$0xff]   ;;  %v7197_v11 = vld [vmem:[%s11165_s2 + $0x40] ss:$16 sps:$4 sm:$0xff]  }
   0x6   :  { %v7195_v10 = vld [vmem:[%s11165_s2 + $0x244] ss:$16 sps:$4 sm:$0xff]   ;;  %v7198_v12 = vld [vmem:[%s11165_s2 + $0x240] ss:$16 sps:$4 sm:$0xff]  }
   0x7   :  { %665 = vmatpush1.bf16.msra.mxu1 %v7191_v7  ;;  %v7199_v13 = vld [vmem:[%s11165_s2 + $0x64] ss:$16 sps:$4 sm:$0xff]   ;;  %v7203_v15 = vld [vmem:[%s11165_s2 + $0x60] ss:$16 sps:$4 sm:$0xff]  }
   0x8   :  { %706 = vmatpush1.bf16.msra.mxu0 %v7192_v8  ;;  %666 = vmatprep.subr.bf16.mxu1 %v7193_v9  ;;  %v7201_v14 = vld [vmem:[%s11165_s2 + $0x264] ss:$16 sps:$4 sm:$0xff]   ;;  %v7204_v16 = vld [vmem:[%s11165_s2 + $0x260] ss:$16 sps:$4 sm:$0xff]   ;;  %v7280_v8 = vld [vmem:[%s11165_s2 + $0x8] ss:$16 sps:$4 sm:$0xff]  }
   0x9   :  { %707 = vmatprep.subr.bf16.mxu0 %v7195_v10  ;;  %v7205_v17 = vld [vmem:[%s11165_s2 + $0x84] ss:$16 sps:$4 sm:$0xff]   ;;  %v7209_v19 = vld [vmem:[%s11165_s2 + $0x80] ss:$16 sps:$4 sm:$0xff]   ;;  %v7288_v10 = vld [vmem:[%s11165_s2 + $0x2c] ss:$16 sps:$4 sm:$0xff]  }
   0xa   :  { %v7207_v18 = vld [vmem:[%s11165_s2 + $0x284] ss:$16 sps:$4 sm:$0xff]   ;;  %v7210_v20 = vld [vmem:[%s11165_s2 + $0x280] ss:$16 sps:$4 sm:$0xff]  }
   0xb   :  { %667 = vmatpush1.bf16.msra.mxu1 %v7197_v11  ;;  %v7211_v21 = vld [vmem:[%s11165_s2 + $0xa4] ss:$16 sps:$4 sm:$0xff]   ;;  %v7215_v23 = vld [vmem:[%s11165_s2 + $0xa0] ss:$16 sps:$4 sm:$0xff]  }
   0xc   :  { %708 = vmatpush1.bf16.msra.mxu0 %v7198_v12  ;;  %668 = vmatprep.subr.bf16.mxu1 %v7199_v13  ;;  %v7213_v22 = vld [vmem:[%s11165_s2 + $0x2a4] ss:$16 sps:$4 sm:$0xff]   ;;  %v7216_v24 = vld [vmem:[%s11165_s2 + $0x2a0] ss:$16 sps:$4 sm:$0xff]   ;;  %v7286_v13 = vld [vmem:[%s11165_s2 + $0x28] ss:$16 sps:$4 sm:$0xff]  }
   0xd   :  { %709 = vmatprep.subr.bf16.mxu0 %v7201_v14  ;;  %v7217_v25 = vld [vmem:[%s11165_s2 + $0xc4] ss:$16 sps:$4 sm:$0xff]   ;;  %v7221_v27 = vld [vmem:[%s11165_s2 + $0xc0] ss:$16 sps:$4 sm:$0xff]  }
   0xe   :  { %v7219_v26 = vld [vmem:[%s11165_s2 + $0x2c4] ss:$16 sps:$4 sm:$0xff]   ;;  %v7222_v28 = vld [vmem:[%s11165_s2 + $0x2c0] ss:$16 sps:$4 sm:$0xff]  }
   0xf   :  { %669 = vmatpush1.bf16.msra.mxu1 %v7203_v15  ;;  %v7223_v29 = vld [vmem:[%s11165_s2 + $0xe4] ss:$16 sps:$4 sm:$0xff]   ;;  %v7227_v31 = vld [vmem:[%s11165_s2 + $0xe0] ss:$16 sps:$4 sm:$0xff]  }
  0x10   :  { %710 = vmatpush1.bf16.msra.mxu0 %v7204_v16  ;;  %670 = vmatprep.subr.bf16.mxu1 %v7205_v17  ;;  %v7225_v30 = vld [vmem:[%s11165_s2 + $0x2e4] ss:$16 sps:$4 sm:$0xff]   ;;  %v7228_v32 = vld [vmem:[%s11165_s2 + $0x2e0] ss:$16 sps:$4 sm:$0xff]   ;;  %v7294_v16 = vld [vmem:[%s11165_s2 + $0x4c] ss:$16 sps:$4 sm:$0xff]  }
  0x11   :  { %711 = vmatprep.subr.bf16.mxu0 %v7207_v18  ;;  %v7229_v33 = vld [vmem:[%s11165_s2 + $0x104] ss:$16 sps:$4 sm:$0xff]   ;;  %v7231_v35 = vld [vmem:[%s11166_s4] ss:$16 sps:$4 sm:$0xff]   ;;  %v7292_v18 = vld [vmem:[%s11165_s2 + $0x48] ss:$16 sps:$4 sm:$0xff]  }
  0x12   :  { %v7233_v34 = vld [vmem:[%s11166_s4 + $0x4] ss:$16 sps:$4 sm:$0xff]   ;;  %v7234_v37 = vld [vmem:[%s11165_s2 + $0x100] ss:$16 sps:$4 sm:$0xff]  }
  0x13   :  { %671 = vmatpush1.bf16.msra.mxu1 %v7209_v19  ;;  %v7236_v38 = vld [vmem:[%s11165_s2 + $0x124] ss:$16 sps:$4 sm:$0xff]   ;;  %v7238_v40 = vld [vmem:[%s11166_s4 + $0x20] ss:$16 sps:$4 sm:$0xff]  }
  0x14   :  { %712 = vmatpush1.bf16.msra.mxu0 %v7210_v20  ;;  %672 = vmatprep.subr.bf16.mxu1 %v7211_v21  ;;  %v7240_v39 = vld [vmem:[%s11166_s4 + $0x24] ss:$16 sps:$4 sm:$0xff]   ;;  %v7241_v41 = vld [vmem:[%s11165_s2 + $0x120] ss:$16 sps:$4 sm:$0xff]   ;;  %v7300_v20 = vld [vmem:[%s11165_s2 + $0x6c] ss:$16 sps:$4 sm:$0xff]  }
  0x15   :  { %713 = vmatprep.subr.bf16.mxu0 %v7213_v22  ;;  %v7242_v42 = vld [vmem:[%s11165_s2 + $0x144] ss:$16 sps:$4 sm:$0xff]   ;;  %v7244_v44 = vld [vmem:[%s11166_s4 + $0x40] ss:$16 sps:$4 sm:$0xff]   ;;  %v7298_v22 = vld [vmem:[%s11165_s2 + $0x68] ss:$16 sps:$4 sm:$0xff]  }
  0x16   :  { %v7246_v43 = vld [vmem:[%s11166_s4 + $0x44] ss:$16 sps:$4 sm:$0xff]   ;;  %v7247_v45 = vld [vmem:[%s11165_s2 + $0x140] ss:$16 sps:$4 sm:$0xff]  }
  0x17   :  { %673 = vmatpush1.bf16.msra.mxu1 %v7215_v23  ;;  %v7248_v46 = vld [vmem:[%s11165_s2 + $0x164] ss:$16 sps:$4 sm:$0xff]   ;;  %v7250_v48 = vld [vmem:[%s11166_s4 + $0x60] ss:$16 sps:$4 sm:$0xff]  }
  0x18   :  { %714 = vmatpush1.bf16.msra.mxu0 %v7216_v24  ;;  %674 = vmatprep.subr.bf16.mxu1 %v7217_v25  ;;  %v7252_v47 = vld [vmem:[%s11166_s4 + $0x64] ss:$16 sps:$4 sm:$0xff]   ;;  %v7253_v50 = vld [vmem:[%s11165_s2 + $0x160] ss:$16 sps:$4 sm:$0xff]   ;;  %v7306_v24 = vld [vmem:[%s11165_s2 + $0x8c] ss:$16 sps:$4 sm:$0xff]  }
  0x19   :  { %715 = vmatprep.subr.bf16.mxu0 %v7219_v26  ;;  %v51_v49 = vld [vmem:[%s11167_s0] sm:$0xff]  ;;  %v7304_v26 = vld [vmem:[%s11165_s2 + $0x88] ss:$16 sps:$4 sm:$0xff]  }
  0x1a   :  { %v7254_v51 = vld [vmem:[%s11165_s2 + $0x184] ss:$16 sps:$4 sm:$0xff]   ;;  %v6275_v52 = vcombine.high %v51_v49, %v51_v49  ;;  %v7256_v54 = vld [vmem:[%s11166_s4 + $0x80] ss:$16 sps:$4 sm:$0xff]   ;;  %v8697_v7 = vcombine.low %v51_v49, %v51_v49 }
  0x1b   :  { %675 = vmatpush1.bf16.msra.mxu1 %v7221_v27  ;;  %v7258_v53 = vld [vmem:[%s11166_s4 + $0x84] ss:$16 sps:$4 sm:$0xff]   ;;  %v7259_v55 = vld [vmem:[%s11165_s2 + $0x180] ss:$16 sps:$4 sm:$0xff]  }
  0x1c   :  { %716 = vmatpush1.bf16.msra.mxu0 %v7222_v28  ;;  %676 = vmatprep.subr.bf16.mxu1 %v7223_v29  ;;  %v7260_v56 = vld [vmem:[%s11165_s2 + $0x1a4] ss:$16 sps:$4 sm:$0xff]   ;;  %v7262_v58 = vld [vmem:[%s11166_s4 + $0xa0] ss:$16 sps:$4 sm:$0xff]   ;;  %v7312_v28 = vld [vmem:[%s11165_s2 + $0xac] ss:$16 sps:$4 sm:$0xff]  }
  0x1d   :  { %717 = vmatprep.subr.bf16.mxu0 %v7225_v30  ;;  %694 = vmatprep.mubr.bf16.mxu1 %v6275_v52  ;;  %v7264_v57 = vld [vmem:[%s11166_s4 + $0xa4] ss:$16 sps:$4 sm:$0xff]   ;;  %v7265_v59 = vld [vmem:[%s11165_s2 + $0x1a0] ss:$16 sps:$4 sm:$0xff]   ;;  %v7310_v30 = vld [vmem:[%s11165_s2 + $0xa8] ss:$16 sps:$4 sm:$0xff]  }
  0x1e   :  { %v7266_v60 = vld [vmem:[%s11165_s2 + $0x1c4] ss:$16 sps:$4 sm:$0xff]   ;;  %v7268_v62 = vld [vmem:[%s11166_s4 + $0xc0] ss:$16 sps:$4 sm:$0xff]  }
  0x1f   :  { %677 = vmatpush1.bf16.msra.mxu1 %v7227_v31  ;;  %v7270_v61 = vld [vmem:[%s11166_s4 + $0xc4] ss:$16 sps:$4 sm:$0xff]   ;;  %v7271_v63 = vld [vmem:[%s11165_s2 + $0x1c0] ss:$16 sps:$4 sm:$0xff]  }
  0x20   :  { %718 = vmatpush1.bf16.msra.mxu0 %v7228_v32  ;;  %678 = vmatprep.subr.bf16.mxu1 %v7229_v33  ;;  %v7272_v0 = vld [vmem:[%s11165_s2 + $0x1e4] ss:$16 sps:$4 sm:$0xff]   ;;  %v7274_v3 = vld [vmem:[%s11166_s4 + $0xe0] ss:$16 sps:$4 sm:$0xff]   ;;  %v7318_v32 = vld [vmem:[%s11165_s2 + $0xcc] ss:$16 sps:$4 sm:$0xff]  }
  0x21   :  { %2416 = vmatprep.subr.bf16.mxu0 %v7233_v34  ;;  %v7276_v2 = vld [vmem:[%s11166_s4 + $0xe4] ss:$16 sps:$4 sm:$0xff]   ;;  %v7277_v4 = vld [vmem:[%s11165_s2 + $0x1e0] ss:$16 sps:$4 sm:$0xff]   ;;  %v7316_v34 = vld [vmem:[%s11165_s2 + $0xc8] ss:$16 sps:$4 sm:$0xff]  }
  0x22   :  { %v7285_v6 = vld [vmem:[%s11166_s4 + $0x104] ss:$16 sps:$4 sm:$0xff]   ;;  %v7283_v9 = vld [vmem:[%s11166_s4 + $0x100] ss:$16 sps:$4 sm:$0xff]  }
  0x23   :  { %736 = vmatmul.mubr.bf16.vlgmr.msra.gmra.mrb[0].mxu0 %v8598_v36  ;;  %679 = vmatpush1.bf16.msra.mxu1 %v7234_v37  ;;  %v7291_v11 = vld [vmem:[%s11166_s4 + $0x124] ss:$16 sps:$4 sm:$0xff]   ;;  %v7289_v14 = vld [vmem:[%s11166_s4 + $0x120] ss:$16 sps:$4 sm:$0xff]   ;;  %v7324_v37 = vld [vmem:[%s11165_s2 + $0xec] ss:$16 sps:$4 sm:$0xff]  }
  0x24   :  { %2417 = vmatpush1.bf16.msra.mxu0 %v7231_v35  ;;  %680 = vmatprep.subr.bf16.mxu1 %v7236_v38  ;;  %v826_v12 = vld [vmem:[%s11168_s1] sm:$0xff] }
  0x25   :  { %2418 = vmatprep.subr.bf16.mxu0 %v7240_v39  ;;  %v8721_v15 = vcombine.high %v826_v12, %v826_v12  ;;  %v7297_v17 = vld [vmem:[%s11166_s4 + $0x144] ss:$16 sps:$4 sm:$0xff]   ;;  %v7295_v19 = vld [vmem:[%s11166_s4 + $0x140] ss:$16 sps:$4 sm:$0xff]   ;;  %v7322_v39 = vld [vmem:[%s11165_s2 + $0xe8] ss:$16 sps:$4 sm:$0xff]  }
  0x26   :  { %v7303_v21 = vld [vmem:[%s11166_s4 + $0x164] ss:$16 sps:$4 sm:$0xff]   ;;  %v7301_v23 = vld [vmem:[%s11166_s4 + $0x160] ss:$16 sps:$4 sm:$0xff]  }
  0x27   :  { %681 = vmatpush1.bf16.msra.mxu1 %v7241_v41  ;;  %2448 = vmatprep.mubr.bf16.mxu0 %v8721_v15  ;;  %v7309_v25 = vld [vmem:[%s11166_s4 + $0x184] ss:$16 sps:$4 sm:$0xff]   ;;  %v7307_v27 = vld [vmem:[%s11166_s4 + $0x180] ss:$16 sps:$4 sm:$0xff]   ;;  %v7330_v41 = vld [vmem:[%s11165_s2 + $0x10c] ss:$16 sps:$4 sm:$0xff]  }
  0x28   :  { %2419 = vmatpush1.bf16.msra.mxu0 %v7238_v40  ;;  %682 = vmatprep.subr.bf16.mxu1 %v7242_v42  ;;  %v7315_v29 = vld [vmem:[%s11166_s4 + $0x1a4] ss:$16 sps:$4 sm:$0xff]   ;;  %v7313_v31 = vld [vmem:[%s11166_s4 + $0x1a0] ss:$16 sps:$4 sm:$0xff]  }
  0x29   :  { %2420 = vmatprep.subr.bf16.mxu0 %v7246_v43  ;;  %v7321_v33 = vld [vmem:[%s11166_s4 + $0x1c4] ss:$16 sps:$4 sm:$0xff]   ;;  %v7319_v35 = vld [vmem:[%s11166_s4 + $0x1c0] ss:$16 sps:$4 sm:$0xff]   ;;  %v7328_v43 = vld [vmem:[%s11165_s2 + $0x108] ss:$16 sps:$4 sm:$0xff]  }
  0x2a   :  { %v7327_v38 = vld [vmem:[%s11166_s4 + $0x1e4] ss:$16 sps:$4 sm:$0xff]   ;;  %v7325_v40 = vld [vmem:[%s11166_s4 + $0x1e0] ss:$16 sps:$4 sm:$0xff]  }
  0x2b   :  { %683 = vmatpush1.bf16.msra.mxu1 %v7247_v45  ;;  %v7335_v42 = vld [vmem:[%s11166_s4 + $0x204] ss:$16 sps:$4 sm:$0xff]   ;;  %v7333_v45 = vld [vmem:[%s11166_s4 + $0x200] ss:$16 sps:$4 sm:$0xff]  }
  0x2c   :  { %2421 = vmatpush1.bf16.msra.mxu0 %v7244_v44  ;;  %684 = vmatprep.subr.bf16.mxu1 %v7248_v46  ;;  %v8805_v44 = vcombine.low %v826_v12, %v826_v12  ;;  %v7338_v46 = vld [vmem:[%s11165_s2 + $0x12c] ss:$16 sps:$4 sm:$0xff]   ;;  %v7339_v49 = vld [vmem:[%s11166_s4 + $0x220] ss:$16 sps:$4 sm:$0xff]   ;;  %v7372_v12 = vld [vmem:[%s11165_s2 + $0x1e8] ss:$16 sps:$4 sm:$0xff]  }
  0x2d   :  { %2422 = vmatprep.subr.bf16.mxu0 %v7252_v47  ;;  %v7341_v47 = vld [vmem:[%s11166_s4 + $0x224] ss:$16 sps:$4 sm:$0xff]  }
  0x2f   :  { %685 = vmatpush1.bf16.msra.mxu1 %v7253_v50  ;;  %v7344_v50 = vld [vmem:[%s11165_s2 + $0x14c] ss:$16 sps:$4 sm:$0xff]  }
  0x30   :  { %2423 = vmatpush1.bf16.msra.mxu0 %v7250_v48  ;;  %686 = vmatprep.subr.bf16.mxu1 %v7254_v51  ;;  %v7336_v48 = vld [vmem:[%s11165_s2 + $0x128] ss:$16 sps:$4 sm:$0xff]   ;;  %v7347_v51 = vld [vmem:[%s11166_s4 + $0x244] ss:$16 sps:$4 sm:$0xff]  }
  0x31   :  { %2424 = vmatprep.subr.bf16.mxu0 %v7258_v53  ;;  %v7345_v53 = vld [vmem:[%s11166_s4 + $0x240] ss:$16 sps:$4 sm:$0xff]  }
  0x33   :  { %687 = vmatpush1.bf16.msra.mxu1 %v7259_v55  ;;  %v7353_v55 = vld [vmem:[%s11166_s4 + $0x264] ss:$16 sps:$4 sm:$0xff]  }
  0x34   :  { %2425 = vmatpush1.bf16.msra.mxu0 %v7256_v54  ;;  %688 = vmatprep.subr.bf16.mxu1 %v7260_v56  ;;  %v7350_v54 = vld [vmem:[%s11165_s2 + $0x16c] ss:$16 sps:$4 sm:$0xff]   ;;  %v7348_v56 = vld [vmem:[%s11165_s2 + $0x168] ss:$16 sps:$4 sm:$0xff]  }
  0x35   :  { %2426 = vmatprep.subr.bf16.mxu0 %v7264_v57  ;;  %v7351_v57 = vld [vmem:[%s11166_s4 + $0x260] ss:$16 sps:$4 sm:$0xff]  }
  0x37   :  { %689 = vmatpush1.bf16.msra.mxu1 %v7265_v59  ;;  %v7356_v59 = vld [vmem:[%s11165_s2 + $0x18c] ss:$16 sps:$4 sm:$0xff]  }
  0x38   :  { %2427 = vmatpush1.bf16.msra.mxu0 %v7262_v58  ;;  %690 = vmatprep.subr.bf16.mxu1 %v7266_v60  ;;  %v8850_v58 = vld [vmem:[%s11168_s1 + $0x8] sm:$0xff]  ;;  %v7359_v60 = vld [vmem:[%s11166_s4 + $0x284] ss:$16 sps:$4 sm:$0xff]  }
  0x39   :  { %2428 = vmatprep.subr.bf16.mxu0 %v7270_v61  ;;  %v8860_v61 = vcombine.high %v8850_v58, %v8850_v58 }
  0x3b   :  { %691 = vmatpush1.bf16.msra.mxu1 %v7271_v63  ;;  %v7357_v63 = vld [vmem:[%s11166_s4 + $0x280] ss:$16 sps:$4 sm:$0xff]  }
  0x3c   :  { %2429 = vmatpush1.bf16.msra.mxu0 %v7268_v62  ;;  %692 = vmatprep.subr.bf16.mxu1 %v7272_v0  ;;  %v7354_v62 = vld [vmem:[%s11165_s2 + $0x188] ss:$16 sps:$4 sm:$0xff]   ;;  %v7362_v0 = vld [vmem:[%s11165_s2 + $0x1ac] ss:$16 sps:$4 sm:$0xff]  }
  0x3d   :  { %2430 = vmatprep.subr.bf16.mxu0 %v7276_v2  ;;  %v7365_v2 = vld [vmem:[%s11166_s4 + $0x2a4] ss:$16 sps:$4 sm:$0xff]  }
  0x3f   :  { %693 = vmatpush1.bf16.msra.mxu1 %v7277_v4  ;;  %v7363_v4 = vld [vmem:[%s11166_s4 + $0x2a0] ss:$16 sps:$4 sm:$0xff]  }
  0x40   :  { %2431 = vmatpush1.bf16.msra.mxu0 %v7274_v3  ;;  %744 = vmatprep.subr.bf16.mxu1 %v7282_v5  ;;  %v7360_v3 = vld [vmem:[%s11165_s2 + $0x1a8] ss:$16 sps:$4 sm:$0xff]   ;;  %v7368_v5 = vld [vmem:[%s11165_s2 + $0x1cc] ss:$16 sps:$4 sm:$0xff]  }
  0x41   :  { %2432 = vmatprep.subr.bf16.mxu0 %v7285_v6  ;;  %v7371_v6 = vld [vmem:[%s11166_s4 + $0x2c4] ss:$16 sps:$4 sm:$0xff]  }
  0x42   :  { %695 = vmatmul.mubr.bf16.vlgmr.msra.gmra.mrb[0].mxu1 %v8697_v7 }
  0x43   :  { %745 = vmatpush1.bf16.msra.mxu1 %v7280_v8  ;;  %776 = vmatprep.mubr.bf16.mxu1 %v6275_v52  ;;  %v7342_v52 = vld [vmem:[%s11165_s2 + $0x148] ss:$16 sps:$4 sm:$0xff]  }
  0x44   :  { %2433 = vmatpush1.bf16.msra.mxu0 %v7283_v9  ;;  %746 = vmatprep.subr.bf16.mxu1 %v7288_v10  ;;  %v7366_v8 = vld [vmem:[%s11165_s2 + $0x1c8] ss:$16 sps:$4 sm:$0xff]   ;;  %v7369_v9 = vld [vmem:[%s11166_s4 + $0x2c0] ss:$16 sps:$4 sm:$0xff]   ;;  %v7374_v10 = vld [vmem:[%s11165_s2 + $0x1ec] ss:$16 sps:$4 sm:$0xff]  }
  0x45   :  { %2434 = vmatprep.subr.bf16.mxu0 %v7291_v11  ;;  %v7377_v11 = vld [vmem:[%s11166_s4 + $0x2e4] ss:$16 sps:$4 sm:$0xff]  }
  0x47   :  { %747 = vmatpush1.bf16.msra.mxu1 %v7286_v13  ;;  %v7375_v13 = vld [vmem:[%s11166_s4 + $0x2e0] ss:$16 sps:$4 sm:$0xff]  }
  0x48   :  { %2435 = vmatpush1.bf16.msra.mxu0 %v7289_v14  ;;  %748 = vmatprep.subr.bf16.mxu1 %v7294_v16  ;;  %v7380_v14 = vld [vmem:[%s11165_s2 + $0x20c] ss:$16 sps:$4 sm:$0xff]   ;;  %v7383_v16 = vld [vmem:[%s11166_s4 + $0x304] ss:$16 sps:$4 sm:$0xff]  }
  0x49   :  { %2436 = vmatprep.subr.bf16.mxu0 %v7297_v17  ;;  %v7378_v17 = vld [vmem:[%s11165_s2 + $0x208] ss:$16 sps:$4 sm:$0xff]  }
  0x4b   :  { %749 = vmatpush1.bf16.msra.mxu1 %v7292_v18  ;;  %v7381_v18 = vld [vmem:[%s11166_s4 + $0x300] ss:$16 sps:$4 sm:$0xff]  }
  0x4c   :  { %2437 = vmatpush1.bf16.msra.mxu0 %v7295_v19  ;;  %750 = vmatprep.subr.bf16.mxu1 %v7300_v20  ;;  %v7386_v19 = vld [vmem:[%s11165_s2 + $0x22c] ss:$16 sps:$4 sm:$0xff]   ;;  %v7389_v20 = vld [vmem:[%s11166_s4 + $0x324] ss:$16 sps:$4 sm:$0xff]  }
  0x4d   :  { %2438 = vmatprep.subr.bf16.mxu0 %v7303_v21  ;;  %v7384_v21 = vld [vmem:[%s11165_s2 + $0x228] ss:$16 sps:$4 sm:$0xff]  }
  0x4f   :  { %751 = vmatpush1.bf16.msra.mxu1 %v7298_v22  ;;  %v7387_v22 = vld [vmem:[%s11166_s4 + $0x320] ss:$16 sps:$4 sm:$0xff]  }
  0x50   :  { %2439 = vmatpush1.bf16.msra.mxu0 %v7301_v23  ;;  %752 = vmatprep.subr.bf16.mxu1 %v7306_v24  ;;  %v7392_v23 = vld [vmem:[%s11165_s2 + $0x24c] ss:$16 sps:$4 sm:$0xff]   ;;  %v7390_v24 = vld [vmem:[%s11165_s2 + $0x248] ss:$16 sps:$4 sm:$0xff]  }
  0x51   :  { %2440 = vmatprep.subr.bf16.mxu0 %v7309_v25  ;;  %v7393_v25 = vld [vmem:[%s11166_s4 + $0x340] ss:$16 sps:$4 sm:$0xff]  }
  0x53   :  { %753 = vmatpush1.bf16.msra.mxu1 %v7304_v26  ;;  %v7398_v26 = vld [vmem:[%s11165_s2 + $0x26c] ss:$16 sps:$4 sm:$0xff]  }
  0x54   :  { %2441 = vmatpush1.bf16.msra.mxu0 %v7307_v27  ;;  %754 = vmatprep.subr.bf16.mxu1 %v7312_v28  ;;  %v7396_v27 = vld [vmem:[%s11165_s2 + $0x268] ss:$16 sps:$4 sm:$0xff]   ;;  %v7399_v28 = vld [vmem:[%s11166_s4 + $0x360] ss:$16 sps:$4 sm:$0xff]  }
  0x55   :  { %2442 = vmatprep.subr.bf16.mxu0 %v7315_v29  ;;  %v7404_v29 = vld [vmem:[%s11165_s2 + $0x28c] ss:$16 sps:$4 sm:$0xff]  }
  0x57   :  { %755 = vmatpush1.bf16.msra.mxu1 %v7310_v30  ;;  %v7407_v30 = vld [vmem:[%s11166_s4 + $0x384] ss:$16 sps:$4 sm:$0xff]  }
  0x58   :  { %2443 = vmatpush1.bf16.msra.mxu0 %v7313_v31  ;;  %756 = vmatprep.subr.bf16.mxu1 %v7318_v32  ;;  %v7402_v31 = vld [vmem:[%s11165_s2 + $0x288] ss:$16 sps:$4 sm:$0xff]   ;;  %v7405_v32 = vld [vmem:[%s11166_s4 + $0x380] ss:$16 sps:$4 sm:$0xff]  }
  0x59   :  { %2444 = vmatprep.subr.bf16.mxu0 %v7321_v33  ;;  %v7410_v33 = vld [vmem:[%s11165_s2 + $0x2ac] ss:$16 sps:$4 sm:$0xff]  }
  0x5b   :  { %757 = vmatpush1.bf16.msra.mxu1 %v7316_v34  ;;  %v7413_v34 = vld [vmem:[%s11166_s4 + $0x3a4] ss:$16 sps:$4 sm:$0xff]  }
  0x5c   :  { %2445 = vmatpush1.bf16.msra.mxu0 %v7319_v35  ;;  %758 = vmatprep.subr.bf16.mxu1 %v7324_v37  ;;  %v7408_v35 = vld [vmem:[%s11165_s2 + $0x2a8] ss:$16 sps:$4 sm:$0xff]   ;;  %v7411_v37 = vld [vmem:[%s11166_s4 + $0x3a0] ss:$16 sps:$4 sm:$0xff]  }
  0x5d   :  { %2446 = vmatprep.subr.bf16.mxu0 %v7327_v38  ;;  %v7416_v38 = vld [vmem:[%s11165_s2 + $0x2cc] ss:$16 sps:$4 sm:$0xff]  }
  0x5f   :  { %759 = vmatpush1.bf16.msra.mxu1 %v7322_v39  ;;  %v7419_v39 = vld [vmem:[%s11166_s4 + $0x3c4] ss:$16 sps:$4 sm:$0xff]  }
  0x60   :  { %2447 = vmatpush1.bf16.msra.mxu0 %v7325_v40  ;;  %760 = vmatprep.subr.bf16.mxu1 %v7330_v41  ;;  %v7414_v40 = vld [vmem:[%s11165_s2 + $0x2c8] ss:$16 sps:$4 sm:$0xff]   ;;  %v7417_v41 = vld [vmem:[%s11166_s4 + $0x3c0] ss:$16 sps:$4 sm:$0xff]  }
  0x61   :  { %2457 = vmatprep.subr.bf16.mxu0 %v7335_v42  ;;  %v7422_v42 = vld [vmem:[%s11165_s2 + $0x2ec] ss:$16 sps:$4 sm:$0xff]  }
  0x63   :  { %2449 = vmatmul.mubr.bf16.vlgmr.msra.gmra.mrb[4].mxu0 %v8805_v44  ;;  %761 = vmatpush1.bf16.msra.mxu1 %v7328_v43  ;;  %v7425_v43 = vld [vmem:[%s11166_s4 + $0x3e4] ss:$16 sps:$4 sm:$0xff]  }
  0x64   :  { %2458 = vmatpush1.bf16.msra.mxu0 %v7333_v45  ;;  %762 = vmatprep.subr.bf16.mxu1 %v7338_v46  ;;  %v7420_v45 = vld [vmem:[%s11165_s2 + $0x2e8] ss:$16 sps:$4 sm:$0xff]   ;;  %v7423_v46 = vld [vmem:[%s11166_s4 + $0x3e0] ss:$16 sps:$4 sm:$0xff]  }
  0x65   :  { %2459 = vmatprep.subr.bf16.mxu0 %v7341_v47  ;;  %2489 = vmatprep.mubr.bf16.mxu0 %v8860_v61  ;;  %v7430_v47 = vld [vmem:[%s11166_s4 + $0x404] ss:$16 sps:$4 sm:$0xff]  }
  0x67   :  { %763 = vmatpush1.bf16.msra.mxu1 %v7336_v48  ;;  %v7433_v48 = vld [vmem:[%s11166_s4 + $0xc] ss:$16 sps:$4 sm:$0xff]  }
  0x68   :  { %2460 = vmatpush1.bf16.msra.mxu0 %v7339_v49  ;;  %764 = vmatprep.subr.bf16.mxu1 %v7344_v50  ;;  %v9011_v49 = vcombine.low %v8850_v58, %v8850_v58  ;;  %v9016_v50 = vld [vmem:[%s11168_s1 + $0x10] sm:$0xff] }
  0x69   :  { %2461 = vmatprep.subr.bf16.mxu0 %v7347_v51  ;;  %v7428_v51 = vld [vmem:[%s11166_s4 + $0x400] ss:$16 sps:$4 sm:$0xff]   ;;  %v7442_v58 = vld [vmem:[%s11166_s4 + $0x444] ss:$16 sps:$4 sm:$0xff]  }
  0x6b   :  { %765 = vmatpush1.bf16.msra.mxu1 %v7342_v52  ;;  %v7431_v52 = vld [vmem:[%s11166_s4 + $0x8] ss:$16 sps:$4 sm:$0xff]  }
  0x6c   :  { %2462 = vmatpush1.bf16.msra.mxu0 %v7345_v53  ;;  %766 = vmatprep.subr.bf16.mxu1 %v7350_v54  ;;  %v7436_v53 = vld [vmem:[%s11166_s4 + $0x424] ss:$16 sps:$4 sm:$0xff]   ;;  %v7439_v54 = vld [vmem:[%s11166_s4 + $0x2c] ss:$16 sps:$4 sm:$0xff]  }
  0x6d   :  { %2463 = vmatprep.subr.bf16.mxu0 %v7353_v55  ;;  %v9032_v55 = vcombine.high %v9016_v50, %v9016_v50 }
  0x6f   :  { %767 = vmatpush1.bf16.msra.mxu1 %v7348_v56  ;;  %v7434_v56 = vld [vmem:[%s11166_s4 + $0x420] ss:$16 sps:$4 sm:$0xff]  }
  0x70   :  { %2464 = vmatpush1.bf16.msra.mxu0 %v7351_v57  ;;  %768 = vmatprep.subr.bf16.mxu1 %v7356_v59  ;;  %v7437_v57 = vld [vmem:[%s11166_s4 + $0x28] ss:$16 sps:$4 sm:$0xff]   ;;  %v7440_v59 = vld [vmem:[%s11166_s4 + $0x440] ss:$16 sps:$4 sm:$0xff]  }
  0x71   :  { %2465 = vmatprep.subr.bf16.mxu0 %v7359_v60  ;;  %v7443_v60 = vld [vmem:[%s11166_s4 + $0x48] ss:$16 sps:$4 sm:$0xff]  }
  0x73   :  { %769 = vmatpush1.bf16.msra.mxu1 %v7354_v62  ;;  %v7448_v62 = vld [vmem:[%s11166_s4 + $0x464] ss:$16 sps:$4 sm:$0xff]  }
  0x74   :  { %2466 = vmatpush1.bf16.msra.mxu0 %v7357_v63  ;;  %770 = vmatprep.subr.bf16.mxu1 %v7362_v0  ;;  %v7446_v63 = vld [vmem:[%s11166_s4 + $0x460] ss:$16 sps:$4 sm:$0xff]   ;;  %v7449_v0 = vld [vmem:[%s11166_s4 + $0x68] ss:$16 sps:$4 sm:$0xff]  }
  0x75   :  { %2467 = vmatprep.subr.bf16.mxu0 %v7365_v2  ;;  %v7454_v2 = vld [vmem:[%s11166_s4 + $0x484] ss:$16 sps:$4 sm:$0xff]  }
  0x77   :  { %771 = vmatpush1.bf16.msra.mxu1 %v7360_v3  ;;  %v7457_v3 = vld [vmem:[%s11166_s4 + $0x8c] ss:$16 sps:$4 sm:$0xff]  }
  0x78   :  { %2468 = vmatpush1.bf16.msra.mxu0 %v7363_v4  ;;  %772 = vmatprep.subr.bf16.mxu1 %v7368_v5  ;;  %v7452_v4 = vld [vmem:[%s11166_s4 + $0x480] ss:$16 sps:$4 sm:$0xff]   ;;  %v7455_v5 = vld [vmem:[%s11166_s4 + $0x88] ss:$16 sps:$4 sm:$0xff]  }
  0x79   :  { %2469 = vmatprep.subr.bf16.mxu0 %v7371_v6  ;;  %v7460_v6 = vld [vmem:[%s11166_s4 + $0x4a4] ss:$16 sps:$4 sm:$0xff]  }
  0x7b   :  { %773 = vmatpush1.bf16.msra.mxu1 %v7366_v8  ;;  %v7463_v8 = vld [vmem:[%s11166_s4 + $0xac] ss:$16 sps:$4 sm:$0xff]  }
  0x7c   :  { %2470 = vmatpush1.bf16.msra.mxu0 %v7369_v9  ;;  %774 = vmatprep.subr.bf16.mxu1 %v7374_v10  ;;  %v7458_v9 = vld [vmem:[%s11166_s4 + $0x4a0] ss:$16 sps:$4 sm:$0xff]   ;;  %v7461_v10 = vld [vmem:[%s11166_s4 + $0xa8] ss:$16 sps:$4 sm:$0xff]  }
  0x7d   :  { %2471 = vmatprep.subr.bf16.mxu0 %v7377_v11  ;;  %v7466_v11 = vld [vmem:[%s11166_s4 + $0x4c4] ss:$16 sps:$4 sm:$0xff]  }
  0x7f   :  { %775 = vmatpush1.bf16.msra.mxu1 %v7372_v12  ;;  %v7469_v12 = vld [vmem:[%s11166_s4 + $0xcc] ss:$16 sps:$4 sm:$0xff]  }
  0x80   :  { %2472 = vmatpush1.bf16.msra.mxu0 %v7375_v13  ;;  %785 = vmatprep.subr.bf16.mxu1 %v7380_v14  ;;  %v7464_v13 = vld [vmem:[%s11166_s4 + $0x4c0] ss:$16 sps:$4 sm:$0xff]   ;;  %v7467_v14 = vld [vmem:[%s11166_s4 + $0xc8] ss:$16 sps:$4 sm:$0xff]  }
  0x81   :  { %2473 = vmatprep.subr.bf16.mxu0 %v7383_v16  ;;  %v7472_v16 = vld [vmem:[%s11166_s4 + $0x4e4] ss:$16 sps:$4 sm:$0xff]  }
  0x82   :  { %777 = vmatmul.mubr.bf16.vlgmr.msra.gmra.mrb[4].mxu1 %v8697_v7  ;;  %v7395_v7 = vld [vmem:[%s11166_s4 + $0x344] ss:$16 sps:$4 sm:$0xff]  }
  0x83   :  { %786 = vmatpush1.bf16.msra.mxu1 %v7378_v17  ;;  %817 = vmatprep.mubr.bf16.mxu1 %v8408_v1  ;;  %v7401_v1 = vld [vmem:[%s11166_s4 + $0x364] ss:$16 sps:$4 sm:$0xff]   ;;  %v7475_v17 = vld [vmem:[%s11166_s4 + $0xec] ss:$16 sps:$4 sm:$0xff]  }
  0x84   :  { %2474 = vmatpush1.bf16.msra.mxu0 %v7381_v18  ;;  %787 = vmatprep.subr.bf16.mxu1 %v7386_v19  ;;  %v7470_v18 = vld [vmem:[%s11166_s4 + $0x4e0] ss:$16 sps:$4 sm:$0xff]   ;;  %v7473_v19 = vld [vmem:[%s11166_s4 + $0xe8] ss:$16 sps:$4 sm:$0xff]  }
  0x85   :  { %2475 = vmatprep.subr.bf16.mxu0 %v7389_v20  ;;  %v7478_v20 = vld [vmem:[%s11166_s4 + $0x504] ss:$16 sps:$4 sm:$0xff]  }
  0x87   :  { %788 = vmatpush1.bf16.msra.mxu1 %v7384_v21  ;;  %v7481_v21 = vld [vmem:[%s11166_s4 + $0x10c] ss:$16 sps:$4 sm:$0xff]  }
  0x88   :  { %2476 = vmatpush1.bf16.msra.mxu0 %v7387_v22  ;;  %789 = vmatprep.subr.bf16.mxu1 %v7392_v23  ;;  %v7476_v22 = vld [vmem:[%s11166_s4 + $0x500] ss:$16 sps:$4 sm:$0xff]   ;;  %v7479_v23 = vld [vmem:[%s11166_s4 + $0x108] ss:$16 sps:$4 sm:$0xff]  }
  0x89   :  { %2477 = vmatprep.subr.bf16.mxu0 %v7395_v7  ;;  %v7484_v7 = vld [vmem:[%s11166_s4 + $0x524] ss:$16 sps:$4 sm:$0xff]  }
  0x8b   :  { %790 = vmatpush1.bf16.msra.mxu1 %v7390_v24  ;;  %v7487_v24 = vld [vmem:[%s11166_s4 + $0x12c] ss:$16 sps:$4 sm:$0xff]  }
  0x8c   :  { %2478 = vmatpush1.bf16.msra.mxu0 %v7393_v25  ;;  %791 = vmatprep.subr.bf16.mxu1 %v7398_v26  ;;  %v7482_v25 = vld [vmem:[%s11166_s4 + $0x520] ss:$16 sps:$4 sm:$0xff]   ;;  %v7485_v26 = vld [vmem:[%s11166_s4 + $0x128] ss:$16 sps:$4 sm:$0xff]  }
  0x8d   :  { %2479 = vmatprep.subr.bf16.mxu0 %v7401_v1  ;;  %v7490_v1 = vld [vmem:[%s11166_s4 + $0x544] ss:$16 sps:$4 sm:$0xff]  }
  0x8f   :  { %792 = vmatpush1.bf16.msra.mxu1 %v7396_v27  ;;  %v7493_v27 = vld [vmem:[%s11166_s4 + $0x14c] ss:$16 sps:$4 sm:$0xff]  }
  0x90   :  { %2480 = vmatpush1.bf16.msra.mxu0 %v7399_v28  ;;  %793 = vmatprep.subr.bf16.mxu1 %v7404_v29  ;;  %v7488_v28 = vld [vmem:[%s11166_s4 + $0x540] ss:$16 sps:$4 sm:$0xff]   ;;  %v7491_v29 = vld [vmem:[%s11166_s4 + $0x148] ss:$16 sps:$4 sm:$0xff]  }
  0x91   :  { %2481 = vmatprep.subr.bf16.mxu0 %v7407_v30  ;;  %v7496_v30 = vld [vmem:[%s11166_s4 + $0x564] ss:$16 sps:$4 sm:$0xff]  }
  0x93   :  { %794 = vmatpush1.bf16.msra.mxu1 %v7402_v31  ;;  %v7499_v31 = vld [vmem:[%s11166_s4 + $0x16c] ss:$16 sps:$4 sm:$0xff]  }
  0x94   :  { %2482 = vmatpush1.bf16.msra.mxu0 %v7405_v32  ;;  %795 = vmatprep.subr.bf16.mxu1 %v7410_v33  ;;  %v7494_v32 = vld [vmem:[%s11166_s4 + $0x560] ss:$16 sps:$4 sm:$0xff]   ;;  %v7497_v33 = vld [vmem:[%s11166_s4 + $0x168] ss:$16 sps:$4 sm:$0xff]  }
  0x95   :  { %2483 = vmatprep.subr.bf16.mxu0 %v7413_v34  ;;  %v7502_v34 = vld [vmem:[%s11166_s4 + $0x584] ss:$16 sps:$4 sm:$0xff]  }
  0x97   :  { %796 = vmatpush1.bf16.msra.mxu1 %v7408_v35  ;;  %v7505_v35 = vld [vmem:[%s11166_s4 + $0x18c] ss:$16 sps:$4 sm:$0xff]  }
  0x98   :  { %2484 = vmatpush1.bf16.msra.mxu0 %v7411_v37  ;;  %797 = vmatprep.subr.bf16.mxu1 %v7416_v38  ;;  %v7500_v37 = vld [vmem:[%s11166_s4 + $0x580] ss:$16 sps:$4 sm:$0xff]   ;;  %v7503_v38 = vld [vmem:[%s11166_s4 + $0x188] ss:$16 sps:$4 sm:$0xff]  }
  0x99   :  { %2485 = vmatprep.subr.bf16.mxu0 %v7419_v39  ;;  %v7508_v39 = vld [vmem:[%s11166_s4 + $0x5a4] ss:$16 sps:$4 sm:$0xff]  }
  0x9b   :  { %798 = vmatpush1.bf16.msra.mxu1 %v7414_v40  ;;  %v7511_v40 = vld [vmem:[%s11166_s4 + $0x1ac] ss:$16 sps:$4 sm:$0xff]  }
  0x9c   :  { %2486 = vmatpush1.bf16.msra.mxu0 %v7417_v41  ;;  %799 = vmatprep.subr.bf16.mxu1 %v7422_v42  ;;  %v7506_v41 = vld [vmem:[%s11166_s4 + $0x5a0] ss:$16 sps:$4 sm:$0xff]   ;;  %v7509_v42 = vld [vmem:[%s11166_s4 + $0x1a8] ss:$16 sps:$4 sm:$0xff]  }
  0x9d   :  { %2487 = vmatprep.subr.bf16.mxu0 %v7425_v43  ;;  %v7514_v43 = vld [vmem:[%s11166_s4 + $0x5c4] ss:$16 sps:$4 sm:$0xff]  }
  0x9f   :  { %800 = vmatpush1.bf16.msra.mxu1 %v7420_v45  ;;  %v7517_v45 = vld [vmem:[%s11166_s4 + $0x1cc] ss:$16 sps:$4 sm:$0xff]  }
  0xa0   :  { %2488 = vmatpush1.bf16.msra.mxu0 %v7423_v46  ;;  %2580 = vmatprep.subr.bf16.mxu1 %v7433_v48  ;;  %v7512_v46 = vld [vmem:[%s11166_s4 + $0x5c0] ss:$16 sps:$4 sm:$0xff]   ;;  %v7520_v48 = vld [vmem:[%s11166_s4 + $0x5e4] ss:$16 sps:$4 sm:$0xff]  }
  0xa1   :  { %2498 = vmatprep.subr.bf16.mxu0 %v7430_v47  ;;  %v7515_v47 = vld [vmem:[%s11166_s4 + $0x1c8] ss:$16 sps:$4 sm:$0xff]  }
  0xa2   :  { %818 = vmatmul.mubr.bf16.vlgmr.msra.gmra.mrb[4].mxu1 %v8598_v36  ;;  %v7445_v36 = vld [vmem:[%s11166_s4 + $0x4c] ss:$16 sps:$4 sm:$0xff]  }
  0xa3   :  { %2490 = vmatmul.mubr.bf16.vlgmr.msra.gmra.mrb[4].mxu0 %v9011_v49  ;;  %2581 = vmatpush1.bf16.msra.mxu1 %v7431_v52  ;;  %v7518_v52 = vld [vmem:[%s11166_s4 + $0x5e0] ss:$16 sps:$4 sm:$0xff]  }
  0xa4   :  { %2499 = vmatpush1.bf16.msra.mxu0 %v7428_v51  ;;  %2582 = vmatprep.subr.bf16.mxu1 %v7439_v54  ;;  %v7523_v51 = vld [vmem:[%s11166_s4 + $0x1ec] ss:$16 sps:$4 sm:$0xff]   ;;  %v7528_v54 = vld [vmem:[%s11166_s4 + $0x604] ss:$16 sps:$4 sm:$0xff]  }
  0xa5   :  { %2500 = vmatprep.subr.bf16.mxu0 %v7436_v53  ;;  %2530 = vmatprep.mubr.bf16.mxu0 %v9032_v55  ;;  %v7521_v53 = vld [vmem:[%s11166_s4 + $0x1e8] ss:$16 sps:$4 sm:$0xff]  }
  0xa6   :  { %2612 = vmatprep.mubr.bf16.mxu1 %v8721_v15  ;;  %v7451_v15 = vld [vmem:[%s11166_s4 + $0x6c] ss:$16 sps:$4 sm:$0xff]  }
  0xa7   :  { %2583 = vmatpush1.bf16.msra.mxu1 %v7437_v57  ;;  %v9221_v57 = vld [vmem:[%s11168_s1 + $0x18] sm:$0xff] }
  0xa8   :  { %2501 = vmatpush1.bf16.msra.mxu0 %v7434_v56  ;;  %2584 = vmatprep.subr.bf16.mxu1 %v7445_v36  ;;  %v7531_v56 = vld [vmem:[%s11166_s4 + $0x20c] ss:$16 sps:$4 sm:$0xff]   ;;  %v7529_v36 = vld [vmem:[%s11166_s4 + $0x208] ss:$16 sps:$4 sm:$0xff]  }
  0xa9   :  { %2502 = vmatprep.subr.bf16.mxu0 %v7442_v58  ;;  %v7526_v58 = vld [vmem:[%s11166_s4 + $0x600] ss:$16 sps:$4 sm:$0xff]  }
  0xab   :  { %2585 = vmatpush1.bf16.msra.mxu1 %v7443_v60  ;;  %v7534_v60 = vld [vmem:[%s11166_s4 + $0x624] ss:$16 sps:$4 sm:$0xff]  }
  0xac   :  { %2503 = vmatpush1.bf16.msra.mxu0 %v7440_v59  ;;  %2586 = vmatprep.subr.bf16.mxu1 %v7451_v15  ;;  %v9231_v59 = vcombine.low %v9016_v50, %v9016_v50  ;;  %v9241_v15 = vcombine.high %v9221_v57, %v9221_v57  ;;  %v7532_v50 = vld [vmem:[%s11166_s4 + $0x620] ss:$16 sps:$4 sm:$0xff]  }
  0xad   :  { %2504 = vmatprep.subr.bf16.mxu0 %v7448_v62  ;;  %v7537_v62 = vld [vmem:[%s11166_s4 + $0x22c] ss:$16 sps:$4 sm:$0xff]  }
  0xaf   :  { %2587 = vmatpush1.bf16.msra.mxu1 %v7449_v0  ;;  %v7540_v0 = vld [vmem:[%s11166_s4 + $0x644] ss:$16 sps:$4 sm:$0xff]  }
  0xb0   :  { %2505 = vmatpush1.bf16.msra.mxu0 %v7446_v63  ;;  %2588 = vmatprep.subr.bf16.mxu1 %v7457_v3  ;;  %v7535_v63 = vld [vmem:[%s11166_s4 + $0x228] ss:$16 sps:$4 sm:$0xff]  }
  0xb1   :  { %2506 = vmatprep.subr.bf16.mxu0 %v7454_v2  ;;  %v7538_v2 = vld [vmem:[%s11166_s4 + $0x640] ss:$16 sps:$4 sm:$0xff]   ;;  %v7541_v3 = vld [vmem:[%s11166_s4 + $0x248] ss:$16 sps:$4 sm:$0xff]  }
  0xb3   :  { %2589 = vmatpush1.bf16.msra.mxu1 %v7455_v5  ;;  %v7544_v5 = vld [vmem:[%s11166_s4 + $0x660] ss:$16 sps:$4 sm:$0xff]  }
  0xb4   :  { %2507 = vmatpush1.bf16.msra.mxu0 %v7452_v4  ;;  %2590 = vmatprep.subr.bf16.mxu1 %v7463_v8  ;;  %v7546_v4 = vld [vmem:[%s11166_s4 + $0x664] ss:$16 sps:$4 sm:$0xff]  }
  0xb5   :  { %2508 = vmatprep.subr.bf16.mxu0 %v7460_v6  ;;  %v7547_v6 = vld [vmem:[%s11166_s4 + $0x268] ss:$16 sps:$4 sm:$0xff]   ;;  %v7552_v8 = vld [vmem:[%s11166_s4 + $0x684] ss:$16 sps:$4 sm:$0xff]  }
  0xb7   :  { %2591 = vmatpush1.bf16.msra.mxu1 %v7461_v10  ;;  %v7550_v10 = vld [vmem:[%s11166_s4 + $0x680] ss:$16 sps:$4 sm:$0xff]  }
  0xb8   :  { %2509 = vmatpush1.bf16.msra.mxu0 %v7458_v9  ;;  %2592 = vmatprep.subr.bf16.mxu1 %v7469_v12  ;;  %v7555_v9 = vld [vmem:[%s11166_s4 + $0x28c] ss:$16 sps:$4 sm:$0xff]   ;;  %v7558_v12 = vld [vmem:[%s11166_s4 + $0x6a4] ss:$16 sps:$4 sm:$0xff]  }
  0xb9   :  { %2510 = vmatprep.subr.bf16.mxu0 %v7466_v11  ;;  %v7553_v11 = vld [vmem:[%s11166_s4 + $0x288] ss:$16 sps:$4 sm:$0xff]  }
  0xbb   :  { %2593 = vmatpush1.bf16.msra.mxu1 %v7467_v14  ;;  %v7556_v14 = vld [vmem:[%s11166_s4 + $0x6a0] ss:$16 sps:$4 sm:$0xff]  }
  0xbc   :  { %2511 = vmatpush1.bf16.msra.mxu0 %v7464_v13  ;;  %2594 = vmatprep.subr.bf16.mxu1 %v7475_v17  ;;  %v7561_v13 = vld [vmem:[%s11166_s4 + $0x2ac] ss:$16 sps:$4 sm:$0xff]   ;;  %v7564_v17 = vld [vmem:[%s11166_s4 + $0x6c4] ss:$16 sps:$4 sm:$0xff]  }
  0xbd   :  { %2512 = vmatprep.subr.bf16.mxu0 %v7472_v16  ;;  %v7559_v16 = vld [vmem:[%s11166_s4 + $0x2a8] ss:$16 sps:$4 sm:$0xff]  }
  0xbf   :  { %2595 = vmatpush1.bf16.msra.mxu1 %v7473_v19 }
  0xc0   :  { %2513 = vmatpush1.bf16.msra.mxu0 %v7470_v18  ;;  %2596 = vmatprep.subr.bf16.mxu1 %v7481_v21  ;;  %v7567_v18 = vld [vmem:[%s11166_s4 + $0x2cc] ss:$16 sps:$4 sm:$0xff]   ;;  %v7562_v21 = vld [vmem:[%s11166_s4 + $0x6c0] ss:$16 sps:$4 sm:$0xff]  }
  0xc1   :  { %2514 = vmatprep.subr.bf16.mxu0 %v7478_v20 }
  0xc3   :  { %2597 = vmatpush1.bf16.msra.mxu1 %v7479_v23 }
  0xc4   :  { %2515 = vmatpush1.bf16.msra.mxu0 %v7476_v22  ;;  %2598 = vmatprep.subr.bf16.mxu1 %v7487_v24  ;;  %v7565_v22 = vld [vmem:[%s11166_s4 + $0x2c8] ss:$16 sps:$4 sm:$0xff]   ;;  %v7573_v24 = vld [vmem:[%s11166_s4 + $0x2ec] ss:$16 sps:$4 sm:$0xff]  }
  0xc5   :  { %2516 = vmatprep.subr.bf16.mxu0 %v7484_v7  ;;  %v7570_v7 = vld [vmem:[%s11166_s4 + $0x6e4] ss:$16 sps:$4 sm:$0xff]  }
  0xc7   :  { %2599 = vmatpush1.bf16.msra.mxu1 %v7485_v26  ;;  %v7568_v26 = vld [vmem:[%s11166_s4 + $0x6e0] ss:$16 sps:$4 sm:$0xff]  }
  0xc8   :  { %2517 = vmatpush1.bf16.msra.mxu0 %v7482_v25  ;;  %2600 = vmatprep.subr.bf16.mxu1 %v7493_v27  ;;  %v7576_v27 = vld [vmem:[%s11166_s4 + $0x704] ss:$16 sps:$4 sm:$0xff]  }
  0xc9   :  { %2518 = vmatprep.subr.bf16.mxu0 %v7490_v1  ;;  %v7571_v1 = vld [vmem:[%s11166_s4 + $0x2e8] ss:$16 sps:$4 sm:$0xff]  }
  0xcb   :  { %2601 = vmatpush1.bf16.msra.mxu1 %v7491_v29  ;;  %v7574_v29 = vld [vmem:[%s11166_s4 + $0x700] ss:$16 sps:$4 sm:$0xff]  }
  0xcc   :  { %2519 = vmatpush1.bf16.msra.mxu0 %v7488_v28  ;;  %2602 = vmatprep.subr.bf16.mxu1 %v7499_v31  ;;  %v7579_v28 = vld [vmem:[%s11166_s4 + $0x30c] ss:$16 sps:$4 sm:$0xff]   ;;  %v7582_v31 = vld [vmem:[%s11166_s4 + $0x724] ss:$16 sps:$4 sm:$0xff]  }
  0xcd   :  { %2520 = vmatprep.subr.bf16.mxu0 %v7496_v30  ;;  %v7577_v30 = vld [vmem:[%s11166_s4 + $0x308] ss:$16 sps:$4 sm:$0xff]  }
  0xcf   :  { %2603 = vmatpush1.bf16.msra.mxu1 %v7497_v33  ;;  %v7580_v33 = vld [vmem:[%s11166_s4 + $0x720] ss:$16 sps:$4 sm:$0xff]  }
  0xd0   :  { %2521 = vmatpush1.bf16.msra.mxu0 %v7494_v32  ;;  %2604 = vmatprep.subr.bf16.mxu1 %v7505_v35  ;;  %v7585_v32 = vld [vmem:[%s11166_s4 + $0x32c] ss:$16 sps:$4 sm:$0xff]   ;;  %v7588_v35 = vld [vmem:[%s11166_s4 + $0x744] ss:$16 sps:$4 sm:$0xff]  }
  0xd1   :  { %2522 = vmatprep.subr.bf16.mxu0 %v7502_v34  ;;  %v7583_v34 = vld [vmem:[%s11166_s4 + $0x328] ss:$16 sps:$4 sm:$0xff]  }
  0xd3   :  { %2605 = vmatpush1.bf16.msra.mxu1 %v7503_v38  ;;  %v151_v38 = vlaneseq }
  0xd4   :  { %2523 = vmatpush1.bf16.msra.mxu0 %v7500_v37  ;;  %2606 = vmatprep.subr.bf16.mxu1 %v7511_v40  ;;  %v7591_v37 = vld [vmem:[%s11166_s4 + $0x34c] ss:$16 sps:$4 sm:$0xff]   ;;  %v7589_v40 = vld [vmem:[%s11166_s4 + $0x348] ss:$16 sps:$4 sm:$0xff]  }
  0xd5   :  { %2524 = vmatprep.subr.bf16.mxu0 %v7508_v39  ;;  %v7586_v39 = vld [vmem:[%s11166_s4 + $0x740] ss:$16 sps:$4 sm:$0xff]  }
  0xd7   :  { %2607 = vmatpush1.bf16.msra.mxu1 %v7509_v42  ;;  %v7597_v42 = vld [vmem:[%s11166_s4 + $0x36c] ss:$16 sps:$4 sm:$0xff]  }
  0xd8   :  { %2525 = vmatpush1.bf16.msra.mxu0 %v7506_v41  ;;  %2608 = vmatprep.subr.bf16.mxu1 %v7517_v45  ;;  %v7594_v41 = vld [vmem:[%s11166_s4 + $0x764] ss:$16 sps:$4 sm:$0xff]   ;;  %v7592_v45 = vld [vmem:[%s11166_s4 + $0x760] ss:$16 sps:$4 sm:$0xff]  }
  0xd9   :  { %2526 = vmatprep.subr.bf16.mxu0 %v7514_v43  ;;  %v9371_v43 = vshrl.u32 %v151_v38, 7  ;;  %v7642_v38 = vld [vmem:[%s11166_s4 + $0x4c8] ss:$16 sps:$4 sm:$0xff]  }
  0xdb   :  { %2609 = vmatpush1.bf16.msra.mxu1 %v7515_v47  ;;  %v7600_v47 = vld [vmem:[%s11166_s4 + $0x784] ss:$16 sps:$4 sm:$0xff]  }
  0xdc   :  { %2527 = vmatpush1.bf16.msra.mxu0 %v7512_v46  ;;  %2610 = vmatprep.subr.bf16.mxu1 %v7523_v51  ;;  %v7595_v46 = vld [vmem:[%s11166_s4 + $0x368] ss:$16 sps:$4 sm:$0xff]   ;;  %v9386_v51 = vsub.s32 0, %v9371_v43 }
  0xdd   :  { %2528 = vmatprep.subr.bf16.mxu0 %v7520_v48  ;;  %v7603_v48 = vld [vmem:[%s11166_s4 + $0x38c] ss:$16 sps:$4 sm:$0xff]  }
  0xdf   :  { %2611 = vmatpush1.bf16.msra.mxu1 %v7521_v53  ;;  %v7598_v53 = vld [vmem:[%s11166_s4 + $0x780] ss:$16 sps:$4 sm:$0xff]  }
  0xe0   :  { %2529 = vmatpush1.bf16.msra.mxu0 %v7518_v52  ;;  %2621 = vmatprep.subr.bf16.mxu1 %v7531_v56  ;;  %v9389_v52 = vsub.s32 1, %v9371_v43  ;;  %v9400_v56 = vld [vmem:[%s11169_s3] sm:$0xf] }
  0xe1   :  { %2539 = vmatprep.subr.bf16.mxu0 %v7528_v54  ;;  %v7601_v54 = vld [vmem:[%s11166_s4 + $0x388] ss:$16 sps:$4 sm:$0xff]  }
  0xe2   :  { %2613 = vmatmul.mubr.bf16.vlgmr.msra.gmra.mrb[8].mxu1 %v8805_v44  ;;  %v7543_v44 = vld [vmem:[%s11166_s4 + $0x24c] ss:$16 sps:$4 sm:$0xff]  }
  0xe3   :  { %2531 = vmatmul.mubr.bf16.vlgmr.msra.gmra.mrb[4].mxu0 %v9231_v59  ;;  %2622 = vmatpush1.bf16.msra.mxu1 %v7529_v36  ;;  %v7609_v36 = vld [vmem:[%s11166_s4 + $0x3ac] ss:$16 sps:$4 sm:$0xff]  }
  0xe4   :  { %2540 = vmatpush1.bf16.msra.mxu0 %v7526_v58  ;;  %2623 = vmatprep.subr.bf16.mxu1 %v7537_v62  ;;  %v7606_v58 = vld [vmem:[%s11166_s4 + $0x7a4] ss:$16 sps:$4 sm:$0xff]   ;;  %v158_v62 = vrot.slane %v9400_v56, %v9389_v52 }
  0xe5   :  { %2541 = vmatprep.subr.bf16.mxu0 %v7534_v60  ;;  %2571 = vmatprep.mubr.bf16.mxu0 %v9241_v15  ;;  %v154_v60 = vrot.slane %v9400_v56, %v9386_v51 }
  0xe6   :  { %2653 = vmatprep.mubr.bf16.mxu1 %v8860_v61  ;;  %v7549_v61 = vld [vmem:[%s11166_s4 + $0x26c] ss:$16 sps:$4 sm:$0xff]  }
  0xe7   :  { %2624 = vmatpush1.bf16.msra.mxu1 %v7535_v63  ;;  %v7607_v63 = vld [vmem:[%s11166_s4 + $0x3a8] ss:$16 sps:$4 sm:$0xff]  }
  0xe8   :  { %2542 = vmatpush1.bf16.msra.mxu0 %v7532_v50  ;;  %2625 = vmatprep.subr.bf16.mxu1 %v7543_v44  ;;  %v7604_v50 = vld [vmem:[%s11166_s4 + $0x7a0] ss:$16 sps:$4 sm:$0xff]   ;;  %v7615_v44 = vld [vmem:[%s11166_s4 + $0x3cc] ss:$16 sps:$4 sm:$0xff]  }
  0xe9   :  { %2543 = vmatprep.subr.bf16.mxu0 %v7540_v0  ;;  %v7612_v0 = vld [vmem:[%s11166_s4 + $0x7c4] ss:$16 sps:$4 sm:$0xff]  }
  0xeb   :  { %2626 = vmatpush1.bf16.msra.mxu1 %v7541_v3 }
  0xec   :  { %2544 = vmatpush1.bf16.msra.mxu0 %v7538_v2  ;;  %2627 = vmatprep.subr.bf16.mxu1 %v7549_v61 }
  0xed   :  { %2545 = vmatprep.subr.bf16.mxu0 %v7546_v4 }
  0xef   :  { %2628 = vmatpush1.bf16.msra.mxu1 %v7547_v6  ;;  %v7610_v6 = vld [vmem:[%s11166_s4 + $0x7c0] ss:$16 sps:$4 sm:$0xff]  }
  0xf0   :  { %2546 = vmatpush1.bf16.msra.mxu0 %v7544_v5  ;;  %2629 = vmatprep.subr.bf16.mxu1 %v7555_v9 }
  0xf1   :  { %2547 = vmatprep.subr.bf16.mxu0 %v7552_v8  ;;  %v7613_v8 = vld [vmem:[%s11166_s4 + $0x3c8] ss:$16 sps:$4 sm:$0xff]  }
  0xf3   :  { %2630 = vmatpush1.bf16.msra.mxu1 %v7553_v11  ;;  %v7618_v11 = vld [vmem:[%s11166_s4 + $0x7e4] ss:$16 sps:$4 sm:$0xff]  }
  0xf4   :  { %2548 = vmatpush1.bf16.msra.mxu0 %v7550_v10  ;;  %2631 = vmatprep.subr.bf16.mxu1 %v7561_v13 }
  0xf5   :  { %2549 = vmatprep.subr.bf16.mxu0 %v7558_v12  ;;  %v7621_v12 = vld [vmem:[%s11166_s4 + $0x3ec] ss:$16 sps:$4 sm:$0xff]  }
  0xf6   :  { %v9307_v19 = vpop.f32.mrb[0].mxu0 }
  0xf7   :  { %v9309_v20 = vpop.f32.mrb[1].mxu0  ;;  %2632 = vmatpush1.bf16.msra.mxu1 %v7559_v16  ;;  %v7619_v16 = vld [vmem:[%s11166_s4 + $0x3e8] ss:$16 sps:$4 sm:$0xff]  }
  0xf8   :  { %2550 = vmatpush1.bf16.msra.mxu0 %v7556_v14  ;;  %v741_v23 = vpop.f32.mrb[2].mxu0  ;;  %2633 = vmatprep.subr.bf16.mxu1 %v7567_v18  ;;  %v7616_v14 = vld [vmem:[%s11166_s4 + $0x7e0] ss:$16 sps:$4 sm:$0xff]   ;;  %v9453_v18 = vcombine.low %v9221_v57, %v9221_v57  ;;  %v7627_v57 = vld [vmem:[%s11166_s4 + $0x428] ss:$16 sps:$4 sm:$0xff]  }
  0xf9   :  { %2551 = vmatprep.subr.bf16.mxu0 %v7564_v17  ;;  %v742_v25 = vpop.f32.mrb[3].mxu0  ;;  %v7626_v17 = vld [vmem:[%s11166_s4 + $0x40c] ss:$16 sps:$4 sm:$0xff]   ;;  %v7725_v23 = vld [vmem:[%s11170_s7 + $0x24] ss:$16 sps:$4 sm:$0xff]  }
  0xfa   :  { %v7728_v25 = vld [vmem:[%s11170_s7 + $0x44] ss:$16 sps:$4 sm:$0xff]  }
  0xfb   :  { %2634 = vmatpush1.bf16.msra.mxu1 %v7565_v22  ;;  %v7720_v22 = vld [vmem:[%s11170_s7] ss:$16 sps:$4 sm:$0xff]  }
  0xfc   :  { %2552 = vmatpush1.bf16.msra.mxu0 %v7562_v21  ;;  %2635 = vmatprep.subr.bf16.mxu1 %v7573_v24  ;;  %v7632_v21 = vld [vmem:[%s11166_s4 + $0x44c] ss:$16 sps:$4 sm:$0xff]   ;;  %v7723_v24 = vld [vmem:[%s11170_s7 + $0x20] ss:$16 sps:$4 sm:$0xff]  }
  0xfd   :  { %2553 = vmatprep.subr.bf16.mxu0 %v7570_v7  ;;  %v7630_v7 = vld [vmem:[%s11166_s4 + $0x448] ss:$16 sps:$4 sm:$0xff]  }
  0xff   :  { %2636 = vmatpush1.bf16.msra.mxu1 %v7571_v1  ;;  %v7638_v1 = vld [vmem:[%s11166_s4 + $0x48c] ss:$16 sps:$4 sm:$0xff]  }
 0x100   :  { %2554 = vmatpush1.bf16.msra.mxu0 %v7568_v26  ;;  %2637 = vmatprep.subr.bf16.mxu1 %v7579_v28  ;;  %v7633_v26 = vld [vmem:[%s11166_s4 + $0x468] ss:$16 sps:$4 sm:$0xff]   ;;  %v7731_v28 = vld [vmem:[%s11170_s7 + $0x64] ss:$16 sps:$4 sm:$0xff]  }
 0x101   :  { %2555 = vmatprep.subr.bf16.mxu0 %v7576_v27  ;;  %v7726_v27 = vld [vmem:[%s11170_s7 + $0x40] ss:$16 sps:$4 sm:$0xff]  }
 0x103   :  { %2638 = vmatpush1.bf16.msra.mxu1 %v7577_v30  ;;  %v7641_v30 = vld [vmem:[%s11166_s4 + $0x4ac] ss:$16 sps:$4 sm:$0xff]  }
 0x104   :  { %2556 = vmatpush1.bf16.msra.mxu0 %v7574_v29  ;;  %2639 = vmatprep.subr.bf16.mxu1 %v7585_v32  ;;  %v7636_v29 = vld [vmem:[%s11166_s4 + $0x488] ss:$16 sps:$4 sm:$0xff]   ;;  %v7734_v32 = vld [vmem:[%s11170_s7 + $0x84] ss:$16 sps:$4 sm:$0xff]  }
 0x105   :  { %2557 = vmatprep.subr.bf16.mxu0 %v7582_v31  ;;  %v7729_v31 = vld [vmem:[%s11170_s7 + $0x60] ss:$16 sps:$4 sm:$0xff]  }
 0x107   :  { %2640 = vmatpush1.bf16.msra.mxu1 %v7583_v34  ;;  %v7644_v34 = vld [vmem:[%s11166_s4 + $0x4cc] ss:$16 sps:$4 sm:$0xff]  }
 0x108   :  { %2558 = vmatpush1.bf16.msra.mxu0 %v7580_v33  ;;  %2641 = vmatprep.subr.bf16.mxu1 %v7591_v37  ;;  %v7639_v33 = vld [vmem:[%s11166_s4 + $0x4a8] ss:$16 sps:$4 sm:$0xff]   ;;  %v7737_v37 = vld [vmem:[%s11170_s7 + $0xa4] ss:$16 sps:$4 sm:$0xff]  }
 0x109   :  { %2559 = vmatprep.subr.bf16.mxu0 %v7588_v35  ;;  %v7732_v35 = vld [vmem:[%s11170_s7 + $0x80] ss:$16 sps:$4 sm:$0xff]  }
 0x10b   :  { %2642 = vmatpush1.bf16.msra.mxu1 %v7589_v40  ;;  %v7735_v40 = vld [vmem:[%s11170_s7 + $0xa0] ss:$16 sps:$4 sm:$0xff]  }
 0x10c   :  { %2560 = vmatpush1.bf16.msra.mxu0 %v7586_v39  ;;  %2643 = vmatprep.subr.bf16.mxu1 %v7597_v42  ;;  %v7647_v39 = vld [vmem:[%s11166_s4 + $0x4ec] ss:$16 sps:$4 sm:$0xff]   ;;  %v7645_v42 = vld [vmem:[%s11166_s4 + $0x4e8] ss:$16 sps:$4 sm:$0xff]  }
 0x10d   :  { %2561 = vmatprep.subr.bf16.mxu0 %v7594_v41  ;;  %v7740_v41 = vld [vmem:[%s11170_s7 + $0xc4] ss:$16 sps:$4 sm:$0xff]  }
 0x10f   :  { %2644 = vmatpush1.bf16.msra.mxu1 %v7595_v46  ;;  %v7650_v46 = vld [vmem:[%s11166_s4 + $0x50c] ss:$16 sps:$4 sm:$0xff]  }
 0x110   :  { %2562 = vmatpush1.bf16.msra.mxu0 %v7592_v45  ;;  %2645 = vmatprep.subr.bf16.mxu1 %v7603_v48  ;;  %v7738_v45 = vld [vmem:[%s11170_s7 + $0xc0] ss:$16 sps:$4 sm:$0xff]   ;;  %v7648_v48 = vld [vmem:[%s11166_s4 + $0x508] ss:$16 sps:$4 sm:$0xff]  }
 0x111   :  { %2563 = vmatprep.subr.bf16.mxu0 %v7600_v47  ;;  %v7743_v47 = vld [vmem:[%s11170_s7 + $0xe4] ss:$16 sps:$4 sm:$0xff]  }
 0x113   :  { %2646 = vmatpush1.bf16.msra.mxu1 %v7601_v54  ;;  %v7653_v54 = vld [vmem:[%s11166_s4 + $0x52c] ss:$16 sps:$4 sm:$0xff]  }
 0x114   :  { %2564 = vmatpush1.bf16.msra.mxu0 %v7598_v53  ;;  %2647 = vmatprep.subr.bf16.mxu1 %v7609_v36  ;;  %v7741_v53 = vld [vmem:[%s11170_s7 + $0xe0] ss:$16 sps:$4 sm:$0xff]   ;;  %v7651_v36 = vld [vmem:[%s11166_s4 + $0x528] ss:$16 sps:$4 sm:$0xff]  }
 0x115   :  { %2565 = vmatprep.subr.bf16.mxu0 %v7606_v58  ;;  %v696_v2 = vpop.f32.mrb[0].mxu1  ;;  %v7746_v58 = vld [vmem:[%s11170_s7 + $0x104] ss:$16 sps:$4 sm:$0xff]  }
 0x116   :  { %v697_v3 = vadd.f32 %v696_v2, %v154_v60  ;;  %v698_v4 = vpop.f32.mrb[1].mxu1  ;;  %v7744_v60 = vld [vmem:[%s11170_s7 + $0x100] ss:$16 sps:$4 sm:$0xff]   ;;  %v7752_v2 = vld [vmem:[%s11170_s7 + $0x144] ss:$16 sps:$4 sm:$0xff]  }
 0x117   :  { %v699_v61 = vadd.f32 %v698_v4, %v158_v62  ;;  %v700_v5 = vpop.f32.mrb[2].mxu1  ;;  %2648 = vmatpush1.bf16.msra.mxu1 %v7607_v63  ;;  %v7656_v62 = vld [vmem:[%s11166_s4 + $0x54c] ss:$16 sps:$4 sm:$0xff]   ;;  %v7654_v63 = vld [vmem:[%s11166_s4 + $0x548] ss:$16 sps:$4 sm:$0xff]  }
 0x118   :  { %2566 = vmatpush1.bf16.msra.mxu0 %v7604_v50  ;;  %v9431_v9 = vadd.f32 %v9307_v19, %v697_v3  ;;  %v701_v10 = vpop.f32.mrb[3].mxu1  ;;  %2649 = vmatprep.subr.bf16.mxu1 %v7615_v44  ;;  %v7624_v19 = vld [vmem:[%s11166_s4 + $0x408] ss:$16 sps:$4 sm:$0xff]   ;;  %v7749_v50 = vld [vmem:[%s11170_s7 + $0x124] ss:$16 sps:$4 sm:$0xff]  }
 0x119   :  { %2567 = vmatprep.subr.bf16.mxu0 %v7612_v0  ;;  %v9440_v13 = vadd.f32 %v9309_v20, %v699_v61  ;;  %v7629_v20 = vld [vmem:[%s11166_s4 + $0x42c] ss:$16 sps:$4 sm:$0xff]   ;;  %v7747_v0 = vld [vmem:[%s11170_s7 + $0x120] ss:$16 sps:$4 sm:$0xff]   ;;  %v7657_v3 = vld [vmem:[%s11166_s4 + $0x568] ss:$16 sps:$4 sm:$0xff]  }
 0x11a   :  { %v7659_v44 = vld [vmem:[%s11166_s4 + $0x56c] ss:$16 sps:$4 sm:$0xff]   ;;  %v7750_v4 = vld [vmem:[%s11170_s7 + $0x140] ss:$16 sps:$4 sm:$0xff]   ;;  %v7755_v5 = vld [vmem:[%s11170_s7 + $0x164] ss:$16 sps:$4 sm:$0xff]  }
 0x11b   :  { %2650 = vmatpush1.bf16.msra.mxu1 %v7613_v8  ;;  %v7662_v61 = vld [vmem:[%s11166_s4 + $0x58c] ss:$16 sps:$4 sm:$0xff]   ;;  %v7753_v8 = vld [vmem:[%s11170_s7 + $0x160] ss:$16 sps:$4 sm:$0xff]  }
 0x11c   :  { %2568 = vmatpush1.bf16.msra.mxu0 %v7610_v6  ;;  %2651 = vmatprep.subr.bf16.mxu1 %v7621_v12  ;;  %v7660_v6 = vld [vmem:[%s11166_s4 + $0x588] ss:$16 sps:$4 sm:$0xff]   ;;  %v7665_v10 = vld [vmem:[%s11166_s4 + $0x5ac] ss:$16 sps:$4 sm:$0xff]  }
 0x11d   :  { %2569 = vmatprep.subr.bf16.mxu0 %v7618_v11  ;;  %v7758_v11 = vld [vmem:[%s11170_s7 + $0x184] ss:$16 sps:$4 sm:$0xff]   ;;  %v7663_v12 = vld [vmem:[%s11166_s4 + $0x5a8] ss:$16 sps:$4 sm:$0xff]  }
 0x11f   :  { %2652 = vmatpush1.bf16.msra.mxu1 %v7619_v16  ;;  %v7668_v16 = vld [vmem:[%s11166_s4 + $0x5cc] ss:$16 sps:$4 sm:$0xff]  }
 0x120   :  { %2570 = vmatpush1.bf16.msra.mxu0 %v7616_v14  ;;  %2662 = vmatprep.subr.bf16.mxu1 %v7626_v17  ;;  %v7756_v14 = vld [vmem:[%s11170_s7 + $0x180] ss:$16 sps:$4 sm:$0xff]   ;;  %v7761_v17 = vld [vmem:[%s11170_s7 + $0x1a4] ss:$16 sps:$4 sm:$0xff]  }
 0x122   :  { %2654 = vmatmul.mubr.bf16.vlgmr.msra.gmra.mrb[8].mxu1 %v9011_v49  ;;  %v7722_v49 = vld [vmem:[%s11170_s7 + $0x4] ss:$16 sps:$4 sm:$0xff]  }
 0x123   :  { %2572 = vmatmul.mubr.bf16.vlgmr.msra.gmra.mrb[4].mxu0 %v9453_v18  ;;  %2663 = vmatpush1.bf16.msra.mxu1 %v7624_v19  ;;  %v7666_v19 = vld [vmem:[%s11166_s4 + $0x5c8] ss:$16 sps:$4 sm:$0xff]  }
 0x124   :  { %2694 = vmatprep.mubr.bf16.mxu1 %v9032_v55  ;;  %2664 = vmatprep.subr.bf16.mxu1 %v7629_v20  ;;  %v7635_v55 = vld [vmem:[%s11166_s4 + $0x46c] ss:$16 sps:$4 sm:$0xff]   ;;  %v7759_v20 = vld [vmem:[%s11170_s7 + $0x1a0] ss:$16 sps:$4 sm:$0xff]  }
 0x125   :  { %3648 = vmatprep.subr.bf16.mxu0 %v7722_v49  ;;  %v7762_v49 = vld [vmem:[%s11170_s7 + $0x1c0] ss:$16 sps:$4 sm:$0xff]  }
 0x126   :  { %3649 = vmatpush1.bf16.msra.mxu0 %v7720_v22  ;;  %v7669_v22 = vld [vmem:[%s11166_s4 + $0x5e8] ss:$16 sps:$4 sm:$0xff]  }
 0x127   :  { %2665 = vmatpush1.bf16.msra.mxu1 %v7627_v57  ;;  %3650 = vmatprep.subr.bf16.mxu0 %v7725_v23  ;;  %v7671_v57 = vld [vmem:[%s11166_s4 + $0x5ec] ss:$16 sps:$4 sm:$0xff]  }
 0x128   :  { %2666 = vmatprep.subr.bf16.mxu1 %v7632_v21  ;;  %v7764_v21 = vld [vmem:[%s11170_s7 + $0x1c4] ss:$16 sps:$4 sm:$0xff]   ;;  %v7674_v23 = vld [vmem:[%s11166_s4 + $0x60c] ss:$16 sps:$4 sm:$0xff]  }
 0x12a   :  { %3651 = vmatpush1.bf16.msra.mxu0 %v7723_v24  ;;  %v7675_v24 = vld [vmem:[%s11166_s4 + $0x628] ss:$16 sps:$4 sm:$0xff]  }
 0x12b   :  { %2667 = vmatpush1.bf16.msra.mxu1 %v7630_v7  ;;  %3652 = vmatprep.subr.bf16.mxu0 %v7728_v25  ;;  %v7672_v7 = vld [vmem:[%s11166_s4 + $0x608] ss:$16 sps:$4 sm:$0xff]   ;;  %v7680_v25 = vld [vmem:[%s11166_s4 + $0x64c] ss:$16 sps:$4 sm:$0xff]  }
 0x12c   :  { %2668 = vmatprep.subr.bf16.mxu1 %v7635_v55  ;;  %v7677_v55 = vld [vmem:[%s11166_s4 + $0x62c] ss:$16 sps:$4 sm:$0xff]  }
 0x12e   :  { %3653 = vmatpush1.bf16.msra.mxu0 %v7726_v27  ;;  %v9671_v27 = vsub.s32 2, %v9371_v43 }
 0x12f   :  { %2669 = vmatpush1.bf16.msra.mxu1 %v7633_v26  ;;  %3654 = vmatprep.subr.bf16.mxu0 %v7731_v28  ;;  %v7678_v26 = vld [vmem:[%s11166_s4 + $0x648] ss:$16 sps:$4 sm:$0xff]  }
 0x130   :  { %2670 = vmatprep.subr.bf16.mxu1 %v7638_v1  ;;  %v7686_v1 = vld [vmem:[%s11166_s4 + $0x68c] ss:$16 sps:$4 sm:$0xff]   ;;  %v7684_v28 = vld [vmem:[%s11166_s4 + $0x688] ss:$16 sps:$4 sm:$0xff]  }
 0x132   :  { %3655 = vmatpush1.bf16.msra.mxu0 %v7729_v31  ;;  %v162_v31 = vrot.slane %v9400_v56, %v9671_v27 }
 0x133   :  { %2671 = vmatpush1.bf16.msra.mxu1 %v7636_v29  ;;  %3656 = vmatprep.subr.bf16.mxu0 %v7734_v32  ;;  %v9677_v29 = vsub.s32 3, %v9371_v43  ;;  %v7692_v43 = vld [vmem:[%s11166_s4 + $0x6cc] ss:$16 sps:$4 sm:$0xff]  }
 0x134   :  { %2672 = vmatprep.subr.bf16.mxu1 %v7641_v30  ;;  %v7689_v30 = vld [vmem:[%s11166_s4 + $0x6ac] ss:$16 sps:$4 sm:$0xff]  }
 0x135   :  { %v166_v32 = vrot.slane %v9400_v56, %v9677_v29  ;;  %v7765_v56 = vld [vmem:[%s11170_s7 + $0x1e0] ss:$16 sps:$4 sm:$0xff]  }
 0x136   :  { %3657 = vmatpush1.bf16.msra.mxu0 %v7732_v35  ;;  %v7767_v35 = vld [vmem:[%s11170_s7 + $0x1e4] ss:$16 sps:$4 sm:$0xff]  }
 0x137   :  { %2673 = vmatpush1.bf16.msra.mxu1 %v7639_v33  ;;  %3658 = vmatprep.subr.bf16.mxu0 %v7737_v37  ;;  %v7687_v33 = vld [vmem:[%s11166_s4 + $0x6a8] ss:$16 sps:$4 sm:$0xff]  }
 0x138   :  { %2674 = vmatprep.subr.bf16.mxu1 %v7644_v34 }
 0x13a   :  { %3659 = vmatpush1.bf16.msra.mxu0 %v7735_v40 }
 0x13b   :  { %2675 = vmatpush1.bf16.msra.mxu1 %v7642_v38  ;;  %3660 = vmatprep.subr.bf16.mxu0 %v7740_v41  ;;  %v7690_v41 = vld [vmem:[%s11166_s4 + $0x6c8] ss:$16 sps:$4 sm:$0xff]  }
 0x13c   :  { %2676 = vmatprep.subr.bf16.mxu1 %v7647_v39 }
 0x13e   :  { %3661 = vmatpush1.bf16.msra.mxu0 %v7738_v45  ;;  %v7695_v45 = vld [vmem:[%s11166_s4 + $0x6ec] ss:$16 sps:$4 sm:$0xff]  }
 0x13f   :  { %2677 = vmatpush1.bf16.msra.mxu1 %v7645_v42  ;;  %3662 = vmatprep.subr.bf16.mxu0 %v7743_v47  ;;  %v7693_v47 = vld [vmem:[%s11166_s4 + $0x6e8] ss:$16 sps:$4 sm:$0xff]  }
 0x140   :  { %2678 = vmatprep.subr.bf16.mxu1 %v7650_v46  ;;  %v7770_v46 = vld [vmem:[%s11170_s7 + $0xc] ss:$16 sps:$4 sm:$0xff]  }
 0x142   :  { %3663 = vmatpush1.bf16.msra.mxu0 %v7741_v53  ;;  %v7696_v53 = vld [vmem:[%s11166_s4 + $0x708] ss:$16 sps:$4 sm:$0xff]  }
 0x143   :  { %2679 = vmatpush1.bf16.msra.mxu1 %v7648_v48  ;;  %3664 = vmatprep.subr.bf16.mxu0 %v7746_v58  ;;  %v7698_v48 = vld [vmem:[%s11166_s4 + $0x70c] ss:$16 sps:$4 sm:$0xff]   ;;  %v7699_v58 = vld [vmem:[%s11166_s4 + $0x728] ss:$16 sps:$4 sm:$0xff]  }
 0x144   :  { %2680 = vmatprep.subr.bf16.mxu1 %v7653_v54  ;;  %v7701_v54 = vld [vmem:[%s11166_s4 + $0x72c] ss:$16 sps:$4 sm:$0xff]  }
 0x146   :  { %3665 = vmatpush1.bf16.msra.mxu0 %v7744_v60  ;;  %v7702_v60 = vld [vmem:[%s11166_s4 + $0x748] ss:$16 sps:$4 sm:$0xff]  }
 0x147   :  { %2681 = vmatpush1.bf16.msra.mxu1 %v7651_v36  ;;  %3666 = vmatprep.subr.bf16.mxu0 %v7749_v50  ;;  %v7704_v36 = vld [vmem:[%s11166_s4 + $0x74c] ss:$16 sps:$4 sm:$0xff]   ;;  %v7705_v50 = vld [vmem:[%s11166_s4 + $0x768] ss:$16 sps:$4 sm:$0xff]  }
 0x148   :  { %2682 = vmatprep.subr.bf16.mxu1 %v7656_v62  ;;  %v7707_v62 = vld [vmem:[%s11166_s4 + $0x76c] ss:$16 sps:$4 sm:$0xff]  }
 0x14a   :  { %3667 = vmatpush1.bf16.msra.mxu0 %v7747_v0  ;;  %v7708_v0 = vld [vmem:[%s11166_s4 + $0x788] ss:$16 sps:$4 sm:$0xff]  }
 0x14b   :  { %2683 = vmatpush1.bf16.msra.mxu1 %v7654_v63  ;;  %3668 = vmatprep.subr.bf16.mxu0 %v7752_v2  ;;  %v7710_v63 = vld [vmem:[%s11166_s4 + $0x78c] ss:$16 sps:$4 sm:$0xff]   ;;  %v7711_v2 = vld [vmem:[%s11166_s4 + $0x7a8] ss:$16 sps:$4 sm:$0xff]  }
 0x14c   :  { %2684 = vmatprep.subr.bf16.mxu1 %v7659_v44  ;;  %v7713_v44 = vld [vmem:[%s11166_s4 + $0x7ac] ss:$16 sps:$4 sm:$0xff]  }
 0x14e   :  { %3669 = vmatpush1.bf16.msra.mxu0 %v7750_v4  ;;  %v7714_v4 = vld [vmem:[%s11166_s4 + $0x7c8] ss:$16 sps:$4 sm:$0xff]  }
 0x14f   :  { %2685 = vmatpush1.bf16.msra.mxu1 %v7657_v3  ;;  %3670 = vmatprep.subr.bf16.mxu0 %v7755_v5  ;;  %v7716_v3 = vld [vmem:[%s11166_s4 + $0x7cc] ss:$16 sps:$4 sm:$0xff]   ;;  %v7717_v5 = vld [vmem:[%s11166_s4 + $0x7e8] ss:$16 sps:$4 sm:$0xff]  }
 0x150   :  { %2686 = vmatprep.subr.bf16.mxu1 %v7662_v61  ;;  %v7719_v61 = vld [vmem:[%s11166_s4 + $0x7ec] ss:$16 sps:$4 sm:$0xff]  }
 0x152   :  { %3671 = vmatpush1.bf16.msra.mxu0 %v7753_v8  ;;  %v7818_v8 = vld [vmem:[%s11170_s7 + $0x204] ss:$16 sps:$4 sm:$0xff]  }
 0x153   :  { %2687 = vmatpush1.bf16.msra.mxu1 %v7660_v6  ;;  %3672 = vmatprep.subr.bf16.mxu0 %v7758_v11  ;;  %v7816_v6 = vld [vmem:[%s11170_s7 + $0x200] ss:$16 sps:$4 sm:$0xff]   ;;  %v7824_v11 = vld [vmem:[%s11170_s7 + $0x224] ss:$16 sps:$4 sm:$0xff]  }
 0x154   :  { %2688 = vmatprep.subr.bf16.mxu1 %v7665_v10  ;;  %v7822_v10 = vld [vmem:[%s11170_s7 + $0x220] ss:$16 sps:$4 sm:$0xff]  }
 0x156   :  { %3673 = vmatpush1.bf16.msra.mxu0 %v7756_v14  ;;  %v7834_v14 = vld [vmem:[%s11170_s7 + $0x260] ss:$16 sps:$4 sm:$0xff]  }
 0x157   :  { %2689 = vmatpush1.bf16.msra.mxu1 %v7663_v12  ;;  %3674 = vmatprep.subr.bf16.mxu0 %v7761_v17  ;;  %v7830_v12 = vld [vmem:[%s11170_s7 + $0x244] ss:$16 sps:$4 sm:$0xff]   ;;  %v7840_v17 = vld [vmem:[%s11170_s7 + $0x280] ss:$16 sps:$4 sm:$0xff]  }
 0x158   :  { %2690 = vmatprep.subr.bf16.mxu1 %v7668_v16  ;;  %v7836_v16 = vld [vmem:[%s11170_s7 + $0x264] ss:$16 sps:$4 sm:$0xff]  }
 0x15a   :  { %3675 = vmatpush1.bf16.msra.mxu0 %v7759_v20  ;;  %v7846_v20 = vld [vmem:[%s11170_s7 + $0x2a0] ss:$16 sps:$4 sm:$0xff]  }
 0x15b   :  { %2691 = vmatpush1.bf16.msra.mxu1 %v7666_v19  ;;  %3676 = vmatprep.subr.bf16.mxu0 %v7764_v21  ;;  %v7842_v19 = vld [vmem:[%s11170_s7 + $0x284] ss:$16 sps:$4 sm:$0xff]   ;;  %v7852_v21 = vld [vmem:[%s11170_s7 + $0x2c0] ss:$16 sps:$4 sm:$0xff]  }
 0x15c   :  { %2692 = vmatprep.subr.bf16.mxu1 %v7671_v57  ;;  %v7848_v57 = vld [vmem:[%s11170_s7 + $0x2a4] ss:$16 sps:$4 sm:$0xff]  }
 0x15e   :  { %3677 = vmatpush1.bf16.msra.mxu0 %v7762_v49  ;;  %v7858_v49 = vld [vmem:[%s11170_s7 + $0x2e0] ss:$16 sps:$4 sm:$0xff]  }
 0x15f   :  { %2693 = vmatpush1.bf16.msra.mxu1 %v7669_v22  ;;  %3678 = vmatprep.subr.bf16.mxu0 %v7767_v35  ;;  %v7854_v22 = vld [vmem:[%s11170_s7 + $0x2c4] ss:$16 sps:$4 sm:$0xff]  }
 0x160   :  { %2703 = vmatprep.subr.bf16.mxu1 %v7674_v23  ;;  %v7860_v23 = vld [vmem:[%s11170_s7 + $0x2e4] ss:$16 sps:$4 sm:$0xff]  }
 0x162   :  { %2695 = vmatmul.mubr.bf16.vlgmr.msra.gmra.mrb[8].mxu1 %v9231_v59  ;;  %v7683_v59 = vld [vmem:[%s11166_s4 + $0x66c] ss:$16 sps:$4 sm:$0xff]   ;;  %3679 = vmatpush1.bf16.msra.mxu0 %v7765_v56 }
 0x163   :  { %2704 = vmatpush1.bf16.msra.mxu1 %v7672_v7  ;;  %2735 = vmatprep.mubr.bf16.mxu1 %v9241_v15  ;;  %v7681_v15 = vld [vmem:[%s11166_s4 + $0x668] ss:$16 sps:$4 sm:$0xff]   ;;  %v7864_v7 = vld [vmem:[%s11170_s7 + $0x300] ss:$16 sps:$4 sm:$0xff]  }
 0x164   :  { %2705 = vmatprep.subr.bf16.mxu1 %v7677_v55  ;;  %3730 = vmatprep.subr.bf16.mxu0 %v7770_v46  ;;  %v7866_v55 = vld [vmem:[%s11170_s7 + $0x304] ss:$16 sps:$4 sm:$0xff]  }
 0x167   :  { %2706 = vmatpush1.bf16.msra.mxu1 %v7675_v24  ;;  %v7870_v24 = vld [vmem:[%s11170_s7 + $0x320] ss:$16 sps:$4 sm:$0xff]  }
 0x168   :  { %2707 = vmatprep.subr.bf16.mxu1 %v7680_v25  ;;  %v7872_v25 = vld [vmem:[%s11170_s7 + $0x324] ss:$16 sps:$4 sm:$0xff]  }
 0x16b   :  { %2708 = vmatpush1.bf16.msra.mxu1 %v7678_v26  ;;  %v7876_v26 = vld [vmem:[%s11170_s7 + $0x340] ss:$16 sps:$4 sm:$0xff]  }
 0x16c   :  { %2709 = vmatprep.subr.bf16.mxu1 %v7683_v59  ;;  %v7878_v59 = vld [vmem:[%s11170_s7 + $0x344] ss:$16 sps:$4 sm:$0xff]  }
 0x16f   :  { %2710 = vmatpush1.bf16.msra.mxu1 %v7681_v15  ;;  %v7882_v15 = vld [vmem:[%s11170_s7 + $0x360] ss:$16 sps:$4 sm:$0xff]  }
 0x170   :  { %2711 = vmatprep.subr.bf16.mxu1 %v7686_v1  ;;  %v7884_v1 = vld [vmem:[%s11170_s7 + $0x364] ss:$16 sps:$4 sm:$0xff]  }
 0x173   :  { %2712 = vmatpush1.bf16.msra.mxu1 %v7684_v28  ;;  %v7888_v28 = vld [vmem:[%s11170_s7 + $0x380] ss:$16 sps:$4 sm:$0xff]  }
 0x174   :  { %2713 = vmatprep.subr.bf16.mxu1 %v7689_v30  ;;  %v7890_v30 = vld [vmem:[%s11170_s7 + $0x384] ss:$16 sps:$4 sm:$0xff]  }
 0x175   :  { %v819_v34 = vpop.f32.mrb[4].mxu1 }
 0x176   :  { %v9695_v37 = vadd.f32 %v819_v34, %v162_v31  ;;  %v821_v38 = vpop.f32.mrb[5].mxu1  ;;  %v7894_v31 = vld [vmem:[%s11170_s7 + $0x3a0] ss:$16 sps:$4 sm:$0xff]   ;;  %v7902_v34 = vld [vmem:[%s11170_s7 + $0x3c4] ss:$16 sps:$4 sm:$0xff]  }
 0x177   :  { %v9700_v39 = vadd.f32 %v821_v38, %v166_v32  ;;  %v823_v40 = vpop.f32.mrb[6].mxu1  ;;  %2714 = vmatpush1.bf16.msra.mxu1 %v7687_v33  ;;  %v7896_v32 = vld [vmem:[%s11170_s7 + $0x3a4] ss:$16 sps:$4 sm:$0xff]   ;;  %v9850_v33 = vld [vmem:[%s11172_s5] sm:$0xf] }
 0x178   :  { %v824_v42 = vpop.f32.mrb[7].mxu1  ;;  %2715 = vmatprep.subr.bf16.mxu1 %v7692_v43  ;;  %v7900_v43 = vld [vmem:[%s11170_s7 + $0x3c0] ss:$16 sps:$4 sm:$0xff]   ;;  %v1091_v35 = vrot.slane %v9850_v33, %v9386_v51  ;;  %v1095_v38 = vrot.slane %v9850_v33, %v9389_v52 }
 0x179   :  { %v7908_v42 = vld [vmem:[%s11170_s7 + $0x3e4] ss:$16 sps:$4 sm:$0xff]  }
 0x17b   :  { %2716 = vmatpush1.bf16.msra.mxu1 %v7690_v41 }
 0x17c   :  { %2717 = vmatprep.subr.bf16.mxu1 %v7695_v45 }
 0x17f   :  { %2718 = vmatpush1.bf16.msra.mxu1 %v7693_v47  ;;  %v7906_v47 = vld [vmem:[%s11170_s7 + $0x3e0] ss:$16 sps:$4 sm:$0xff]  }
 0x180   :  { %2719 = vmatprep.subr.bf16.mxu1 %v7698_v48 }
 0x183   :  { %2720 = vmatpush1.bf16.msra.mxu1 %v7696_v53 }
 0x184   :  { %2721 = vmatprep.subr.bf16.mxu1 %v7701_v54  ;;  %v7768_v54 = vld [vmem:[%s11170_s7 + $0x8] ss:$16 sps:$4 sm:$0xff]  }
 0x187   :  { %2722 = vmatpush1.bf16.msra.mxu1 %v7699_v58 }
 0x188   :  { %2723 = vmatprep.subr.bf16.mxu1 %v7704_v36  ;;  %v7773_v36 = vld [vmem:[%s11170_s7 + $0x2c] ss:$16 sps:$4 sm:$0xff]  }
 0x18b   :  { %2724 = vmatpush1.bf16.msra.mxu1 %v7702_v60  ;;  %v7914_v60 = vld [vmem:[%s11170_s7 + $0x20c] ss:$16 sps:$4 sm:$0xff]  }
 0x18c   :  { %2725 = vmatprep.subr.bf16.mxu1 %v7707_v62  ;;  %v7771_v62 = vld [vmem:[%s11170_s7 + $0x28] ss:$16 sps:$4 sm:$0xff]  }
 0x18f   :  { %2726 = vmatpush1.bf16.msra.mxu1 %v7705_v50  ;;  %v7776_v50 = vld [vmem:[%s11170_s7 + $0x4c] ss:$16 sps:$4 sm:$0xff]  }
 0x190   :  { %2727 = vmatprep.subr.bf16.mxu1 %v7710_v63  ;;  %v7774_v63 = vld [vmem:[%s11170_s7 + $0x48] ss:$16 sps:$4 sm:$0xff]  }
 0x193   :  { %2728 = vmatpush1.bf16.msra.mxu1 %v7708_v0  ;;  %v7779_v0 = vld [vmem:[%s11170_s7 + $0x6c] ss:$16 sps:$4 sm:$0xff]  }
 0x194   :  { %2729 = vmatprep.subr.bf16.mxu1 %v7713_v44  ;;  %v7777_v44 = vld [vmem:[%s11170_s7 + $0x68] ss:$16 sps:$4 sm:$0xff]  }
 0x197   :  { %2730 = vmatpush1.bf16.msra.mxu1 %v7711_v2  ;;  %v7782_v2 = vld [vmem:[%s11170_s7 + $0x8c] ss:$16 sps:$4 sm:$0xff]  }
 0x198   :  { %2731 = vmatprep.subr.bf16.mxu1 %v7716_v3  ;;  %v7780_v3 = vld [vmem:[%s11170_s7 + $0x88] ss:$16 sps:$4 sm:$0xff]  }
 0x19b   :  { %2732 = vmatpush1.bf16.msra.mxu1 %v7714_v4  ;;  %v7785_v4 = vld [vmem:[%s11170_s7 + $0xac] ss:$16 sps:$4 sm:$0xff]  }
 0x19c   :  { %2733 = vmatprep.subr.bf16.mxu1 %v7719_v61  ;;  %v7783_v61 = vld [vmem:[%s11170_s7 + $0xa8] ss:$16 sps:$4 sm:$0xff]  }
 0x19f   :  { %2734 = vmatpush1.bf16.msra.mxu1 %v7717_v5  ;;  %v7788_v5 = vld [vmem:[%s11170_s7 + $0xcc] ss:$16 sps:$4 sm:$0xff]  }
 0x1a0   :  { %3689 = vmatprep.subr.bf16.mxu1 %v7818_v8  ;;  %v7791_v8 = vld [vmem:[%s11170_s7 + $0xec] ss:$16 sps:$4 sm:$0xff]  }
 0x1a2   :  { %2736 = vmatmul.mubr.bf16.vlgmr.msra.gmra.mrb[8].mxu1 %v9453_v18  ;;  %v7828_v18 = vld [vmem:[%s11170_s7 + $0x240] ss:$16 sps:$4 sm:$0xff]  }
 0x1a3   :  { %3690 = vmatpush1.bf16.msra.mxu1 %v7816_v6  ;;  %v7786_v6 = vld [vmem:[%s11170_s7 + $0xc8] ss:$16 sps:$4 sm:$0xff]  }
 0x1a4   :  { %3691 = vmatprep.subr.bf16.mxu1 %v7824_v11  ;;  %v7794_v11 = vld [vmem:[%s11170_s7 + $0x10c] ss:$16 sps:$4 sm:$0xff]  }
 0x1a7   :  { %3692 = vmatpush1.bf16.msra.mxu1 %v7822_v10  ;;  %v7789_v10 = vld [vmem:[%s11170_s7 + $0xe8] ss:$16 sps:$4 sm:$0xff]  }
 0x1a8   :  { %3693 = vmatprep.subr.bf16.mxu1 %v7830_v12  ;;  %v7797_v12 = vld [vmem:[%s11170_s7 + $0x12c] ss:$16 sps:$4 sm:$0xff]  }
 0x1ab   :  { %3694 = vmatpush1.bf16.msra.mxu1 %v7828_v18  ;;  %v7792_v18 = vld [vmem:[%s11170_s7 + $0x108] ss:$16 sps:$4 sm:$0xff]  }
 0x1ac   :  { %3695 = vmatprep.subr.bf16.mxu1 %v7836_v16  ;;  %v7800_v16 = vld [vmem:[%s11170_s7 + $0x14c] ss:$16 sps:$4 sm:$0xff]  }
 0x1af   :  { %3696 = vmatpush1.bf16.msra.mxu1 %v7834_v14  ;;  %v7795_v14 = vld [vmem:[%s11170_s7 + $0x128] ss:$16 sps:$4 sm:$0xff]  }
 0x1b0   :  { %3697 = vmatprep.subr.bf16.mxu1 %v7842_v19  ;;  %v7803_v19 = vld [vmem:[%s11170_s7 + $0x16c] ss:$16 sps:$4 sm:$0xff]  }
 0x1b3   :  { %3698 = vmatpush1.bf16.msra.mxu1 %v7840_v17  ;;  %v7798_v17 = vld [vmem:[%s11170_s7 + $0x148] ss:$16 sps:$4 sm:$0xff]  }
 0x1b4   :  { %3699 = vmatprep.subr.bf16.mxu1 %v7848_v57  ;;  %v7806_v57 = vld [vmem:[%s11170_s7 + $0x18c] ss:$16 sps:$4 sm:$0xff]  }
 0x1b7   :  { %3700 = vmatpush1.bf16.msra.mxu1 %v7846_v20  ;;  %v7801_v20 = vld [vmem:[%s11170_s7 + $0x168] ss:$16 sps:$4 sm:$0xff]  }
 0x1b8   :  { %3701 = vmatprep.subr.bf16.mxu1 %v7854_v22  ;;  %v7809_v22 = vld [vmem:[%s11170_s7 + $0x1ac] ss:$16 sps:$4 sm:$0xff]  }
 0x1bb   :  { %3702 = vmatpush1.bf16.msra.mxu1 %v7852_v21  ;;  %v7804_v21 = vld [vmem:[%s11170_s7 + $0x188] ss:$16 sps:$4 sm:$0xff]  }
 0x1bc   :  { %3703 = vmatprep.subr.bf16.mxu1 %v7860_v23  ;;  %v7812_v23 = vld [vmem:[%s11170_s7 + $0x1cc] ss:$16 sps:$4 sm:$0xff]  }
 0x1bf   :  { %3704 = vmatpush1.bf16.msra.mxu1 %v7858_v49  ;;  %v7807_v49 = vld [vmem:[%s11170_s7 + $0x1a8] ss:$16 sps:$4 sm:$0xff]  }
 0x1c0   :  { %3705 = vmatprep.subr.bf16.mxu1 %v7866_v55  ;;  %v7815_v55 = vld [vmem:[%s11170_s7 + $0x1ec] ss:$16 sps:$4 sm:$0xff]  }
 0x1c3   :  { %3706 = vmatpush1.bf16.msra.mxu1 %v7864_v7  ;;  %v7810_v7 = vld [vmem:[%s11170_s7 + $0x1c8] ss:$16 sps:$4 sm:$0xff]  }
 0x1c4   :  { %3707 = vmatprep.subr.bf16.mxu1 %v7872_v25  ;;  %v7821_v25 = vld [vmem:[%s11171_s6 + $0x4] ss:$16 sps:$4 sm:$0xff]  }
 0x1c7   :  { %3708 = vmatpush1.bf16.msra.mxu1 %v7870_v24  ;;  %v7813_v24 = vld [vmem:[%s11170_s7 + $0x1e8] ss:$16 sps:$4 sm:$0xff]  }
 0x1c8   :  { %3709 = vmatprep.subr.bf16.mxu1 %v7878_v59  ;;  %v7827_v59 = vld [vmem:[%s11171_s6 + $0x24] ss:$16 sps:$4 sm:$0xff]  }
 0x1cb   :  { %3710 = vmatpush1.bf16.msra.mxu1 %v7876_v26  ;;  %v7819_v26 = vld [vmem:[%s11171_s6] ss:$16 sps:$4 sm:$0xff]  }
 0x1cc   :  { %3711 = vmatprep.subr.bf16.mxu1 %v7884_v1  ;;  %v7825_v1 = vld [vmem:[%s11171_s6 + $0x20] ss:$16 sps:$4 sm:$0xff]  }
 0x1cf   :  { %3712 = vmatpush1.bf16.msra.mxu1 %v7882_v15  ;;  %v9978_v15 = vpack.c.bf16 %v9440_v13, %v9440_v13  ;;  %v7831_v13 = vld [vmem:[%s11171_s6 + $0x40] ss:$16 sps:$4 sm:$0xff]  }
 0x1d0   :  { %3713 = vmatprep.subr.bf16.mxu1 %v7890_v30  ;;  %v7839_v30 = vld [vmem:[%s11171_s6 + $0x64] ss:$16 sps:$4 sm:$0xff]  }
 0x1d3   :  { %3714 = vmatpush1.bf16.msra.mxu1 %v7888_v28  ;;  %v7833_v28 = vld [vmem:[%s11171_s6 + $0x44] ss:$16 sps:$4 sm:$0xff]  }
 0x1d4   :  { %3715 = vmatprep.subr.bf16.mxu1 %v7896_v32  ;;  %v7845_v32 = vld [vmem:[%s11171_s6 + $0x84] ss:$16 sps:$4 sm:$0xff]  }
 0x1d7   :  { %3716 = vmatpush1.bf16.msra.mxu1 %v7894_v31  ;;  %v7837_v31 = vld [vmem:[%s11171_s6 + $0x60] ss:$16 sps:$4 sm:$0xff]  }
 0x1d8   :  { %3717 = vmatprep.subr.bf16.mxu1 %v7902_v34  ;;  %v7851_v34 = vld [vmem:[%s11171_s6 + $0xa4] ss:$16 sps:$4 sm:$0xff]  }
 0x1db   :  { %3718 = vmatpush1.bf16.msra.mxu1 %v7900_v43  ;;  %v7843_v43 = vld [vmem:[%s11171_s6 + $0x80] ss:$16 sps:$4 sm:$0xff]  }
 0x1dc   :  { %3719 = vmatprep.subr.bf16.mxu1 %v7908_v42  ;;  %v7869_v42 = vld [vmem:[%s11171_s6 + $0x104] ss:$16 sps:$4 sm:$0xff]  }
 0x1df   :  { %3720 = vmatpush1.bf16.msra.mxu1 %v7906_v47  ;;  %v7873_v47 = vld [vmem:[%s11171_s6 + $0x120] ss:$16 sps:$4 sm:$0xff]  }
 0x1e0   :  { %3771 = vmatprep.subr.bf16.mxu1 %v7914_v60  ;;  %v7891_v60 = vld [vmem:[%s11171_s6 + $0x180] ss:$16 sps:$4 sm:$0xff]  }
 0x1f6   :  { %v2573_v56 = vpop.f32.mrb[4].mxu0 }
 0x1f7   :  { %v7130_v40 = vadd.f32 %v2573_v56, %v1091_v35  ;;  %v2575_v41 = vpop.f32.mrb[5].mxu0  ;;  %v7849_v35 = vld [vmem:[%s11171_s6 + $0xa0] ss:$16 sps:$4 sm:$0xff]  }
 0x1f8   :  { %v7131_v45 = vadd.f32 %v2575_v41, %v1095_v38  ;;  %v2577_v46 = vpop.f32.mrb[6].mxu0  ;;  %v7857_v38 = vld [vmem:[%s11171_s6 + $0xc4] ss:$16 sps:$4 sm:$0xff]   ;;  %v7855_v56 = vld [vmem:[%s11171_s6 + $0xc0] ss:$16 sps:$4 sm:$0xff]  }
 0x1f9   :  { %v2578_v48 = vpop.f32.mrb[7].mxu0  ;;  %v9871_v58 = vpack.c.bf16 %v7130_v40, %v7130_v40  ;;  %v7863_v40 = vld [vmem:[%s11171_s6 + $0xe4] ss:$16 sps:$4 sm:$0xff]   ;;  %v7861_v41 = vld [vmem:[%s11171_s6 + $0xe0] ss:$16 sps:$4 sm:$0xff]  }
 0x1fa   :  { %v2877_v53 = vpack.c.bf16 %v7131_v45, %v7131_v45  ;;  %v7867_v45 = vld [vmem:[%s11171_s6 + $0x100] ss:$16 sps:$4 sm:$0xff]   ;;  %v7875_v46 = vld [vmem:[%s11171_s6 + $0x124] ss:$16 sps:$4 sm:$0xff]  }
 0x1fb   :  { %v7881_v48 = vld [vmem:[%s11171_s6 + $0x144] ss:$16 sps:$4 sm:$0xff]  }
 0x1fc   :  { %3680 = vmatprep.mubr.bf16.mxu0 %v2877_v53 }
 0x1fd   :  { %3681 = vmatmul.mubr.bf16.vlgmr.msra.gmra.mrb[8].mxu0 %v9871_v58 }
 0x1fe   :  { %3731 = vmatpush1.bf16.msra.mxu0 %v7768_v54  ;;  %3762 = vmatprep.mubr.bf16.mxu0 %v2877_v53  ;;  %v7879_v53 = vld [vmem:[%s11171_s6 + $0x140] ss:$16 sps:$4 sm:$0xff]   ;;  %v7887_v54 = vld [vmem:[%s11171_s6 + $0x164] ss:$16 sps:$4 sm:$0xff]  }
 0x1ff   :  { %3732 = vmatprep.subr.bf16.mxu0 %v7773_v36  ;;  %v7893_v36 = vld [vmem:[%s11171_s6 + $0x184] ss:$16 sps:$4 sm:$0xff]  }
 0x202   :  { %3733 = vmatpush1.bf16.msra.mxu0 %v7771_v62  ;;  %v7899_v62 = vld [vmem:[%s11171_s6 + $0x1a4] ss:$16 sps:$4 sm:$0xff]  }
 0x203   :  { %3734 = vmatprep.subr.bf16.mxu0 %v7776_v50  ;;  %v7897_v50 = vld [vmem:[%s11171_s6 + $0x1a0] ss:$16 sps:$4 sm:$0xff]  }
 0x206   :  { %3735 = vmatpush1.bf16.msra.mxu0 %v7774_v63  ;;  %v7905_v63 = vld [vmem:[%s11171_s6 + $0x1c4] ss:$16 sps:$4 sm:$0xff]  }
 0x207   :  { %3736 = vmatprep.subr.bf16.mxu0 %v7779_v0  ;;  %v7903_v0 = vld [vmem:[%s11171_s6 + $0x1c0] ss:$16 sps:$4 sm:$0xff]  }
 0x20a   :  { %3737 = vmatpush1.bf16.msra.mxu0 %v7777_v44  ;;  %v1099_v44 = vrot.slane %v9850_v33, %v9671_v27 }
 0x20b   :  { %3738 = vmatprep.subr.bf16.mxu0 %v7782_v2  ;;  %v7911_v2 = vld [vmem:[%s11171_s6 + $0x1e4] ss:$16 sps:$4 sm:$0xff]  }
 0x20e   :  { %3739 = vmatpush1.bf16.msra.mxu0 %v7780_v3  ;;  %v1103_v3 = vrot.slane %v9850_v33, %v9677_v29  ;;  %v7912_v33 = vld [vmem:[%s11170_s7 + $0x208] ss:$16 sps:$4 sm:$0xff]  }
 0x20f   :  { %3740 = vmatprep.subr.bf16.mxu0 %v7785_v4 }
 0x212   :  { %3741 = vmatpush1.bf16.msra.mxu0 %v7783_v61  ;;  %v7909_v61 = vld [vmem:[%s11171_s6 + $0x1e0] ss:$16 sps:$4 sm:$0xff]  }
 0x213   :  { %3742 = vmatprep.subr.bf16.mxu0 %v7788_v5 }
 0x216   :  { %3743 = vmatpush1.bf16.msra.mxu0 %v7786_v6 }
 0x217   :  { %3744 = vmatprep.subr.bf16.mxu0 %v7791_v8  ;;  %v7917_v8 = vld [vmem:[%s11171_s6 + $0xc] ss:$16 sps:$4 sm:$0xff]  }
 0x21a   :  { %3745 = vmatpush1.bf16.msra.mxu0 %v7789_v10 }
 0x21b   :  { %3746 = vmatprep.subr.bf16.mxu0 %v7794_v11 }
 0x21e   :  { %3747 = vmatpush1.bf16.msra.mxu0 %v7792_v18 }
 0x21f   :  { %3748 = vmatprep.subr.bf16.mxu0 %v7797_v12 }
 0x222   :  { %3749 = vmatpush1.bf16.msra.mxu0 %v7795_v14  ;;  %v7915_v14 = vld [vmem:[%s11171_s6 + $0x8] ss:$16 sps:$4 sm:$0xff]  }
 0x223   :  { %3750 = vmatprep.subr.bf16.mxu0 %v7800_v16  ;;  %v10084_v16 = vpack.c.bf16 %v9431_v9, %v9431_v9  ;;  %v7918_v9 = vld [vmem:[%s11170_s7 + $0x228] ss:$16 sps:$4 sm:$0xff]  }
 0x226   :  { %3751 = vmatpush1.bf16.msra.mxu0 %v7798_v17 }
 0x227   :  { %3752 = vmatprep.subr.bf16.mxu0 %v7803_v19  ;;  %v7920_v19 = vld [vmem:[%s11170_s7 + $0x22c] ss:$16 sps:$4 sm:$0xff]  }
 0x22a   :  { %3753 = vmatpush1.bf16.msra.mxu0 %v7801_v20  ;;  %v7923_v20 = vld [vmem:[%s11171_s6 + $0x2c] ss:$16 sps:$4 sm:$0xff]  }
 0x22b   :  { %3754 = vmatprep.subr.bf16.mxu0 %v7806_v57  ;;  %v7921_v57 = vld [vmem:[%s11171_s6 + $0x28] ss:$16 sps:$4 sm:$0xff]  }
 0x22e   :  { %3755 = vmatpush1.bf16.msra.mxu0 %v7804_v21  ;;  %v7926_v21 = vld [vmem:[%s11170_s7 + $0x24c] ss:$16 sps:$4 sm:$0xff]  }
 0x22f   :  { %3756 = vmatprep.subr.bf16.mxu0 %v7809_v22  ;;  %v7929_v22 = vld [vmem:[%s11171_s6 + $0x4c] ss:$16 sps:$4 sm:$0xff]  }
 0x232   :  { %3757 = vmatpush1.bf16.msra.mxu0 %v7807_v49  ;;  %v7924_v49 = vld [vmem:[%s11170_s7 + $0x248] ss:$16 sps:$4 sm:$0xff]  }
 0x233   :  { %3758 = vmatprep.subr.bf16.mxu0 %v7812_v23  ;;  %v7927_v23 = vld [vmem:[%s11171_s6 + $0x48] ss:$16 sps:$4 sm:$0xff]  }
 0x236   :  { %3759 = vmatpush1.bf16.msra.mxu0 %v7810_v7  ;;  %v7932_v7 = vld [vmem:[%s11170_s7 + $0x26c] ss:$16 sps:$4 sm:$0xff]  }
 0x237   :  { %3760 = vmatprep.subr.bf16.mxu0 %v7815_v55  ;;  %v7935_v55 = vld [vmem:[%s11171_s6 + $0x6c] ss:$16 sps:$4 sm:$0xff]  }
 0x23a   :  { %3761 = vmatpush1.bf16.msra.mxu0 %v7813_v24  ;;  %v7930_v24 = vld [vmem:[%s11170_s7 + $0x268] ss:$16 sps:$4 sm:$0xff]  }
 0x23b   :  { %4452 = vmatprep.subr.bf16.mxu0 %v7821_v25  ;;  %v7933_v25 = vld [vmem:[%s11171_s6 + $0x68] ss:$16 sps:$4 sm:$0xff]  }
 0x23d   :  { %3763 = vmatmul.mubr.bf16.vlgmr.msra.gmra.mrb[12].mxu0 %v9871_v58  ;;  %v7885_v58 = vld [vmem:[%s11171_s6 + $0x160] ss:$16 sps:$4 sm:$0xff]  }
 0x23e   :  { %4453 = vmatpush1.bf16.msra.mxu0 %v7819_v26  ;;  %4484 = vmatprep.mubr.bf16.mxu0 %v9978_v15  ;;  %v7938_v26 = vld [vmem:[%s11170_s7 + $0x28c] ss:$16 sps:$4 sm:$0xff]  }
 0x23f   :  { %4454 = vmatprep.subr.bf16.mxu0 %v7827_v59  ;;  %v7941_v59 = vld [vmem:[%s11171_s6 + $0x8c] ss:$16 sps:$4 sm:$0xff]  }
 0x242   :  { %4455 = vmatpush1.bf16.msra.mxu0 %v7825_v1  ;;  %v7939_v1 = vld [vmem:[%s11171_s6 + $0x88] ss:$16 sps:$4 sm:$0xff]  }
 0x243   :  { %4456 = vmatprep.subr.bf16.mxu0 %v7833_v28  ;;  %v7944_v28 = vld [vmem:[%s11170_s7 + $0x2ac] ss:$16 sps:$4 sm:$0xff]  }
 0x246   :  { %4457 = vmatpush1.bf16.msra.mxu0 %v7831_v13  ;;  %v7947_v13 = vld [vmem:[%s11171_s6 + $0xac] ss:$16 sps:$4 sm:$0xff]  }
 0x247   :  { %4458 = vmatprep.subr.bf16.mxu0 %v7839_v30  ;;  %v7942_v30 = vld [vmem:[%s11170_s7 + $0x2a8] ss:$16 sps:$4 sm:$0xff]  }
 0x24a   :  { %4459 = vmatpush1.bf16.msra.mxu0 %v7837_v31  ;;  %v7945_v31 = vld [vmem:[%s11171_s6 + $0xa8] ss:$16 sps:$4 sm:$0xff]  }
 0x24b   :  { %4460 = vmatprep.subr.bf16.mxu0 %v7845_v32  ;;  %v7950_v32 = vld [vmem:[%s11170_s7 + $0x2cc] ss:$16 sps:$4 sm:$0xff]  }
 0x24e   :  { %4461 = vmatpush1.bf16.msra.mxu0 %v7843_v43  ;;  %v7953_v43 = vld [vmem:[%s11171_s6 + $0xcc] ss:$16 sps:$4 sm:$0xff]  }
 0x24f   :  { %4462 = vmatprep.subr.bf16.mxu0 %v7851_v34  ;;  %v7948_v34 = vld [vmem:[%s11170_s7 + $0x2c8] ss:$16 sps:$4 sm:$0xff]  }
 0x252   :  { %4463 = vmatpush1.bf16.msra.mxu0 %v7849_v35  ;;  %v7951_v35 = vld [vmem:[%s11171_s6 + $0xc8] ss:$16 sps:$4 sm:$0xff]  }
 0x253   :  { %4464 = vmatprep.subr.bf16.mxu0 %v7857_v38  ;;  %v7956_v38 = vld [vmem:[%s11170_s7 + $0x2ec] ss:$16 sps:$4 sm:$0xff]  }
 0x256   :  { %4465 = vmatpush1.bf16.msra.mxu0 %v7855_v56  ;;  %v7959_v56 = vld [vmem:[%s11171_s6 + $0xec] ss:$16 sps:$4 sm:$0xff]  }
 0x257   :  { %4466 = vmatprep.subr.bf16.mxu0 %v7863_v40  ;;  %v7954_v40 = vld [vmem:[%s11170_s7 + $0x2e8] ss:$16 sps:$4 sm:$0xff]  }
 0x25a   :  { %4467 = vmatpush1.bf16.msra.mxu0 %v7861_v41  ;;  %v7957_v41 = vld [vmem:[%s11171_s6 + $0xe8] ss:$16 sps:$4 sm:$0xff]  }
 0x25b   :  { %4468 = vmatprep.subr.bf16.mxu0 %v7869_v42  ;;  %v7962_v42 = vld [vmem:[%s11170_s7 + $0x30c] ss:$16 sps:$4 sm:$0xff]  }
 0x25e   :  { %4469 = vmatpush1.bf16.msra.mxu0 %v7867_v45  ;;  %v7965_v45 = vld [vmem:[%s11171_s6 + $0x10c] ss:$16 sps:$4 sm:$0xff]  }
 0x25f   :  { %4470 = vmatprep.subr.bf16.mxu0 %v7875_v46  ;;  %v7960_v46 = vld [vmem:[%s11170_s7 + $0x308] ss:$16 sps:$4 sm:$0xff]  }
 0x262   :  { %4471 = vmatpush1.bf16.msra.mxu0 %v7873_v47  ;;  %v7963_v47 = vld [vmem:[%s11171_s6 + $0x108] ss:$16 sps:$4 sm:$0xff]  }
 0x263   :  { %4472 = vmatprep.subr.bf16.mxu0 %v7881_v48  ;;  %v7968_v48 = vld [vmem:[%s11170_s7 + $0x32c] ss:$16 sps:$4 sm:$0xff]  }
 0x266   :  { %4473 = vmatpush1.bf16.msra.mxu0 %v7879_v53  ;;  %v7971_v53 = vld [vmem:[%s11171_s6 + $0x12c] ss:$16 sps:$4 sm:$0xff]  }
 0x267   :  { %4474 = vmatprep.subr.bf16.mxu0 %v7887_v54  ;;  %v7966_v54 = vld [vmem:[%s11170_s7 + $0x328] ss:$16 sps:$4 sm:$0xff]  }
 0x26a   :  { %4475 = vmatpush1.bf16.msra.mxu0 %v7885_v58  ;;  %v7969_v58 = vld [vmem:[%s11171_s6 + $0x128] ss:$16 sps:$4 sm:$0xff]  }
 0x26b   :  { %4476 = vmatprep.subr.bf16.mxu0 %v7893_v36  ;;  %v7974_v36 = vld [vmem:[%s11170_s7 + $0x34c] ss:$16 sps:$4 sm:$0xff]  }
 0x26e   :  { %4477 = vmatpush1.bf16.msra.mxu0 %v7891_v60  ;;  %v7977_v60 = vld [vmem:[%s11171_s6 + $0x14c] ss:$16 sps:$4 sm:$0xff]  }
 0x26f   :  { %4478 = vmatprep.subr.bf16.mxu0 %v7899_v62  ;;  %v7972_v62 = vld [vmem:[%s11170_s7 + $0x348] ss:$16 sps:$4 sm:$0xff]  }
 0x272   :  { %4479 = vmatpush1.bf16.msra.mxu0 %v7897_v50  ;;  %v7975_v50 = vld [vmem:[%s11171_s6 + $0x148] ss:$16 sps:$4 sm:$0xff]  }
 0x273   :  { %4480 = vmatprep.subr.bf16.mxu0 %v7905_v63  ;;  %v7980_v63 = vld [vmem:[%s11170_s7 + $0x36c] ss:$16 sps:$4 sm:$0xff]  }
 0x275   :  { %v2737_v4 = vpop.f32.mrb[8].mxu1 }
 0x276   :  { %4481 = vmatpush1.bf16.msra.mxu0 %v7903_v0  ;;  %v7132_v5 = vadd.f32 %v2737_v4, %v1099_v44  ;;  %v2739_v6 = vpop.f32.mrb[9].mxu1  ;;  %v7983_v0 = vld [vmem:[%s11171_s6 + $0x16c] ss:$16 sps:$4 sm:$0xff]   ;;  %v7978_v44 = vld [vmem:[%s11170_s7 + $0x368] ss:$16 sps:$4 sm:$0xff]  }
 0x277   :  { %4482 = vmatprep.subr.bf16.mxu0 %v7911_v2  ;;  %v7133_v10 = vadd.f32 %v2739_v6, %v1103_v3  ;;  %v2741_v11 = vpop.f32.mrb[10].mxu1  ;;  %v7981_v2 = vld [vmem:[%s11171_s6 + $0x168] ss:$16 sps:$4 sm:$0xff]   ;;  %v7986_v3 = vld [vmem:[%s11170_s7 + $0x38c] ss:$16 sps:$4 sm:$0xff]  }
 0x278   :  { %v2742_v18 = vpop.f32.mrb[11].mxu1  ;;  %v10086_v17 = vpack.c.bf16 %v7132_v5, %v7132_v5  ;;  %v7989_v4 = vld [vmem:[%s11171_s6 + $0x18c] ss:$16 sps:$4 sm:$0xff]   ;;  %v7987_v5 = vld [vmem:[%s11171_s6 + $0x188] ss:$16 sps:$4 sm:$0xff]  }
 0x279   :  { %v2879_v12 = vpack.c.bf16 %v7133_v10, %v7133_v10  ;;  %v7992_v6 = vld [vmem:[%s11170_s7 + $0x3ac] ss:$16 sps:$4 sm:$0xff]   ;;  %v7990_v10 = vld [vmem:[%s11170_s7 + $0x3a8] ss:$16 sps:$4 sm:$0xff]  }
 0x27a   :  { %4483 = vmatpush1.bf16.msra.mxu0 %v7909_v61  ;;  %v7984_v61 = vld [vmem:[%s11170_s7 + $0x388] ss:$16 sps:$4 sm:$0xff]   ;;  %v7998_v18 = vld [vmem:[%s11170_s7 + $0x3cc] ss:$16 sps:$4 sm:$0xff]  }
 0x27b   :  { %4534 = vmatprep.subr.bf16.mxu0 %v7917_v8  ;;  %3721 = vmatprep.mubr.bf16.mxu1 %v2879_v12  ;;  %v7995_v8 = vld [vmem:[%s11171_s6 + $0x1ac] ss:$16 sps:$4 sm:$0xff]   ;;  %v7993_v11 = vld [vmem:[%s11171_s6 + $0x1a8] ss:$16 sps:$4 sm:$0xff]  }
 0x27c   :  { %3722 = vmatmul.mubr.bf16.vlgmr.msra.gmra.mrb[12].mxu1 %v10086_v17 }
 0x27d   :  { %4485 = vmatmul.mubr.bf16.vlgmr.msra.gmra.mrb[16].mxu0 %v10084_v16  ;;  %3772 = vmatpush1.bf16.msra.mxu1 %v7912_v33  ;;  %v7996_v33 = vld [vmem:[%s11170_s7 + $0x3c8] ss:$16 sps:$4 sm:$0xff]  }
 0x27e   :  { %4535 = vmatpush1.bf16.msra.mxu0 %v7915_v14  ;;  %4566 = vmatprep.mubr.bf16.mxu0 %v9978_v15  ;;  %v7936_v15 = vld [vmem:[%s11170_s7 + $0x288] ss:$16 sps:$4 sm:$0xff]  }
 0x27f   :  { %3803 = vmatprep.mubr.bf16.mxu1 %v2879_v12  ;;  %3773 = vmatprep.subr.bf16.mxu1 %v7920_v19  ;;  %v8001_v12 = vld [vmem:[%s11171_s6 + $0x1cc] ss:$16 sps:$4 sm:$0xff]   ;;  %v7999_v14 = vld [vmem:[%s11171_s6 + $0x1c8] ss:$16 sps:$4 sm:$0xff]  }
 0x280   :  { %4536 = vmatprep.subr.bf16.mxu0 %v7923_v20  ;;  %v8004_v19 = vld [vmem:[%s11170_s7 + $0x3ec] ss:$16 sps:$4 sm:$0xff]  }
 0x281   :  { %3774 = vmatpush1.bf16.msra.mxu1 %v7918_v9  ;;  %v8007_v20 = vld [vmem:[%s11171_s6 + $0x1ec] ss:$16 sps:$4 sm:$0xff]   ;;  %v8002_v9 = vld [vmem:[%s11170_s7 + $0x3e8] ss:$16 sps:$4 sm:$0xff]  }
 0x282   :  { %4537 = vmatpush1.bf16.msra.mxu0 %v7921_v57  ;;  %3775 = vmatprep.subr.bf16.mxu1 %v7926_v21  ;;  %v8005_v57 = vld [vmem:[%s11171_s6 + $0x1e8] ss:$16 sps:$4 sm:$0xff]   ;;  %v8010_v21 = vld [vmem:[%s11171_s6 + $0x204] ss:$16 sps:$4 sm:$0xff]  }
 0x283   :  { %4538 = vmatprep.subr.bf16.mxu0 %v7929_v22  ;;  %v8008_v22 = vld [vmem:[%s11171_s6 + $0x200] ss:$16 sps:$4 sm:$0xff]  }
 0x285   :  { %3776 = vmatpush1.bf16.msra.mxu1 %v7924_v49  ;;  %v8013_v49 = vld [vmem:[%s11171_s6 + $0x224] ss:$16 sps:$4 sm:$0xff]  }
 0x286   :  { %4539 = vmatpush1.bf16.msra.mxu0 %v7927_v23  ;;  %3777 = vmatprep.subr.bf16.mxu1 %v7932_v7  ;;  %v10282_v23 = vpack.c.bf16 %v9700_v39, %v9700_v39  ;;  %v8011_v7 = vld [vmem:[%s11171_s6 + $0x220] ss:$16 sps:$4 sm:$0xff]  }
 0x287   :  { %4540 = vmatprep.subr.bf16.mxu0 %v7935_v55  ;;  %v8016_v55 = vld [vmem:[%s11171_s6 + $0x244] ss:$16 sps:$4 sm:$0xff]   ;;  %v8014_v39 = vld [vmem:[%s11171_s6 + $0x240] ss:$16 sps:$4 sm:$0xff]  }
 0x289   :  { %3778 = vmatpush1.bf16.msra.mxu1 %v7930_v24  ;;  %v8022_v24 = vld [vmem:[%s11171_s6 + $0x284] ss:$16 sps:$4 sm:$0xff]  }
 0x28a   :  { %4541 = vmatpush1.bf16.msra.mxu0 %v7933_v25  ;;  %3779 = vmatprep.subr.bf16.mxu1 %v7938_v26  ;;  %v8020_v25 = vld [vmem:[%s11171_s6 + $0x280] ss:$16 sps:$4 sm:$0xff]   ;;  %v8025_v26 = vld [vmem:[%s11171_s6 + $0x2a4] ss:$16 sps:$4 sm:$0xff]  }
 0x28b   :  { %4542 = vmatprep.subr.bf16.mxu0 %v7941_v59  ;;  %v8023_v59 = vld [vmem:[%s11171_s6 + $0x2a0] ss:$16 sps:$4 sm:$0xff]  }
 0x28d   :  { %3780 = vmatpush1.bf16.msra.mxu1 %v7936_v15  ;;  %v8028_v15 = vld [vmem:[%s11171_s6 + $0x2c4] ss:$16 sps:$4 sm:$0xff]  }
 0x28e   :  { %4543 = vmatpush1.bf16.msra.mxu0 %v7939_v1  ;;  %3781 = vmatprep.subr.bf16.mxu1 %v7944_v28 }
 0x28f   :  { %4544 = vmatprep.subr.bf16.mxu0 %v7947_v13 }
 0x291   :  { %3782 = vmatpush1.bf16.msra.mxu1 %v7942_v30  ;;  %v8026_v30 = vld [vmem:[%s11171_s6 + $0x2c0] ss:$16 sps:$4 sm:$0xff]  }
 0x292   :  { %4545 = vmatpush1.bf16.msra.mxu0 %v7945_v31  ;;  %3783 = vmatprep.subr.bf16.mxu1 %v7950_v32  ;;  %v8031_v32 = vld [vmem:[%s11171_s6 + $0x2e4] ss:$16 sps:$4 sm:$0xff]  }
 0x293   :  { %4546 = vmatprep.subr.bf16.mxu0 %v7953_v43  ;;  %v8029_v43 = vld [vmem:[%s11171_s6 + $0x2e0] ss:$16 sps:$4 sm:$0xff]  }
 0x295   :  { %3784 = vmatpush1.bf16.msra.mxu1 %v7948_v34  ;;  %v8034_v34 = vld [vmem:[%s11171_s6 + $0x304] ss:$16 sps:$4 sm:$0xff]  }
 0x296   :  { %4547 = vmatpush1.bf16.msra.mxu0 %v7951_v35  ;;  %3785 = vmatprep.subr.bf16.mxu1 %v7956_v38  ;;  %v8032_v35 = vld [vmem:[%s11171_s6 + $0x300] ss:$16 sps:$4 sm:$0xff]   ;;  %v8037_v38 = vld [vmem:[%s11171_s6 + $0x324] ss:$16 sps:$4 sm:$0xff]  }
 0x297   :  { %4548 = vmatprep.subr.bf16.mxu0 %v7959_v56  ;;  %v8035_v56 = vld [vmem:[%s11171_s6 + $0x320] ss:$16 sps:$4 sm:$0xff]  }
 0x299   :  { %3786 = vmatpush1.bf16.msra.mxu1 %v7954_v40  ;;  %v8040_v40 = vld [vmem:[%s11171_s6 + $0x344] ss:$16 sps:$4 sm:$0xff]  }
 0x29a   :  { %4549 = vmatpush1.bf16.msra.mxu0 %v7957_v41  ;;  %3787 = vmatprep.subr.bf16.mxu1 %v7962_v42  ;;  %v8038_v41 = vld [vmem:[%s11171_s6 + $0x340] ss:$16 sps:$4 sm:$0xff]   ;;  %v8043_v42 = vld [vmem:[%s11171_s6 + $0x364] ss:$16 sps:$4 sm:$0xff]  }
 0x29b   :  { %4550 = vmatprep.subr.bf16.mxu0 %v7965_v45  ;;  %v8041_v45 = vld [vmem:[%s11171_s6 + $0x360] ss:$16 sps:$4 sm:$0xff]  }
 0x29d   :  { %3788 = vmatpush1.bf16.msra.mxu1 %v7960_v46  ;;  %v8046_v46 = vld [vmem:[%s11171_s6 + $0x384] ss:$16 sps:$4 sm:$0xff]  }
 0x29e   :  { %4551 = vmatpush1.bf16.msra.mxu0 %v7963_v47  ;;  %3789 = vmatprep.subr.bf16.mxu1 %v7968_v48  ;;  %v8044_v47 = vld [vmem:[%s11171_s6 + $0x380] ss:$16 sps:$4 sm:$0xff]   ;;  %v8049_v48 = vld [vmem:[%s11171_s6 + $0x3a4] ss:$16 sps:$4 sm:$0xff]  }
 0x29f   :  { %4552 = vmatprep.subr.bf16.mxu0 %v7971_v53  ;;  %v8047_v53 = vld [vmem:[%s11171_s6 + $0x3a0] ss:$16 sps:$4 sm:$0xff]  }
 0x2a1   :  { %3790 = vmatpush1.bf16.msra.mxu1 %v7966_v54  ;;  %v8052_v54 = vld [vmem:[%s11171_s6 + $0x3c4] ss:$16 sps:$4 sm:$0xff]  }
 0x2a2   :  { %4553 = vmatpush1.bf16.msra.mxu0 %v7969_v58  ;;  %3791 = vmatprep.subr.bf16.mxu1 %v7974_v36  ;;  %v8050_v58 = vld [vmem:[%s11171_s6 + $0x3c0] ss:$16 sps:$4 sm:$0xff]   ;;  %v8055_v36 = vld [vmem:[%s11171_s6 + $0x3e4] ss:$16 sps:$4 sm:$0xff]  }
 0x2a3   :  { %4554 = vmatprep.subr.bf16.mxu0 %v7977_v60  ;;  %v8053_v60 = vld [vmem:[%s11171_s6 + $0x3e0] ss:$16 sps:$4 sm:$0xff]  }
 0x2a5   :  { %3792 = vmatpush1.bf16.msra.mxu1 %v7972_v62  ;;  %v8058_v62 = vld [vmem:[%s11171_s6 + $0x20c] ss:$16 sps:$4 sm:$0xff]  }
 0x2a6   :  { %4555 = vmatpush1.bf16.msra.mxu0 %v7975_v50  ;;  %3793 = vmatprep.subr.bf16.mxu1 %v7980_v63  ;;  %v8056_v50 = vld [vmem:[%s11171_s6 + $0x208] ss:$16 sps:$4 sm:$0xff]   ;;  %v10386_v63 = vpack.c.bf16 %v9695_v37, %v9695_v37  ;;  %v8064_v37 = vld [vmem:[%s11171_s6 + $0x24c] ss:$16 sps:$4 sm:$0xff]  }
 0x2a7   :  { %4556 = vmatprep.subr.bf16.mxu0 %v7983_v0  ;;  %v8061_v0 = vld [vmem:[%s11171_s6 + $0x22c] ss:$16 sps:$4 sm:$0xff]  }
 0x2a9   :  { %3794 = vmatpush1.bf16.msra.mxu1 %v7978_v44  ;;  %v8059_v44 = vld [vmem:[%s11171_s6 + $0x228] ss:$16 sps:$4 sm:$0xff]  }
 0x2aa   :  { %4557 = vmatpush1.bf16.msra.mxu0 %v7981_v2  ;;  %3795 = vmatprep.subr.bf16.mxu1 %v7986_v3  ;;  %v8062_v2 = vld [vmem:[%s11171_s6 + $0x248] ss:$16 sps:$4 sm:$0xff]   ;;  %v8067_v3 = vld [vmem:[%s11171_s6 + $0x26c] ss:$16 sps:$4 sm:$0xff]  }
 0x2ab   :  { %4558 = vmatprep.subr.bf16.mxu0 %v7989_v4  ;;  %v8065_v4 = vld [vmem:[%s11171_s6 + $0x268] ss:$16 sps:$4 sm:$0xff]  }
 0x2ad   :  { %3796 = vmatpush1.bf16.msra.mxu1 %v7984_v61  ;;  %v8070_v61 = vld [vmem:[%s11171_s6 + $0x28c] ss:$16 sps:$4 sm:$0xff]  }
 0x2ae   :  { %4559 = vmatpush1.bf16.msra.mxu0 %v7987_v5  ;;  %3797 = vmatprep.subr.bf16.mxu1 %v7992_v6  ;;  %v8068_v5 = vld [vmem:[%s11171_s6 + $0x288] ss:$16 sps:$4 sm:$0xff]   ;;  %v8073_v6 = vld [vmem:[%s11171_s6 + $0x2ac] ss:$16 sps:$4 sm:$0xff]  }
 0x2af   :  { %4560 = vmatprep.subr.bf16.mxu0 %v7995_v8  ;;  %v8071_v8 = vld [vmem:[%s11171_s6 + $0x2a8] ss:$16 sps:$4 sm:$0xff]  }
 0x2b1   :  { %3798 = vmatpush1.bf16.msra.mxu1 %v7990_v10  ;;  %v8076_v10 = vld [vmem:[%s11171_s6 + $0x2cc] ss:$16 sps:$4 sm:$0xff]  }
 0x2b2   :  { %4561 = vmatpush1.bf16.msra.mxu0 %v7993_v11  ;;  %3799 = vmatprep.subr.bf16.mxu1 %v7998_v18 }
 0x2b3   :  { %4562 = vmatprep.subr.bf16.mxu0 %v8001_v12 }
 0x2b5   :  { %3800 = vmatpush1.bf16.msra.mxu1 %v7996_v33  ;;  %v8074_v33 = vld [vmem:[%s11171_s6 + $0x2c8] ss:$16 sps:$4 sm:$0xff]  }
 0x2b6   :  { %4563 = vmatpush1.bf16.msra.mxu0 %v7999_v14  ;;  %3801 = vmatprep.subr.bf16.mxu1 %v8004_v19  ;;  %v8079_v19 = vld [vmem:[%s11171_s6 + $0x2ec] ss:$16 sps:$4 sm:$0xff]  }
 0x2b7   :  { %4564 = vmatprep.subr.bf16.mxu0 %v8007_v20  ;;  %v8077_v20 = vld [vmem:[%s11171_s6 + $0x2e8] ss:$16 sps:$4 sm:$0xff]  }
 0x2b9   :  { %3802 = vmatpush1.bf16.msra.mxu1 %v8002_v9  ;;  %v8104_v9 = vld [vmem:[%s11173_s9] ss:$16 sps:$4 sm:$0xff]  }
 0x2ba   :  { %4565 = vmatpush1.bf16.msra.mxu0 %v8005_v57  ;;  %4493 = vmatprep.subr.bf16.mxu1 %v8010_v21  ;;  %v8106_v57 = vld [vmem:[%s11173_s9 + $0x4] ss:$16 sps:$4 sm:$0xff]   ;;  %v8082_v21 = vld [vmem:[%s11171_s6 + $0x30c] ss:$16 sps:$4 sm:$0xff]  }
 0x2bb   :  { %5440 = vmatprep.subr.bf16.mxu0 %v8106_v57 }
 0x2bc   :  { %3804 = vmatmul.mubr.bf16.vlgmr.msra.gmra.mrb[16].mxu1 %v10086_v17  ;;  %v8017_v17 = vld [vmem:[%s11171_s6 + $0x260] ss:$16 sps:$4 sm:$0xff]  }
 0x2bd   :  { %4567 = vmatmul.mubr.bf16.vlgmr.msra.gmra.mrb[20].mxu0 %v10084_v16  ;;  %4494 = vmatpush1.bf16.msra.mxu1 %v8008_v22  ;;  %v8019_v16 = vld [vmem:[%s11171_s6 + $0x264] ss:$16 sps:$4 sm:$0xff]  }
 0x2be   :  { %4525 = vmatprep.mubr.bf16.mxu1 %v10282_v23  ;;  %4495 = vmatprep.subr.bf16.mxu1 %v8013_v49  ;;  %v8112_v22 = vld [vmem:[%s11173_s9 + $0x24] ss:$16 sps:$4 sm:$0xff]   ;;  %v8110_v49 = vld [vmem:[%s11173_s9 + $0x20] ss:$16 sps:$4 sm:$0xff]  }
 0x2bf   :  { %5441 = vmatpush1.bf16.msra.mxu0 %v8104_v9  ;;  %v8145_v9 = vld [vmem:[%s11173_s9 + $0xcc] ss:$16 sps:$4 sm:$0xff]  }
 0x2c0   :  { %5442 = vmatprep.subr.bf16.mxu0 %v8112_v22 }
 0x2c1   :  { %4496 = vmatpush1.bf16.msra.mxu1 %v8011_v7  ;;  %v8085_v7 = vld [vmem:[%s11171_s6 + $0x32c] ss:$16 sps:$4 sm:$0xff]  }
 0x2c2   :  { %4497 = vmatprep.subr.bf16.mxu1 %v8016_v55  ;;  %v8118_v55 = vld [vmem:[%s11173_s9 + $0x44] ss:$16 sps:$4 sm:$0xff]  }
 0x2c3   :  { %5443 = vmatpush1.bf16.msra.mxu0 %v8110_v49 }
 0x2c4   :  { %5444 = vmatprep.subr.bf16.mxu0 %v8118_v55 }
 0x2c5   :  { %4498 = vmatpush1.bf16.msra.mxu1 %v8014_v39  ;;  %v8083_v39 = vld [vmem:[%s11171_s6 + $0x328] ss:$16 sps:$4 sm:$0xff]  }
 0x2c6   :  { %4499 = vmatprep.subr.bf16.mxu1 %v8019_v16  ;;  %v8116_v16 = vld [vmem:[%s11173_s9 + $0x40] ss:$16 sps:$4 sm:$0xff]  }
 0x2c7   :  { %5445 = vmatpush1.bf16.msra.mxu0 %v8116_v16  ;;  %v8143_v16 = vld [vmem:[%s11173_s9 + $0xc8] ss:$16 sps:$4 sm:$0xff]  }
 0x2c9   :  { %4500 = vmatpush1.bf16.msra.mxu1 %v8017_v17  ;;  %v8124_v17 = vld [vmem:[%s11173_s9 + $0x64] ss:$16 sps:$4 sm:$0xff]  }
 0x2ca   :  { %4501 = vmatprep.subr.bf16.mxu1 %v8022_v24  ;;  %v8088_v24 = vld [vmem:[%s11171_s6 + $0x34c] ss:$16 sps:$4 sm:$0xff]   ;;  %5446 = vmatprep.subr.bf16.mxu0 %v8124_v17  ;;  %v8190_v17 = vld [vmem:[%s11173_s9 + $0x1c4] ss:$16 sps:$4 sm:$0xff]  }
 0x2cd   :  { %4502 = vmatpush1.bf16.msra.mxu1 %v8020_v25  ;;  %v8086_v25 = vld [vmem:[%s11171_s6 + $0x348] ss:$16 sps:$4 sm:$0xff]  }
 0x2ce   :  { %4503 = vmatprep.subr.bf16.mxu1 %v8025_v26  ;;  %v8122_v26 = vld [vmem:[%s11173_s9 + $0x60] ss:$16 sps:$4 sm:$0xff]  }
 0x2cf   :  { %5447 = vmatpush1.bf16.msra.mxu0 %v8122_v26 }
 0x2d0   :  { %v10317_v1 = vpop.f32.mrb[8].mxu0 }
 0x2d1   :  { %v10319_v28 = vpop.f32.mrb[9].mxu0  ;;  %4504 = vmatpush1.bf16.msra.mxu1 %v8023_v59  ;;  %v8130_v59 = vld [vmem:[%s11173_s9 + $0x84] ss:$16 sps:$4 sm:$0xff]  }
 0x2d2   :  { %v3686_v13 = vpop.f32.mrb[10].mxu0  ;;  %4505 = vmatprep.subr.bf16.mxu1 %v8028_v15  ;;  %v8091_v15 = vld [vmem:[%s11171_s6 + $0x36c] ss:$16 sps:$4 sm:$0xff]   ;;  %5448 = vmatprep.subr.bf16.mxu0 %v8130_v59 }
 0x2d3   :  { %v3687_v31 = vpop.f32.mrb[11].mxu0  ;;  %v8089_v13 = vld [vmem:[%s11171_s6 + $0x368] ss:$16 sps:$4 sm:$0xff]  }
 0x2d4   :  { %v8136_v31 = vld [vmem:[%s11173_s9 + $0xa4] ss:$16 sps:$4 sm:$0xff]  }
 0x2d5   :  { %4506 = vmatpush1.bf16.msra.mxu1 %v8026_v30  ;;  %v8128_v30 = vld [vmem:[%s11173_s9 + $0x80] ss:$16 sps:$4 sm:$0xff]  }
 0x2d6   :  { %4507 = vmatprep.subr.bf16.mxu1 %v8031_v32  ;;  %v8094_v32 = vld [vmem:[%s11171_s6 + $0x38c] ss:$16 sps:$4 sm:$0xff]   ;;  %5449 = vmatpush1.bf16.msra.mxu0 %v8128_v30 }
 0x2d7   :  { %5450 = vmatprep.subr.bf16.mxu0 %v8136_v31  ;;  %v8157_v30 = vld [vmem:[%s11173_s9 + $0x10c] ss:$16 sps:$4 sm:$0xff]   ;;  %v8194_v31 = vld [vmem:[%s11173_s9 + $0x1e0] ss:$16 sps:$4 sm:$0xff]  }
 0x2d9   :  { %4508 = vmatpush1.bf16.msra.mxu1 %v8029_v43  ;;  %v8092_v43 = vld [vmem:[%s11171_s6 + $0x388] ss:$16 sps:$4 sm:$0xff]  }
 0x2da   :  { %4509 = vmatprep.subr.bf16.mxu1 %v8034_v34  ;;  %v8134_v34 = vld [vmem:[%s11173_s9 + $0xa0] ss:$16 sps:$4 sm:$0xff]  }
 0x2db   :  { %5451 = vmatpush1.bf16.msra.mxu0 %v8134_v34  ;;  %v8163_v34 = vld [vmem:[%s11173_s9 + $0x12c] ss:$16 sps:$4 sm:$0xff]  }
 0x2dd   :  { %4510 = vmatpush1.bf16.msra.mxu1 %v8032_v35  ;;  %v8142_v35 = vld [vmem:[%s11173_s9 + $0xc4] ss:$16 sps:$4 sm:$0xff]  }
 0x2de   :  { %4511 = vmatprep.subr.bf16.mxu1 %v8037_v38  ;;  %v8097_v38 = vld [vmem:[%s11171_s6 + $0x3ac] ss:$16 sps:$4 sm:$0xff]   ;;  %5452 = vmatprep.subr.bf16.mxu0 %v8142_v35  ;;  %v8161_v35 = vld [vmem:[%s11173_s9 + $0x128] ss:$16 sps:$4 sm:$0xff]  }
 0x2e1   :  { %4512 = vmatpush1.bf16.msra.mxu1 %v8035_v56  ;;  %v8095_v56 = vld [vmem:[%s11171_s6 + $0x3a8] ss:$16 sps:$4 sm:$0xff]  }
 0x2e2   :  { %4513 = vmatprep.subr.bf16.mxu1 %v8040_v40  ;;  %v8140_v40 = vld [vmem:[%s11173_s9 + $0xc0] ss:$16 sps:$4 sm:$0xff]  }
 0x2e3   :  { %5453 = vmatpush1.bf16.msra.mxu0 %v8140_v40  ;;  %v8175_v40 = vld [vmem:[%s11173_s9 + $0x16c] ss:$16 sps:$4 sm:$0xff]  }
 0x2e5   :  { %4514 = vmatpush1.bf16.msra.mxu1 %v8038_v41  ;;  %v8148_v41 = vld [vmem:[%s11173_s9 + $0xe4] ss:$16 sps:$4 sm:$0xff]  }
 0x2e6   :  { %4515 = vmatprep.subr.bf16.mxu1 %v8043_v42  ;;  %v8100_v42 = vld [vmem:[%s11171_s6 + $0x3cc] ss:$16 sps:$4 sm:$0xff]   ;;  %5454 = vmatprep.subr.bf16.mxu0 %v8148_v41  ;;  %v8173_v41 = vld [vmem:[%s11173_s9 + $0x168] ss:$16 sps:$4 sm:$0xff]  }
 0x2e9   :  { %4516 = vmatpush1.bf16.msra.mxu1 %v8041_v45  ;;  %v8098_v45 = vld [vmem:[%s11171_s6 + $0x3c8] ss:$16 sps:$4 sm:$0xff]  }
 0x2ea   :  { %4517 = vmatprep.subr.bf16.mxu1 %v8046_v46  ;;  %v8146_v46 = vld [vmem:[%s11173_s9 + $0xe0] ss:$16 sps:$4 sm:$0xff]  }
 0x2eb   :  { %5455 = vmatpush1.bf16.msra.mxu0 %v8146_v46  ;;  %v8187_v46 = vld [vmem:[%s11173_s9 + $0x1ac] ss:$16 sps:$4 sm:$0xff]  }
 0x2ed   :  { %4518 = vmatpush1.bf16.msra.mxu1 %v8044_v47  ;;  %v8154_v47 = vld [vmem:[%s11173_s9 + $0x104] ss:$16 sps:$4 sm:$0xff]  }
 0x2ee   :  { %4519 = vmatprep.subr.bf16.mxu1 %v8049_v48  ;;  %v8103_v48 = vld [vmem:[%s11171_s6 + $0x3ec] ss:$16 sps:$4 sm:$0xff]   ;;  %5456 = vmatprep.subr.bf16.mxu0 %v8154_v47  ;;  %v8185_v47 = vld [vmem:[%s11173_s9 + $0x1a8] ss:$16 sps:$4 sm:$0xff]  }
 0x2f1   :  { %4520 = vmatpush1.bf16.msra.mxu1 %v8047_v53  ;;  %v8101_v53 = vld [vmem:[%s11171_s6 + $0x3e8] ss:$16 sps:$4 sm:$0xff]  }
 0x2f2   :  { %4521 = vmatprep.subr.bf16.mxu1 %v8052_v54  ;;  %v8152_v54 = vld [vmem:[%s11173_s9 + $0x100] ss:$16 sps:$4 sm:$0xff]  }
 0x2f3   :  { %5457 = vmatpush1.bf16.msra.mxu0 %v8152_v54  ;;  %v8199_v54 = vld [vmem:[%s11173_s9 + $0x1ec] ss:$16 sps:$4 sm:$0xff]  }
 0x2f5   :  { %4522 = vmatpush1.bf16.msra.mxu1 %v8050_v58  ;;  %v8160_v58 = vld [vmem:[%s11173_s9 + $0x124] ss:$16 sps:$4 sm:$0xff]  }
 0x2f6   :  { %4523 = vmatprep.subr.bf16.mxu1 %v8055_v36  ;;  %v8109_v36 = vld [vmem:[%s11173_s9 + $0xc] ss:$16 sps:$4 sm:$0xff]   ;;  %5458 = vmatprep.subr.bf16.mxu0 %v8160_v58  ;;  %v8197_v58 = vld [vmem:[%s11173_s9 + $0x1e8] ss:$16 sps:$4 sm:$0xff]  }
 0x2f9   :  { %4524 = vmatpush1.bf16.msra.mxu1 %v8053_v60  ;;  %v8107_v60 = vld [vmem:[%s11173_s9 + $0x8] ss:$16 sps:$4 sm:$0xff]  }
 0x2fa   :  { %4575 = vmatprep.subr.bf16.mxu1 %v8058_v62  ;;  %v8115_v62 = vld [vmem:[%s11173_s9 + $0x2c] ss:$16 sps:$4 sm:$0xff]  }
 0x2fc   :  { %4526 = vmatmul.mubr.bf16.vlgmr.msra.gmra.mrb[20].mxu1 %v10386_v63 }
 0x2fd   :  { %4576 = vmatpush1.bf16.msra.mxu1 %v8056_v50  ;;  %4607 = vmatprep.mubr.bf16.mxu1 %v10282_v23  ;;  %v8080_v23 = vld [vmem:[%s11171_s6 + $0x308] ss:$16 sps:$4 sm:$0xff]   ;;  %v8158_v50 = vld [vmem:[%s11173_s9 + $0x120] ss:$16 sps:$4 sm:$0xff]  }
 0x2fe   :  { %4577 = vmatprep.subr.bf16.mxu1 %v8061_v0  ;;  %v8166_v0 = vld [vmem:[%s11173_s9 + $0x144] ss:$16 sps:$4 sm:$0xff]   ;;  %5459 = vmatpush1.bf16.msra.mxu0 %v8158_v50 }
 0x2ff   :  { %5460 = vmatprep.subr.bf16.mxu0 %v8166_v0 }
 0x301   :  { %4578 = vmatpush1.bf16.msra.mxu1 %v8059_v44  ;;  %v8164_v44 = vld [vmem:[%s11173_s9 + $0x140] ss:$16 sps:$4 sm:$0xff]  }
 0x302   :  { %4579 = vmatprep.subr.bf16.mxu1 %v8064_v37  ;;  %v8113_v37 = vld [vmem:[%s11173_s9 + $0x28] ss:$16 sps:$4 sm:$0xff]   ;;  %5461 = vmatpush1.bf16.msra.mxu0 %v8164_v44 }
 0x305   :  { %4580 = vmatpush1.bf16.msra.mxu1 %v8062_v2  ;;  %v8172_v2 = vld [vmem:[%s11173_s9 + $0x164] ss:$16 sps:$4 sm:$0xff]  }
 0x306   :  { %4581 = vmatprep.subr.bf16.mxu1 %v8067_v3  ;;  %v8121_v3 = vld [vmem:[%s11173_s9 + $0x4c] ss:$16 sps:$4 sm:$0xff]   ;;  %5462 = vmatprep.subr.bf16.mxu0 %v8172_v2 }
 0x309   :  { %4582 = vmatpush1.bf16.msra.mxu1 %v8065_v4  ;;  %v8170_v4 = vld [vmem:[%s11173_s9 + $0x160] ss:$16 sps:$4 sm:$0xff]  }
 0x30a   :  { %4583 = vmatprep.subr.bf16.mxu1 %v8070_v61  ;;  %v8119_v61 = vld [vmem:[%s11173_s9 + $0x48] ss:$16 sps:$4 sm:$0xff]   ;;  %5463 = vmatpush1.bf16.msra.mxu0 %v8170_v4 }
 0x30d   :  { %4584 = vmatpush1.bf16.msra.mxu1 %v8068_v5  ;;  %v8127_v5 = vld [vmem:[%s11173_s9 + $0x6c] ss:$16 sps:$4 sm:$0xff]  }
 0x30e   :  { %4585 = vmatprep.subr.bf16.mxu1 %v8073_v6  ;;  %v8176_v6 = vld [vmem:[%s11173_s9 + $0x180] ss:$16 sps:$4 sm:$0xff]  }
 0x310   :  { %v10423_v11 = vpop.f32.mrb[12].mxu0 }
 0x311   :  { %v10425_v18 = vpop.f32.mrb[13].mxu0  ;;  %4586 = vmatpush1.bf16.msra.mxu1 %v8071_v8  ;;  %v8125_v8 = vld [vmem:[%s11173_s9 + $0x68] ss:$16 sps:$4 sm:$0xff]  }
 0x312   :  { %v3768_v12 = vpop.f32.mrb[14].mxu0  ;;  %4587 = vmatprep.subr.bf16.mxu1 %v8076_v10  ;;  %v8184_v10 = vld [vmem:[%s11173_s9 + $0x1a4] ss:$16 sps:$4 sm:$0xff]  }
 0x313   :  { %v3769_v14 = vpop.f32.mrb[15].mxu0  ;;  %v8133_v12 = vld [vmem:[%s11173_s9 + $0x8c] ss:$16 sps:$4 sm:$0xff]  }
 0x314   :  { %v8131_v14 = vld [vmem:[%s11173_s9 + $0x88] ss:$16 sps:$4 sm:$0xff]  }
 0x315   :  { %4588 = vmatpush1.bf16.msra.mxu1 %v8074_v33  ;;  %v8182_v33 = vld [vmem:[%s11173_s9 + $0x1a0] ss:$16 sps:$4 sm:$0xff]  }
 0x316   :  { %4589 = vmatprep.subr.bf16.mxu1 %v8079_v19  ;;  %v8139_v19 = vld [vmem:[%s11173_s9 + $0xac] ss:$16 sps:$4 sm:$0xff]  }
 0x319   :  { %4590 = vmatpush1.bf16.msra.mxu1 %v8077_v20  ;;  %v8137_v20 = vld [vmem:[%s11173_s9 + $0xa8] ss:$16 sps:$4 sm:$0xff]  }
 0x31a   :  { %4591 = vmatprep.subr.bf16.mxu1 %v8082_v21 }
 0x31d   :  { %4592 = vmatpush1.bf16.msra.mxu1 %v8080_v23 }
 0x31e   :  { %4593 = vmatprep.subr.bf16.mxu1 %v8085_v7 }
 0x321   :  { %4594 = vmatpush1.bf16.msra.mxu1 %v8083_v39 }
 0x322   :  { %4595 = vmatprep.subr.bf16.mxu1 %v8088_v24 }
 0x325   :  { %4596 = vmatpush1.bf16.msra.mxu1 %v8086_v25 }
 0x326   :  { %4597 = vmatprep.subr.bf16.mxu1 %v8091_v15  ;;  %v8149_v15 = vld [vmem:[%s11173_s9 + $0xe8] ss:$16 sps:$4 sm:$0xff]  }
 0x329   :  { %4598 = vmatpush1.bf16.msra.mxu1 %v8089_v13  ;;  %v8196_v13 = vld [vmem:[%s11173_s9 + $0x1e4] ss:$16 sps:$4 sm:$0xff]  }
 0x32a   :  { %4599 = vmatprep.subr.bf16.mxu1 %v8094_v32  ;;  %v8155_v32 = vld [vmem:[%s11173_s9 + $0x108] ss:$16 sps:$4 sm:$0xff]  }
 0x32d   :  { %4600 = vmatpush1.bf16.msra.mxu1 %v8092_v43  ;;  %v8202_v43 = vld [vmem:[%s11173_s9 + $0x204] ss:$16 sps:$4 sm:$0xff]  }
 0x32e   :  { %4601 = vmatprep.subr.bf16.mxu1 %v8097_v38  ;;  %v8169_v38 = vld [vmem:[%s11173_s9 + $0x14c] ss:$16 sps:$4 sm:$0xff]  }
 0x331   :  { %4602 = vmatpush1.bf16.msra.mxu1 %v8095_v56  ;;  %v8167_v56 = vld [vmem:[%s11173_s9 + $0x148] ss:$16 sps:$4 sm:$0xff]  }
 0x332   :  { %4603 = vmatprep.subr.bf16.mxu1 %v8100_v42  ;;  %v8181_v42 = vld [vmem:[%s11173_s9 + $0x18c] ss:$16 sps:$4 sm:$0xff]  }
 0x335   :  { %4604 = vmatpush1.bf16.msra.mxu1 %v8098_v45  ;;  %v8179_v45 = vld [vmem:[%s11173_s9 + $0x188] ss:$16 sps:$4 sm:$0xff]  }
 0x336   :  { %4605 = vmatprep.subr.bf16.mxu1 %v8103_v48  ;;  %v8193_v48 = vld [vmem:[%s11173_s9 + $0x1cc] ss:$16 sps:$4 sm:$0xff]  }
 0x339   :  { %4606 = vmatpush1.bf16.msra.mxu1 %v8101_v53  ;;  %v8191_v53 = vld [vmem:[%s11173_s9 + $0x1c8] ss:$16 sps:$4 sm:$0xff]  }
 0x33a   :  { %5522 = vmatprep.subr.bf16.mxu1 %v8109_v36  ;;  %v8205_v36 = vld [vmem:[%s11173_s9 + $0x20c] ss:$16 sps:$4 sm:$0xff]  }
 0x33c   :  { %4608 = vmatmul.mubr.bf16.vlgmr.msra.gmra.mrb[24].mxu1 %v10386_v63  ;;  %v8178_v63 = vld [vmem:[%s11173_s9 + $0x184] ss:$16 sps:$4 sm:$0xff]  }
 0x33d   :  { %5523 = vmatpush1.bf16.msra.mxu1 %v8107_v60  ;;  %5464 = vmatprep.subr.bf16.mxu0 %v8178_v63 }
 0x33e   :  { %5524 = vmatprep.subr.bf16.mxu1 %v8115_v62  ;;  %5465 = vmatpush1.bf16.msra.mxu0 %v8176_v6  ;;  %v10698_v6 = vld [vmem:[%s11175_s8] sm:$0xf] }
 0x33f   :  { %5466 = vmatprep.subr.bf16.mxu0 %v8184_v10 }
 0x341   :  { %5525 = vmatpush1.bf16.msra.mxu1 %v8113_v37 }
 0x342   :  { %5526 = vmatprep.subr.bf16.mxu1 %v8121_v3  ;;  %5467 = vmatpush1.bf16.msra.mxu0 %v8182_v33 }
 0x343   :  { %5468 = vmatprep.subr.bf16.mxu0 %v8190_v17  ;;  %v8209_v17 = vld [vmem:[%s11173_s9 + $0x228] ss:$16 sps:$4 sm:$0xff]  }
 0x345   :  { %5527 = vmatpush1.bf16.msra.mxu1 %v8119_v61 }
 0x346   :  { %5528 = vmatprep.subr.bf16.mxu1 %v8127_v5 }
 0x349   :  { %5529 = vmatpush1.bf16.msra.mxu1 %v8125_v8 }
 0x34a   :  { %5530 = vmatprep.subr.bf16.mxu1 %v8133_v12 }
 0x34d   :  { %5531 = vmatpush1.bf16.msra.mxu1 %v8131_v14 }
 0x34e   :  { %5532 = vmatprep.subr.bf16.mxu1 %v8139_v19 }
 0x34f   :  { %v3723_v21 = vpop.f32.mrb[12].mxu1 }
 0x350   :  { %v4486_v57 = vpop.f32.mrb[16].mxu0  ;;  %v3724_v22 = vadd.f32 %v3723_v21, %v10317_v1  ;;  %v3725_v23 = vpop.f32.mrb[13].mxu1  ;;  %v8151_v1 = vld [vmem:[%s11173_s9 + $0xec] ss:$16 sps:$4 sm:$0xff]  }
 0x351   :  { %v4488_v49 = vpop.f32.mrb[17].mxu0  ;;  %v3726_v7 = vadd.f32 %v3725_v23, %v10319_v28  ;;  %v3727_v39 = vpop.f32.mrb[14].mxu1  ;;  %5533 = vmatpush1.bf16.msra.mxu1 %v8137_v20  ;;  %v8188_v28 = vld [vmem:[%s11173_s9 + $0x1c0] ss:$16 sps:$4 sm:$0xff]   ;;  %v8203_v23 = vld [vmem:[%s11173_s9 + $0x208] ss:$16 sps:$4 sm:$0xff]  }
 0x352   :  { %v4490_v55 = vpop.f32.mrb[18].mxu0  ;;  %v3728_v25 = vpop.f32.mrb[15].mxu1  ;;  %5534 = vmatprep.subr.bf16.mxu1 %v8145_v9  ;;  %v10619_v26 = vadd.f32 %v4486_v57, %v3724_v22  ;;  %5469 = vmatpush1.bf16.msra.mxu0 %v8188_v28  ;;  %v8211_v39 = vld [vmem:[%s11173_s9 + $0x22c] ss:$16 sps:$4 sm:$0xff]   ;;  %v8220_v28 = vld [vmem:[%s11173_s9 + $0x264] ss:$16 sps:$4 sm:$0xff]  }
 0x353   :  { %v4491_v24 = vpop.f32.mrb[19].mxu0  ;;  %v10624_v59 = vadd.f32 %v4488_v49, %v3726_v7  ;;  %5470 = vmatprep.subr.bf16.mxu0 %v8196_v13  ;;  %v8200_v49 = vld [vmem:[%s11173_s9 + $0x200] ss:$16 sps:$4 sm:$0xff]   ;;  %v8208_v55 = vld [vmem:[%s11173_s9 + $0x224] ss:$16 sps:$4 sm:$0xff]  }
 0x354   :  { %v8214_v24 = vld [vmem:[%s11173_s9 + $0x244] ss:$16 sps:$4 sm:$0xff]   ;;  %v8217_v25 = vld [vmem:[%s11173_s9 + $0x24c] ss:$16 sps:$4 sm:$0xff]   ;;  %v8221_v13 = vld [vmem:[%s11173_s9 + $0x268] ss:$16 sps:$4 sm:$0xff]  }
 0x355   :  { %5535 = vmatpush1.bf16.msra.mxu1 %v8143_v16  ;;  %v8206_v16 = vld [vmem:[%s11173_s9 + $0x220] ss:$16 sps:$4 sm:$0xff]  }
 0x356   :  { %5536 = vmatprep.subr.bf16.mxu1 %v8151_v1  ;;  %5471 = vmatpush1.bf16.msra.mxu0 %v8194_v31  ;;  %v8212_v1 = vld [vmem:[%s11173_s9 + $0x240] ss:$16 sps:$4 sm:$0xff]   ;;  %v8229_v31 = vld [vmem:[%s11173_s9 + $0x28c] ss:$16 sps:$4 sm:$0xff]  }
 0x357   :  { %5481 = vmatprep.subr.bf16.mxu0 %v8202_v43  ;;  %v8227_v43 = vld [vmem:[%s11173_s9 + $0x288] ss:$16 sps:$4 sm:$0xff]  }
 0x359   :  { %5537 = vmatpush1.bf16.msra.mxu1 %v8149_v15  ;;  %v8218_v15 = vld [vmem:[%s11173_s9 + $0x260] ss:$16 sps:$4 sm:$0xff]  }
 0x35a   :  { %5538 = vmatprep.subr.bf16.mxu1 %v8157_v30  ;;  %v8226_v30 = vld [vmem:[%s11173_s9 + $0x284] ss:$16 sps:$4 sm:$0xff]  }
 0x35d   :  { %5539 = vmatpush1.bf16.msra.mxu1 %v8155_v32  ;;  %v8224_v32 = vld [vmem:[%s11173_s9 + $0x280] ss:$16 sps:$4 sm:$0xff]  }
 0x35e   :  { %5540 = vmatprep.subr.bf16.mxu1 %v8163_v34  ;;  %v8232_v34 = vld [vmem:[%s11173_s9 + $0x2a4] ss:$16 sps:$4 sm:$0xff]  }
 0x361   :  { %5541 = vmatpush1.bf16.msra.mxu1 %v8161_v35  ;;  %v8235_v35 = vld [vmem:[%s11173_s9 + $0x2ac] ss:$16 sps:$4 sm:$0xff]  }
 0x362   :  { %5542 = vmatprep.subr.bf16.mxu1 %v8169_v38  ;;  %v8230_v38 = vld [vmem:[%s11173_s9 + $0x2a0] ss:$16 sps:$4 sm:$0xff]  }
 0x365   :  { %5543 = vmatpush1.bf16.msra.mxu1 %v8167_v56  ;;  %v8233_v56 = vld [vmem:[%s11173_s9 + $0x2a8] ss:$16 sps:$4 sm:$0xff]  }
 0x366   :  { %5544 = vmatprep.subr.bf16.mxu1 %v8175_v40  ;;  %v8238_v40 = vld [vmem:[%s11173_s9 + $0x2c4] ss:$16 sps:$4 sm:$0xff]  }
 0x369   :  { %5545 = vmatpush1.bf16.msra.mxu1 %v8173_v41  ;;  %v8241_v41 = vld [vmem:[%s11173_s9 + $0x2cc] ss:$16 sps:$4 sm:$0xff]  }
 0x36a   :  { %5546 = vmatprep.subr.bf16.mxu1 %v8181_v42  ;;  %v8236_v42 = vld [vmem:[%s11173_s9 + $0x2c0] ss:$16 sps:$4 sm:$0xff]  }
 0x36d   :  { %5547 = vmatpush1.bf16.msra.mxu1 %v8179_v45  ;;  %v8239_v45 = vld [vmem:[%s11173_s9 + $0x2c8] ss:$16 sps:$4 sm:$0xff]  }
 0x36e   :  { %5548 = vmatprep.subr.bf16.mxu1 %v8187_v46  ;;  %v8244_v46 = vld [vmem:[%s11173_s9 + $0x2e4] ss:$16 sps:$4 sm:$0xff]  }
 0x371   :  { %5549 = vmatpush1.bf16.msra.mxu1 %v8185_v47  ;;  %v8247_v47 = vld [vmem:[%s11173_s9 + $0x2ec] ss:$16 sps:$4 sm:$0xff]  }
 0x372   :  { %5550 = vmatprep.subr.bf16.mxu1 %v8193_v48  ;;  %v8242_v48 = vld [vmem:[%s11173_s9 + $0x2e0] ss:$16 sps:$4 sm:$0xff]  }
 0x375   :  { %5551 = vmatpush1.bf16.msra.mxu1 %v8191_v53  ;;  %v8245_v53 = vld [vmem:[%s11173_s9 + $0x2e8] ss:$16 sps:$4 sm:$0xff]  }
 0x376   :  { %5552 = vmatprep.subr.bf16.mxu1 %v8199_v54  ;;  %v8250_v54 = vld [vmem:[%s11173_s9 + $0x304] ss:$16 sps:$4 sm:$0xff]  }
 0x379   :  { %5553 = vmatpush1.bf16.msra.mxu1 %v8197_v58  ;;  %v8253_v58 = vld [vmem:[%s11173_s9 + $0x30c] ss:$16 sps:$4 sm:$0xff]  }
 0x37a   :  { %5563 = vmatprep.subr.bf16.mxu1 %v8205_v36  ;;  %v8248_v36 = vld [vmem:[%s11173_s9 + $0x300] ss:$16 sps:$4 sm:$0xff]  }
 0x38f   :  { %v3805_v60 = vpop.f32.mrb[16].mxu1 }
 0x390   :  { %v4568_v62 = vpop.f32.mrb[20].mxu0  ;;  %v3806_v50 = vadd.f32 %v3805_v60, %v10423_v11  ;;  %v3807_v0 = vpop.f32.mrb[17].mxu1  ;;  %v4621_v11 = vrot.slane %v10698_v6, %v9386_v51  ;;  %v8251_v60 = vld [vmem:[%s11173_s9 + $0x308] ss:$16 sps:$4 sm:$0xff]  }
 0x391   :  { %v4570_v44 = vpop.f32.mrb[21].mxu0  ;;  %v3808_v37 = vadd.f32 %v3807_v0, %v10425_v18  ;;  %v3809_v2 = vpop.f32.mrb[18].mxu1  ;;  %v4625_v18 = vrot.slane %v10698_v6, %v9389_v52  ;;  %v8254_v0 = vld [vmem:[%s11173_s9 + $0x320] ss:$16 sps:$4 sm:$0xff]  }
 0x392   :  { %v4572_v3 = vpop.f32.mrb[22].mxu0  ;;  %v10691_v4 = vadd.f32 %v4568_v62, %v3806_v50  ;;  %v3810_v61 = vpop.f32.mrb[19].mxu1  ;;  %v8256_v62 = vld [vmem:[%s11173_s9 + $0x324] ss:$16 sps:$4 sm:$0xff]   ;;  %v8259_v50 = vld [vmem:[%s11173_s9 + $0x32c] ss:$16 sps:$4 sm:$0xff]  }
 0x393   :  { %v4573_v63 = vpop.f32.mrb[23].mxu0  ;;  %v10693_v5 = vadd.f32 %v4570_v44, %v3808_v37  ;;  %v8257_v44 = vld [vmem:[%s11173_s9 + $0x328] ss:$16 sps:$4 sm:$0xff]   ;;  %v8262_v37 = vld [vmem:[%s11173_s9 + $0x344] ss:$16 sps:$4 sm:$0xff]  }
 0x394   :  { %v8265_v2 = vld [vmem:[%s11173_s9 + $0x34c] ss:$16 sps:$4 sm:$0xff]   ;;  %v8260_v3 = vld [vmem:[%s11173_s9 + $0x340] ss:$16 sps:$4 sm:$0xff]   ;;  %v8263_v61 = vld [vmem:[%s11173_s9 + $0x348] ss:$16 sps:$4 sm:$0xff]  }
 0x395   :  { %v8268_v63 = vld [vmem:[%s11173_s9 + $0x364] ss:$16 sps:$4 sm:$0xff]  }
 0x3cf   :  { %v4527_v8 = vpop.f32.mrb[20].mxu1 }
 0x3d0   :  { %v4528_v10 = vadd.f32 %v4527_v8, %v10619_v26  ;;  %v4529_v12 = vpop.f32.mrb[21].mxu1  ;;  %v8215_v26 = vld [vmem:[%s11173_s9 + $0x248] ss:$16 sps:$4 sm:$0xff]   ;;  %v8266_v8 = vld [vmem:[%s11173_s9 + $0x360] ss:$16 sps:$4 sm:$0xff]  }
 0x3d1   :  { %v4530_v33 = vadd.f32 %v4529_v12, %v10624_v59  ;;  %v4531_v14 = vpop.f32.mrb[22].mxu1  ;;  %v8223_v59 = vld [vmem:[%s11173_s9 + $0x26c] ss:$16 sps:$4 sm:$0xff]  }
 0x3d2   :  { %v4638_v19 = vadd.f32 %v4621_v11, %v4528_v10  ;;  %v4532_v20 = vpop.f32.mrb[23].mxu1  ;;  %v8271_v11 = vld [vmem:[%s11173_s9 + $0x36c] ss:$16 sps:$4 sm:$0xff]   ;;  %v8274_v10 = vld [vmem:[%s11173_s9 + $0x384] ss:$16 sps:$4 sm:$0xff]  }
 0x3d3   :  { %v4639_v9 = vadd.f32 %v4625_v18, %v4530_v33  ;;  %v8269_v18 = vld [vmem:[%s11173_s9 + $0x368] ss:$16 sps:$4 sm:$0xff]   ;;  %v8277_v12 = vld [vmem:[%s11173_s9 + $0x38c] ss:$16 sps:$4 sm:$0xff]   ;;  %v8272_v33 = vld [vmem:[%s11173_s9 + $0x380] ss:$16 sps:$4 sm:$0xff]  }
 0x3d4   :  { %v4642_v57 = vmax.f32 %v4638_v19, 0.0  ;;  %v8275_v14 = vld [vmem:[%s11173_s9 + $0x388] ss:$16 sps:$4 sm:$0xff]   ;;  %v8280_v19 = vld [vmem:[%s11173_s9 + $0x3a4] ss:$16 sps:$4 sm:$0xff]  }
 0x3d5   :  { %v4643_v21 = vmax.f32 %v4639_v9, 0.0  ;;  %v8283_v20 = vld [vmem:[%s11173_s9 + $0x3ac] ss:$16 sps:$4 sm:$0xff]   ;;  %v8278_v9 = vld [vmem:[%s11173_s9 + $0x3a0] ss:$16 sps:$4 sm:$0xff]  }
 0x3d6   :  { %v4646_v7 = vpack.c.bf16 %v4642_v57, %v4642_v57  ;;  %v8281_v57 = vld [vmem:[%s11173_s9 + $0x3a8] ss:$16 sps:$4 sm:$0xff]  }
 0x3d7   :  { %v4647_v22 = vpack.c.bf16 %v4643_v21, %v4643_v21  ;;  %v8286_v21 = vld [vmem:[%s11173_s9 + $0x3c4] ss:$16 sps:$4 sm:$0xff]  }
 0x3d9   :  { %5472 = vmatprep.mubr.bf16.mxu0 %v4647_v22  ;;  %5554 = vmatprep.mubr.bf16.mxu1 %v4647_v22  ;;  %v8289_v22 = vld [vmem:[%s11173_s9 + $0x3cc] ss:$16 sps:$4 sm:$0xff]  }
 0x3da   :  { %5473 = vmatmul.mubr.bf16.vlgmr.msra.gmra.mrb[24].mxu0 %v4646_v7  ;;  %5555 = vmatmul.mubr.bf16.vlgmr.msra.gmra.mrb[28].mxu1 %v4646_v7  ;;  %v4633_v7 = vrot.slane %v10698_v6, %v9677_v29 }
 0x3db   :  { %5482 = vmatpush1.bf16.msra.mxu0 %v8200_v49  ;;  %5564 = vmatpush1.bf16.msra.mxu1 %v8203_v23  ;;  %v4629_v49 = vrot.slane %v10698_v6, %v9671_v27  ;;  %v8295_v6 = vld [vmem:[%s11173_s9 + $0x3ec] ss:$16 sps:$4 sm:$0xff]  }
 0x3dc   :  { %5483 = vmatprep.subr.bf16.mxu0 %v8208_v55  ;;  %5565 = vmatprep.subr.bf16.mxu1 %v8211_v39  ;;  %v8284_v55 = vld [vmem:[%s11173_s9 + $0x3c0] ss:$16 sps:$4 sm:$0xff]   ;;  %v8287_v39 = vld [vmem:[%s11173_s9 + $0x3c8] ss:$16 sps:$4 sm:$0xff]  }
 0x3df   :  { %5484 = vmatpush1.bf16.msra.mxu0 %v8206_v16  ;;  %5566 = vmatpush1.bf16.msra.mxu1 %v8209_v17 }
 0x3e0   :  { %5485 = vmatprep.subr.bf16.mxu0 %v8214_v24  ;;  %5567 = vmatprep.subr.bf16.mxu1 %v8217_v25  ;;  %v8292_v24 = vld [vmem:[%s11173_s9 + $0x3e4] ss:$16 sps:$4 sm:$0xff]  }
 0x3e3   :  { %5486 = vmatpush1.bf16.msra.mxu0 %v8212_v1  ;;  %5568 = vmatpush1.bf16.msra.mxu1 %v8215_v26 }
 0x3e4   :  { %5487 = vmatprep.subr.bf16.mxu0 %v8220_v28  ;;  %5569 = vmatprep.subr.bf16.mxu1 %v8223_v59 }
 0x3e7   :  { %5488 = vmatpush1.bf16.msra.mxu0 %v8218_v15  ;;  %5570 = vmatpush1.bf16.msra.mxu1 %v8221_v13  ;;  %v8293_v15 = vld [vmem:[%s11173_s9 + $0x3e8] ss:$16 sps:$4 sm:$0xff]  }
 0x3e8   :  { %5489 = vmatprep.subr.bf16.mxu0 %v8226_v30  ;;  %5571 = vmatprep.subr.bf16.mxu1 %v8229_v31 }
 0x3eb   :  { %5490 = vmatpush1.bf16.msra.mxu0 %v8224_v32  ;;  %5572 = vmatpush1.bf16.msra.mxu1 %v8227_v43  ;;  %v8296_v32 = vld [vmem:[%s11174_s11] ss:$8 sps:$4 sm:$0xff]  }
 0x3ec   :  { %5491 = vmatprep.subr.bf16.mxu0 %v8232_v34  ;;  %5573 = vmatprep.subr.bf16.mxu1 %v8235_v35  ;;  %v8301_v34 = vld [vmem:[%s11174_s11 + $0x14] ss:$8 sps:$4 sm:$0xff]   ;;  %v8299_v35 = vld [vmem:[%s11174_s11 + $0x10] ss:$8 sps:$4 sm:$0xff]  }
 0x3ef   :  { %5492 = vmatpush1.bf16.msra.mxu0 %v8230_v38  ;;  %5574 = vmatpush1.bf16.msra.mxu1 %v8233_v56  ;;  %v8304_v38 = vld [vmem:[%s11174_s11 + $0x24] ss:$8 sps:$4 sm:$0xff]   ;;  %v8302_v56 = vld [vmem:[%s11174_s11 + $0x20] ss:$8 sps:$4 sm:$0xff]  }
 0x3f0   :  { %5493 = vmatprep.subr.bf16.mxu0 %v8238_v40  ;;  %5575 = vmatprep.subr.bf16.mxu1 %v8241_v41  ;;  %v8307_v40 = vld [vmem:[%s11174_s11 + $0x34] ss:$8 sps:$4 sm:$0xff]   ;;  %v8305_v41 = vld [vmem:[%s11174_s11 + $0x30] ss:$8 sps:$4 sm:$0xff]  }
 0x3f3   :  { %5494 = vmatpush1.bf16.msra.mxu0 %v8236_v42  ;;  %5576 = vmatpush1.bf16.msra.mxu1 %v8239_v45  ;;  %v8310_v42 = vld [vmem:[%s11174_s11 + $0x44] ss:$8 sps:$4 sm:$0xff]   ;;  %v8308_v45 = vld [vmem:[%s11174_s11 + $0x40] ss:$8 sps:$4 sm:$0xff]  }
 0x3f4   :  { %5495 = vmatprep.subr.bf16.mxu0 %v8244_v46  ;;  %5577 = vmatprep.subr.bf16.mxu1 %v8247_v47  ;;  %v8313_v46 = vld [vmem:[%s11174_s11 + $0x54] ss:$8 sps:$4 sm:$0xff]   ;;  %v8311_v47 = vld [vmem:[%s11174_s11 + $0x50] ss:$8 sps:$4 sm:$0xff]  }
 0x3f7   :  { %5496 = vmatpush1.bf16.msra.mxu0 %v8242_v48  ;;  %5578 = vmatpush1.bf16.msra.mxu1 %v8245_v53  ;;  %v8316_v48 = vld [vmem:[%s11174_s11 + $0x64] ss:$8 sps:$4 sm:$0xff]   ;;  %v8314_v53 = vld [vmem:[%s11174_s11 + $0x60] ss:$8 sps:$4 sm:$0xff]  }
 0x3f8   :  { %5497 = vmatprep.subr.bf16.mxu0 %v8250_v54  ;;  %5579 = vmatprep.subr.bf16.mxu1 %v8253_v58  ;;  %v8319_v54 = vld [vmem:[%s11174_s11 + $0x74] ss:$8 sps:$4 sm:$0xff]   ;;  %v8317_v58 = vld [vmem:[%s11174_s11 + $0x70] ss:$8 sps:$4 sm:$0xff]  }
 0x3fb   :  { %5498 = vmatpush1.bf16.msra.mxu0 %v8248_v36  ;;  %5580 = vmatpush1.bf16.msra.mxu1 %v8251_v60  ;;  %v8322_v36 = vld [vmem:[%s11174_s11 + $0x84] ss:$8 sps:$4 sm:$0xff]   ;;  %v8320_v60 = vld [vmem:[%s11174_s11 + $0x80] ss:$8 sps:$4 sm:$0xff]  }
 0x3fc   :  { %5499 = vmatprep.subr.bf16.mxu0 %v8256_v62  ;;  %5581 = vmatprep.subr.bf16.mxu1 %v8259_v50  ;;  %v8325_v62 = vld [vmem:[%s11174_s11 + $0x94] ss:$8 sps:$4 sm:$0xff]   ;;  %v8323_v50 = vld [vmem:[%s11174_s11 + $0x90] ss:$8 sps:$4 sm:$0xff]  }
 0x3ff   :  { %5500 = vmatpush1.bf16.msra.mxu0 %v8254_v0  ;;  %5582 = vmatpush1.bf16.msra.mxu1 %v8257_v44  ;;  %v8328_v0 = vld [vmem:[%s11174_s11 + $0xa4] ss:$8 sps:$4 sm:$0xff]   ;;  %v8326_v44 = vld [vmem:[%s11174_s11 + $0xa0] ss:$8 sps:$4 sm:$0xff]  }
 0x400   :  { %5501 = vmatprep.subr.bf16.mxu0 %v8262_v37  ;;  %5583 = vmatprep.subr.bf16.mxu1 %v8265_v2  ;;  %v8331_v37 = vld [vmem:[%s11174_s11 + $0xb4] ss:$8 sps:$4 sm:$0xff]   ;;  %v8329_v2 = vld [vmem:[%s11174_s11 + $0xb0] ss:$8 sps:$4 sm:$0xff]  }
 0x403   :  { %5502 = vmatpush1.bf16.msra.mxu0 %v8260_v3  ;;  %5584 = vmatpush1.bf16.msra.mxu1 %v8263_v61  ;;  %v8334_v3 = vld [vmem:[%s11174_s11 + $0xc4] ss:$8 sps:$4 sm:$0xff]   ;;  %v8332_v61 = vld [vmem:[%s11174_s11 + $0xc0] ss:$8 sps:$4 sm:$0xff]  }
 0x404   :  { %5503 = vmatprep.subr.bf16.mxu0 %v8268_v63  ;;  %5585 = vmatprep.subr.bf16.mxu1 %v8271_v11  ;;  %v8337_v63 = vld [vmem:[%s11174_s11 + $0xd4] ss:$8 sps:$4 sm:$0xff]   ;;  %v8335_v11 = vld [vmem:[%s11174_s11 + $0xd0] ss:$8 sps:$4 sm:$0xff]  }
 0x407   :  { %5504 = vmatpush1.bf16.msra.mxu0 %v8266_v8  ;;  %5586 = vmatpush1.bf16.msra.mxu1 %v8269_v18  ;;  %v8340_v8 = vld [vmem:[%s11174_s11 + $0xe4] ss:$8 sps:$4 sm:$0xff]   ;;  %v8338_v18 = vld [vmem:[%s11174_s11 + $0xe0] ss:$8 sps:$4 sm:$0xff]  }
 0x408   :  { %5505 = vmatprep.subr.bf16.mxu0 %v8274_v10  ;;  %5587 = vmatprep.subr.bf16.mxu1 %v8277_v12  ;;  %v8343_v10 = vld [vmem:[%s11174_s11 + $0xf4] ss:$8 sps:$4 sm:$0xff]   ;;  %v8341_v12 = vld [vmem:[%s11174_s11 + $0xf0] ss:$8 sps:$4 sm:$0xff]  }
 0x40b   :  { %5506 = vmatpush1.bf16.msra.mxu0 %v8272_v33  ;;  %5588 = vmatpush1.bf16.msra.mxu1 %v8275_v14  ;;  %v8346_v33 = vld [vmem:[%s11174_s11 + $0x104] ss:$8 sps:$4 sm:$0xff]  }
 0x40c   :  { %5507 = vmatprep.subr.bf16.mxu0 %v8280_v19  ;;  %5589 = vmatprep.subr.bf16.mxu1 %v8283_v20  ;;  %v8392_v14 = vld [vmem:[%s11176_s13 + $0x40] sm:$0xff]   ;;  %v8394_v20 = vld [vmem:[%s11176_s13 + $0x48] sm:$0xff]  }
 0x40d   :  { %v8393_v19 = vld [vmem:[%s11176_s13] sm:$0xff]  }
 0x40f   :  { %v4609_v23 = vpop.f32.mrb[24].mxu1  ;;  %5508 = vmatpush1.bf16.msra.mxu0 %v8278_v9  ;;  %5590 = vmatpush1.bf16.msra.mxu1 %v8281_v57  ;;  %v8395_v9 = vld [vmem:[%s11176_s13 + $0x8] sm:$0xff]   ;;  %v8396_v57 = vld [vmem:[%s11176_s13 + $0x50] sm:$0xff]  }
 0x410   :  { %v4610_v16 = vadd.f32 %v4609_v23, %v10691_v4  ;;  %v4611_v17 = vpop.f32.mrb[25].mxu1  ;;  %5509 = vmatprep.subr.bf16.mxu0 %v8286_v21  ;;  %5591 = vmatprep.subr.bf16.mxu1 %v8289_v22  ;;  %v8290_v4 = vld [vmem:[%s11173_s9 + $0x3e0] ss:$16 sps:$4 sm:$0xff]   ;;  %v8398_v22 = vld [vmem:[%s11176_s13 + $0x58] sm:$0xff]  }
 0x411   :  { %v4612_v25 = vadd.f32 %v4611_v17, %v10693_v5  ;;  %v4613_v1 = vpop.f32.mrb[26].mxu1  ;;  %v8298_v5 = vld [vmem:[%s11174_s11 + $0x4] ss:$8 sps:$4 sm:$0xff]   ;;  %v8397_v21 = vld [vmem:[%s11176_s13 + $0x10] sm:$0xff]  }
 0x412   :  { %v4640_v26 = vadd.f32 %v4629_v49, %v4610_v16  ;;  %v4614_v28 = vpop.f32.mrb[27].mxu1  ;;  %v8399_v49 = vld [vmem:[%s11176_s13 + $0x18] sm:$0xff]   ;;  %v8400_v23 = vld [vmem:[%s11176_s13 + $0x60] sm:$0xff]  }
 0x413   :  { %v4641_v59 = vadd.f32 %v4633_v7, %v4612_v25  ;;  %5510 = vmatpush1.bf16.msra.mxu0 %v8284_v55  ;;  %5592 = vmatpush1.bf16.msra.mxu1 %v8287_v39  ;;  %v8401_v7 = vld [vmem:[%s11176_s13 + $0x20] sm:$0xff]   ;;  %v8402_v55 = vld [vmem:[%s11176_s13 + $0x68] sm:$0xff]  }
 0x414   :  { %v4644_v13 = vmax.f32 %v4640_v26, 0.0  ;;  %5511 = vmatprep.subr.bf16.mxu0 %v8292_v24  ;;  %5593 = vmatprep.subr.bf16.mxu1 %v8295_v6  ;;  %v8403_v39 = vld [vmem:[%s11176_s13 + $0x28] sm:$0xff]   ;;  %v11036_v16 = vld [vmem:[%s11177_s10] sm:$0xf] }
 0x415   :  { %v4645_v30 = vmax.f32 %v4641_v59, 0.0  ;;  %v4783_v17 = vrot.slane %v11036_v16, %v9386_v51  ;;  %v4787_v24 = vrot.slane %v11036_v16, %v9389_v52  ;;  %v4795_v6 = vrot.slane %v11036_v16, %v9677_v29  ;;  %v8344_v29 = vld [vmem:[%s11174_s11 + $0x100] ss:$8 sps:$4 sm:$0xff]  }
 0x416   :  { %v4648_v43 = vpack.c.bf16 %v4644_v13, %v4644_v13 }
 0x417   :  { %v4649_v31 = vpack.c.bf16 %v4645_v30, %v4645_v30  ;;  %5512 = vmatpush1.bf16.msra.mxu0 %v8290_v4  ;;  %5594 = vmatpush1.bf16.msra.mxu1 %v8293_v15 }
 0x418   :  { %6008 = vmatprep.subr.bf16.mxu0 %v8298_v5  ;;  %7102 = vmatprep.subr.bf16.mxu1 %v8392_v14  ;;  %v8388_v14 = vld [vmem:[%s11174_s11 + $0x1e4] ss:$8 sps:$4 sm:$0xff]  }
 0x419   :  { %5513 = vmatprep.mubr.bf16.mxu0 %v4649_v31  ;;  %5595 = vmatprep.mubr.bf16.mxu1 %v4649_v31 }
 0x41a   :  { %5514 = vmatmul.mubr.bf16.vlgmr.msra.gmra.mrb[24].mxu0 %v4648_v43  ;;  %5596 = vmatmul.mubr.bf16.vlgmr.msra.gmra.mrb[28].mxu1 %v4648_v43 }
 0x41b   :  { %6009 = vmatpush1.bf16.msra.mxu0 %v8296_v32  ;;  %7103 = vmatpush3.bf16.msra.mxu1 %v8393_v19  ;;  %v8386_v19 = vld [vmem:[%s11174_s11 + $0x1e0] ss:$8 sps:$4 sm:$0xff]  }
 0x41c   :  { %6010 = vmatprep.subr.bf16.mxu0 %v8301_v34  ;;  %7104 = vmatprep.subr.bf16.mxu1 %v8394_v20 }
 0x41f   :  { %6011 = vmatpush1.bf16.msra.mxu0 %v8299_v35  ;;  %7105 = vmatpush3.bf16.msra.mxu1 %v8395_v9  ;;  %v8391_v9 = vld [vmem:[%s11174_s11 + $0x1f4] ss:$8 sps:$4 sm:$0xff]  }
 0x420   :  { %6012 = vmatprep.subr.bf16.mxu0 %v8304_v38  ;;  %7106 = vmatprep.subr.bf16.mxu1 %v8396_v57 }
 0x423   :  { %6013 = vmatpush1.bf16.msra.mxu0 %v8302_v56  ;;  %7107 = vmatpush3.bf16.msra.mxu1 %v8397_v21  ;;  %v8349_v56 = vld [vmem:[%s11174_s11 + $0x114] ss:$8 sps:$4 sm:$0xff]  }
 0x424   :  { %6014 = vmatprep.subr.bf16.mxu0 %v8307_v40  ;;  %7108 = vmatprep.subr.bf16.mxu1 %v8398_v22  ;;  %v8404_v22 = vld [vmem:[%s11176_s13 + $0x70] sm:$0xff]  }
 0x427   :  { %6015 = vmatpush1.bf16.msra.mxu0 %v8305_v41  ;;  %7109 = vmatpush3.bf16.msra.mxu1 %v8399_v49  ;;  %v8347_v41 = vld [vmem:[%s11174_s11 + $0x110] ss:$8 sps:$4 sm:$0xff]  }
 0x428   :  { %6016 = vmatprep.subr.bf16.mxu0 %v8310_v42  ;;  %7110 = vmatprep.subr.bf16.mxu1 %v8400_v23  ;;  %v8352_v42 = vld [vmem:[%s11174_s11 + $0x124] ss:$8 sps:$4 sm:$0xff]   ;;  %v8405_v49 = vld [vmem:[%s11176_s13 + $0x30] sm:$0xff]   ;;  %v8406_v23 = vld [vmem:[%s11176_s13 + $0x78] sm:$0xff]  }
 0x42b   :  { %6017 = vmatpush1.bf16.msra.mxu0 %v8308_v45  ;;  %7111 = vmatpush3.bf16.msra.mxu1 %v8401_v7  ;;  %v8350_v45 = vld [vmem:[%s11174_s11 + $0x120] ss:$8 sps:$4 sm:$0xff]   ;;  %v8407_v7 = vld [vmem:[%s11176_s13 + $0x38] sm:$0xff]  }
 0x42c   :  { %6018 = vmatprep.subr.bf16.mxu0 %v8313_v46  ;;  %7112 = vmatprep.subr.bf16.mxu1 %v8402_v55  ;;  %v8355_v46 = vld [vmem:[%s11174_s11 + $0x134] ss:$8 sps:$4 sm:$0xff]   ;;  %v5676_v55 = vld [vmem:[%s11178_s12] sm:$0x3] }
 0x42f   :  { %6019 = vmatpush1.bf16.msra.mxu0 %v8311_v47  ;;  %7113 = vmatpush3.bf16.msra.mxu1 %v8403_v39  ;;  %v8353_v47 = vld [vmem:[%s11174_s11 + $0x130] ss:$8 sps:$4 sm:$0xff]   ;;  %v5681_v39 = vrot.slane %v5676_v55, %v9386_v51 }
 0x430   :  { %6020 = vmatprep.subr.bf16.mxu0 %v8316_v48  ;;  %v8358_v48 = vld [vmem:[%s11174_s11 + $0x144] ss:$8 sps:$4 sm:$0xff]   ;;  %7114 = vmatprep.subr.bf16.mxu1 %v8404_v22 }
 0x433   :  { %6021 = vmatpush1.bf16.msra.mxu0 %v8314_v53  ;;  %v8356_v53 = vld [vmem:[%s11174_s11 + $0x140] ss:$8 sps:$4 sm:$0xff]   ;;  %7115 = vmatpush3.bf16.msra.mxu1 %v8405_v49 }
 0x434   :  { %6022 = vmatprep.subr.bf16.mxu0 %v8319_v54  ;;  %v8361_v54 = vld [vmem:[%s11174_s11 + $0x154] ss:$8 sps:$4 sm:$0xff]   ;;  %7116 = vmatprep.subr.bf16.mxu1 %v8406_v23 }
 0x437   :  { %6023 = vmatpush1.bf16.msra.mxu0 %v8317_v58  ;;  %v8359_v58 = vld [vmem:[%s11174_s11 + $0x150] ss:$8 sps:$4 sm:$0xff]   ;;  %7117 = vmatpush3.bf16.msra.mxu1 %v8407_v7 }
 0x438   :  { %6024 = vmatprep.subr.bf16.mxu0 %v8322_v36  ;;  %v8364_v36 = vld [vmem:[%s11174_s11 + $0x164] ss:$8 sps:$4 sm:$0xff]  }
 0x43b   :  { %6025 = vmatpush1.bf16.msra.mxu0 %v8320_v60  ;;  %v8362_v60 = vld [vmem:[%s11174_s11 + $0x160] ss:$8 sps:$4 sm:$0xff]  }
 0x43c   :  { %6026 = vmatprep.subr.bf16.mxu0 %v8325_v62  ;;  %v8367_v62 = vld [vmem:[%s11174_s11 + $0x174] ss:$8 sps:$4 sm:$0xff]  }
 0x43f   :  { %6027 = vmatpush1.bf16.msra.mxu0 %v8323_v50  ;;  %v8365_v50 = vld [vmem:[%s11174_s11 + $0x170] ss:$8 sps:$4 sm:$0xff]  }
 0x440   :  { %6028 = vmatprep.subr.bf16.mxu0 %v8328_v0  ;;  %v8370_v0 = vld [vmem:[%s11174_s11 + $0x184] ss:$8 sps:$4 sm:$0xff]  }
 0x443   :  { %6029 = vmatpush1.bf16.msra.mxu0 %v8326_v44  ;;  %v8368_v44 = vld [vmem:[%s11174_s11 + $0x180] ss:$8 sps:$4 sm:$0xff]  }
 0x444   :  { %6030 = vmatprep.subr.bf16.mxu0 %v8331_v37  ;;  %v8373_v37 = vld [vmem:[%s11174_s11 + $0x194] ss:$8 sps:$4 sm:$0xff]  }
 0x447   :  { %6031 = vmatpush1.bf16.msra.mxu0 %v8329_v2  ;;  %v8371_v2 = vld [vmem:[%s11174_s11 + $0x190] ss:$8 sps:$4 sm:$0xff]  }
 0x448   :  { %6032 = vmatprep.subr.bf16.mxu0 %v8334_v3  ;;  %v8376_v3 = vld [vmem:[%s11174_s11 + $0x1a4] ss:$8 sps:$4 sm:$0xff]  }
 0x44b   :  { %6033 = vmatpush1.bf16.msra.mxu0 %v8332_v61  ;;  %v8374_v61 = vld [vmem:[%s11174_s11 + $0x1a0] ss:$8 sps:$4 sm:$0xff]  }
 0x44c   :  { %6034 = vmatprep.subr.bf16.mxu0 %v8337_v63  ;;  %v8379_v63 = vld [vmem:[%s11174_s11 + $0x1b4] ss:$8 sps:$4 sm:$0xff]  }
 0x44f   :  { %6035 = vmatpush1.bf16.msra.mxu0 %v8335_v11  ;;  %v8377_v11 = vld [vmem:[%s11174_s11 + $0x1b0] ss:$8 sps:$4 sm:$0xff]  }
 0x450   :  { %6036 = vmatprep.subr.bf16.mxu0 %v8340_v8  ;;  %v8382_v8 = vld [vmem:[%s11174_s11 + $0x1c4] ss:$8 sps:$4 sm:$0xff]  }
 0x453   :  { %6037 = vmatpush1.bf16.msra.mxu0 %v8338_v18  ;;  %v8380_v18 = vld [vmem:[%s11174_s11 + $0x1c0] ss:$8 sps:$4 sm:$0xff]  }
 0x454   :  { %6038 = vmatprep.subr.bf16.mxu0 %v8343_v10  ;;  %v8385_v10 = vld [vmem:[%s11174_s11 + $0x1d4] ss:$8 sps:$4 sm:$0xff]  }
 0x457   :  { %6039 = vmatpush1.bf16.msra.mxu0 %v8341_v12  ;;  %v8383_v12 = vld [vmem:[%s11174_s11 + $0x1d0] ss:$8 sps:$4 sm:$0xff]  }
 0x458   :  { %6049 = vmatprep.subr.bf16.mxu0 %v8346_v33  ;;  %v4791_v33 = vrot.slane %v11036_v16, %v9671_v27  ;;  %v8389_v27 = vld [vmem:[%s11174_s11 + $0x1f0] ss:$8 sps:$4 sm:$0xff]   ;;  %v5685_v16 = vrot.slane %v5676_v55, %v9389_v52 }
 0x4ed   :  { %v5515_v25 = vpop.f32.mrb[24].mxu0  ;;  %v11044_v1 = vpop.f32.mrb[28].mxu1 }
 0x4ee   :  { %v7134_v26 = vadd.f32 %v5515_v25, %v4783_v17  ;;  %v5517_v28 = vpop.f32.mrb[25].mxu0  ;;  %v5599_v59 = vpop.f32.mrb[29].mxu1  ;;  %v7136_v20 = vadd.f32 %v11044_v1, %v4791_v33 }
 0x4ef   :  { %v7135_v4 = vadd.f32 %v5517_v28, %v4787_v24  ;;  %v7137_v15 = vadd.f32 %v5599_v59, %v4795_v6  ;;  %v5519_v13 = vpop.f32.mrb[26].mxu0  ;;  %v5601_v5 = vpop.f32.mrb[30].mxu1 }
 0x4f0   :  { %v5604_v30 = vmax.f32 %v7134_v26, 0.0  ;;  %v5520_v31 = vpop.f32.mrb[27].mxu0  ;;  %v5602_v32 = vpop.f32.mrb[31].mxu1  ;;  %v5606_v57 = vmax.f32 %v7136_v20, 0.0  ;;  %v7085_v5 = vld [vmem:[%s11179_s14] ss:$0 sm:$0xff] }
 0x4f1   :  { %v5605_v43 = vmax.f32 %v7135_v4, 0.0  ;;  %v5607_v34 = vmax.f32 %v7137_v15, 0.0 }
 0x4f2   :  { %v5608_v38 = vpack.c.bf16 %v5604_v30, %v5604_v30  ;;  %v5610_v21 = vpack.c.bf16 %v5606_v57, %v5606_v57 }
 0x4f3   :  { %v5609_v35 = vpack.c.bf16 %v5605_v43, %v5605_v43  ;;  %v5611_v40 = vpack.c.bf16 %v5607_v34, %v5607_v34 }
 0x4f5   :  { %6040 = vmatprep.mubr.bf16.mxu0 %v5609_v35 }
 0x4f6   :  { %6041 = vmatmul.mubr.bf16.vlgmr.msra.gmra.mrb[28].mxu0 %v5608_v38 }
 0x4f7   :  { %6050 = vmatpush1.bf16.msra.mxu0 %v8344_v29  ;;  %6081 = vmatprep.mubr.bf16.mxu0 %v5611_v40 }
 0x4f8   :  { %6051 = vmatprep.subr.bf16.mxu0 %v8349_v56 }
 0x4fb   :  { %6052 = vmatpush1.bf16.msra.mxu0 %v8347_v41 }
 0x4fc   :  { %6053 = vmatprep.subr.bf16.mxu0 %v8352_v42 }
 0x4ff   :  { %6054 = vmatpush1.bf16.msra.mxu0 %v8350_v45 }
 0x500   :  { %6055 = vmatprep.subr.bf16.mxu0 %v8355_v46 }
 0x503   :  { %6056 = vmatpush1.bf16.msra.mxu0 %v8353_v47 }
 0x504   :  { %6057 = vmatprep.subr.bf16.mxu0 %v8358_v48 }
 0x507   :  { %6058 = vmatpush1.bf16.msra.mxu0 %v8356_v53 }
 0x508   :  { %6059 = vmatprep.subr.bf16.mxu0 %v8361_v54 }
 0x50b   :  { %6060 = vmatpush1.bf16.msra.mxu0 %v8359_v58 }
 0x50c   :  { %6061 = vmatprep.subr.bf16.mxu0 %v8364_v36 }
 0x50f   :  { %6062 = vmatpush1.bf16.msra.mxu0 %v8362_v60 }
 0x510   :  { %6063 = vmatprep.subr.bf16.mxu0 %v8367_v62 }
 0x513   :  { %6064 = vmatpush1.bf16.msra.mxu0 %v8365_v50 }
 0x514   :  { %6065 = vmatprep.subr.bf16.mxu0 %v8370_v0 }
 0x517   :  { %6066 = vmatpush1.bf16.msra.mxu0 %v8368_v44 }
 0x518   :  { %6067 = vmatprep.subr.bf16.mxu0 %v8373_v37 }
 0x51b   :  { %6068 = vmatpush1.bf16.msra.mxu0 %v8371_v2 }
 0x51c   :  { %6069 = vmatprep.subr.bf16.mxu0 %v8376_v3 }
 0x51f   :  { %6070 = vmatpush1.bf16.msra.mxu0 %v8374_v61 }
 0x520   :  { %6071 = vmatprep.subr.bf16.mxu0 %v8379_v63 }
 0x523   :  { %6072 = vmatpush1.bf16.msra.mxu0 %v8377_v11 }
 0x524   :  { %6073 = vmatprep.subr.bf16.mxu0 %v8382_v8 }
 0x527   :  { %6074 = vmatpush1.bf16.msra.mxu0 %v8380_v18 }
 0x528   :  { %6075 = vmatprep.subr.bf16.mxu0 %v8385_v10 }
 0x52b   :  { %6076 = vmatpush1.bf16.msra.mxu0 %v8383_v12 }
 0x52c   :  { %6077 = vmatprep.subr.bf16.mxu0 %v8388_v14 }
 0x52f   :  { %6078 = vmatpush1.bf16.msra.mxu0 %v8386_v19 }
 0x530   :  { %6079 = vmatprep.subr.bf16.mxu0 %v8391_v9 }
 0x533   :  { %6080 = vmatpush1.bf16.msra.mxu0 %v8389_v27 }
 0x536   :  { %6082 = vmatmul.mubr.bf16.vlgmr.msra.gmra.mrb[28].mxu0 %v5610_v21 }
 0x609   :  { %v6083_v17 = vpop.f32.mrb[28].mxu0 }
 0x60a   :  { %v7138_v24 = vadd.f32 %v6083_v17, %v5681_v39  ;;  %v6085_v6 = vpop.f32.mrb[29].mxu0 }
 0x60b   :  { %v7139_v25 = vadd.f32 %v6085_v6, %v5685_v16  ;;  %v6087_v1 = vpop.f32.mrb[30].mxu0 }
 0x60c   :  { %v6090_v26 = vmax.f32 %v7138_v24, 0.0  ;;  %v6088_v28 = vpop.f32.mrb[31].mxu0 }
 0x60d   :  { %v6091_v59 = vmax.f32 %v7139_v25, 0.0 }
 0x60e   :  { %v6092_v15 = vpack.c.bf16 %v6090_v26, %v6090_v26 }
 0x60f   :  { %v6093_v4 = vpack.c.bf16 %v6091_v59, %v6091_v59 }
 0x611   :  { %6261 = vmatprep.mubr.bf16.mxu1 %v6093_v4 }
 0x612   :  { %6262 = vmatmul.mubr.bf16.vlgmr.msra.gmra.mrb[32].mxu1 %v6092_v15 }
 0x6e5   :  { %v7118_v13 = vpop.f32.mrb[32].mxu1 }
 0x6e6   :  { %v7119_v51 = vpop.f32.mrb[33].mxu1 }
 0x6e7   :  { %v7120_v30 = vadd.f32 %v7119_v51, %v7118_v13  ;;  %v7121_v52 = vpop.f32.mrb[34].mxu1 }
 0x6e8   :  { %v7122_v31 = vpop.f32.mrb[35].mxu1 }
 0x6e9   :  { %v6264_v32 = vadd.f32 %v7120_v30, %v7085_v5 }
 0x6eb   :  { %6269 = vst [vmem:[%s11180_s15] sm:$0xff] %v6264_v32 }

</bundles_post_ra>
